<compile_context>
chip_gen: v5e
topology: v5e:2x2
jax: 0.10.0
libtpu: 0.0.40
codegen_flags: <defaults>
</compile_context>

<pallas_src>
import functools

import jax
import jax.numpy as jnp
import numpy as np
from jax.experimental import pallas as pl
from jax.experimental.pallas import tpu as pltpu

EPS_WS = 1e-5   # StdConv2d weight-standardization eps
EPS_BN = 1e-5   # nn.BatchNorm2d default eps
LANE = 128      # TPU lane width: channels are padded to a multiple of this
_OFF = 8        # interior column offset in the padded scratch (sublane-aligned)

_COMPILER_PARAMS = pltpu.CompilerParams(
    dimension_semantics=("parallel",),      # batch grid axis -> megacore split
    vmem_limit_bytes=48 * 1024 * 1024,      # safe on v5e/v6e (128 MiB) and v7x (64 MiB)
)


def _round_up(v, m):
    return (v + m - 1) // m * m


# ----------------------------- Pallas kernels ------------------------------ #

def _conv3x3_acc(a_scr, w_ref, H, W, C):
    """3x3 'same' conv over the zero-haloed scratch as 9 accumulated MXU
    matmuls: bf16 (H*W, C) x bf16 (C, C) -> f32 accumulator (H*W, C).

    Scratch layout: rows 1..H hold the image, row 0 / row H+1 are the zero
    halo; columns _OFF.._OFF+W-1 hold the image, columns _OFF-1 / _OFF+W are
    the zero halo (interior starts at a sublane-aligned offset)."""
    acc = None
    for kh in range(3):
        for kw in range(3):
            c0 = _OFF - 1 + kw
            patch = a_scr[kh:kh + H, c0:c0 + W, :]
            patch = patch.reshape(H * W, C).astype(jnp.bfloat16)
            term = jnp.dot(patch, w_ref[kh, kw, :, :],
                           preferred_element_type=jnp.float32)
            acc = term if acc is None else acc + term
    return acc                                            # (H*W, C) float32


def _write_stats(acc, stat_ref, inv_hw, C):
    """Pack per-image channel sum (sublane 0) and centered sum-of-squares
    (sublane 1) into one (1, 8, C) f32 stats output."""
    s = jnp.sum(acc, axis=0, keepdims=True)               # (1, C)
    d = acc - s * inv_hw                                   # centered
    q = jnp.sum(d * d, axis=0, keepdims=True)              # (1, C)
    row = jax.lax.broadcasted_iota(jnp.int32, (8, C), 0)
    packed = jnp.where(row == 0, jnp.broadcast_to(s, (8, C)),
                       jnp.where(row == 1, jnp.broadcast_to(q, (8, C)), 0.0))
    stat_ref[...] = packed.reshape(1, 8, C)


def _conv1_kernel(x_ref, w_ref, y_ref, stat_ref, a_scr, *, H, W, C):
    """conv1 (standardized weights) + per-image BN1 partial statistics."""
    a_scr[...] = jnp.zeros_like(a_scr)                     # zero halo (VMEM-only)
    a_scr[1:H + 1, _OFF:_OFF + W, :] = x_ref[0]            # aligned interior store
    acc = _conv3x3_acc(a_scr, w_ref, H, W, C)
    y_ref[...] = acc.reshape(1, H, W, C).astype(jnp.bfloat16)
    _write_stats(acc, stat_ref, 1.0 / (H * W), C)


def _bn_relu_conv2_kernel(y1_ref, scale_ref, bias_ref, w_ref,
                          y_ref, stat_ref, a_scr, *, H, W, C):
    """bn1 (folded scale/bias) + relu + conv2 + per-image BN2 partial stats.
    The halo stays zero because only the interior of the scratch is written."""
    a_scr[...] = jnp.zeros_like(a_scr)
    scale = scale_ref[...].reshape(1, 1, C)
    bias = bias_ref[...].reshape(1, 1, C)
    a = jnp.maximum(y1_ref[0].astype(jnp.float32) * scale + bias, 0.0)
    a_scr[1:H + 1, _OFF:_OFF + W, :] = a
    acc = _conv3x3_acc(a_scr, w_ref, H, W, C)
    y_ref[...] = acc.reshape(1, H, W, C).astype(jnp.bfloat16)
    _write_stats(acc, stat_ref, 1.0 / (H * W), C)


def _bn_add_relu_kernel(y2_ref, scale_ref, bias_ref, x_ref, out_ref, *, C):
    """bn2 (folded scale/bias) + residual add + relu."""
    scale = scale_ref[...].reshape(1, 1, 1, C)
    bias = bias_ref[...].reshape(1, 1, 1, C)
    out_ref[...] = jnp.maximum(
        y2_ref[...].astype(jnp.float32) * scale + bias + x_ref[...], 0.0)


# ------------------------------ JAX wrapper -------------------------------- #

def standardize_weight(w_oihw):
    """StdConv2d weight standardization (torch.var_mean over [1,2,3], unbiased=False)."""
    m = jnp.mean(w_oihw, axis=(1, 2, 3), keepdims=True)
    v = jnp.mean((w_oihw - m) ** 2, axis=(1, 2, 3), keepdims=True)
    return (w_oihw - m) / jnp.sqrt(v + EPS_WS)


def _prep_conv_weight(w_oihw, ci_pad, co_pad):
    """Standardize, pad channels, lay out as (kh, kw, Cin_pad, Cout_pad) bf16."""
    cout, cin = w_oihw.shape[0], w_oihw.shape[1]
    w = jnp.transpose(standardize_weight(w_oihw.astype(jnp.float32)), (2, 3, 1, 0))
    w = jnp.pad(w, ((0, 0), (0, 0), (0, ci_pad - cin), (0, co_pad - cout)))
    return w.astype(jnp.bfloat16)


def _bn_scale_bias(stats, gamma_p, beta_p, hw, n_imgs):
    """Reduce per-image partials -> per-channel BN (training-stats) scale/bias.
    Uses a Chan-style pairwise combination (per-image centered sumsq), avoiding
    E[x^2] - E[x]^2 cancellation."""
    s = stats[:, 0, :]                                     # (N, Cp) per-image sums
    q = stats[:, 1, :]                                     # (N, Cp) centered sumsq
    mu_i = s / hw                                          # per-image means
    mu = jnp.mean(mu_i, axis=0)                            # (Cp,) batch mean
    m2 = jnp.sum(q, axis=0) + hw * jnp.sum((mu_i - mu[None, :]) ** 2, axis=0)
    var = jnp.maximum(m2 / (hw * n_imgs), 0.0)             # biased batch variance
    scale = gamma_p * jax.lax.rsqrt(var + EPS_BN)
    bias = beta_p - mu * scale
    return scale.reshape(1, -1), bias.reshape(1, -1)


@jax.jit
def resnet_basic_block(x_nchw, w1_oihw, w2_oihw, gamma1, beta1, gamma2, beta2):
    # TODO(synk): stride > 1 / downsample path not implemented (this instance uses
    #             stride=1, downsample=None, which also requires Cin == Cout).
    # TODO(synk): BatchNorm running_mean / running_var buffers are not updated
    #             (pure forward replication of training-mode batch statistics).
    N, Cin, H, W = x_nchw.shape
    Cout = w1_oihw.shape[0]
    assert Cin == Cout, "residual path requires inplanes == planes (downsample=None)"
    Cp = _round_up(Cout, LANE)                 # lane-dense channel count
    hw = float(H * W)

    # Tiny parameter / layout prep (plain JAX glue).
    w1m = _prep_conv_weight(w1_oihw, Cp, Cp)   # (3, 3, Cp, Cp) bf16
    w2m = _prep_conv_weight(w2_oihw, Cp, Cp)
    g1p = jnp.pad(gamma1.astype(jnp.float32), (0, Cp - Cout))
    b1p = jnp.pad(beta1.astype(jnp.float32), (0, Cp - Cout))
    g2p = jnp.pad(gamma2.astype(jnp.float32), (0, Cp - Cout))
    b2p = jnp.pad(beta2.astype(jnp.float32), (0, Cp - Cout))

    # Single NHWC channel-pad of the input; NO halo pad in HBM (halo built
    # in-kernel).  xr is both pass A's input and pass C's residual.
    xr = jnp.pad(jnp.transpose(x_nchw, (0, 2, 3, 1)).astype(jnp.float32),
                 ((0, 0), (0, 0), (0, 0), (0, Cp - Cin)))            # (N,H,W,Cp)

    img_spec = pl.BlockSpec((1, H, W, Cp), lambda n: (n, 0, 0, 0))
    stat_spec = pl.BlockSpec((1, 8, Cp), lambda n: (n, 0, 0))
    w_spec = pl.BlockSpec((3, 3, Cp, Cp), lambda n: (0, 0, 0, 0))
    vec_spec = pl.BlockSpec((1, Cp), lambda n: (0, 0))

    act_shape = jax.ShapeDtypeStruct((N, H, W, Cp), jnp.bfloat16)    # bf16 handoffs
    out_shape = jax.ShapeDtypeStruct((N, H, W, Cp), jnp.float32)
    stat_shape = jax.ShapeDtypeStruct((N, 8, Cp), jnp.float32)
    # Padded activation scratch: rows 0 / H+1 and cols _OFF-1 / _OFF+W are the
    # zero halo; interior starts at sublane-aligned column _OFF.
    pad_scr = pltpu.VMEM((H + 2, W + _OFF + 1, Cp), jnp.float32)

    # ---- pass A: conv1 + BN1 partial stats (grid over batch, pipelined) ----
    y1, st1 = pl.pallas_call(
        functools.partial(_conv1_kernel, H=H, W=W, C=Cp),
        out_shape=(act_shape, stat_shape),
        grid=(N,),
        in_specs=[img_spec, w_spec],
        out_specs=(img_spec, stat_spec),
        scratch_shapes=[pad_scr],
        compiler_params=_COMPILER_PARAMS,
    )(xr, w1m)

    scale1, bias1 = _bn_scale_bias(st1, g1p, b1p, hw, N)

    # ---- pass B: bn1 + relu + conv2 + BN2 partial stats ----
    y2, st2 = pl.pallas_call(
        functools.partial(_bn_relu_conv2_kernel, H=H, W=W, C=Cp),
        out_shape=(act_shape, stat_shape),
        grid=(N,),
        in_specs=[img_spec, vec_spec, vec_spec, w_spec],
        out_specs=(img_spec, stat_spec),
        scratch_shapes=[pad_scr],
        compiler_params=_COMPILER_PARAMS,
    )(y1, scale1, bias1, w2m)

    scale2, bias2 = _bn_scale_bias(st2, g2p, b2p, hw, N)

    # ---- pass C: bn2 + residual add + relu (output aliases the residual) ----
    out = pl.pallas_call(
        functools.partial(_bn_add_relu_kernel, C=Cp),
        out_shape=out_shape,
        grid=(N,),
        in_specs=[img_spec, vec_spec, vec_spec, img_spec],
        out_specs=img_spec,
        input_output_aliases={3: 0},          # xr (dead after this call) -> out
        compiler_params=_COMPILER_PARAMS,
    )(y2, scale2, bias2, xr)

    return jnp.transpose(out[..., :Cout], (0, 3, 1, 2))              # back to NCHW


# --------------------------- pure-JAX reference ---------------------------- #

def reference_block(x, w1, w2, g1, b1, g2, b2):
    def conv(inp, w):
        return jax.lax.conv_general_dilated(
            inp, w, window_strides=(1, 1), padding=((1, 1), (1, 1)),
            dimension_numbers=('NCHW', 'OIHW', 'NCHW'))

    def bn(y, g, b):
        m = jnp.mean(y, axis=(0, 2, 3), keepdims=True)
        v = jnp.mean((y - m) ** 2, axis=(0, 2, 3), keepdims=True)
        return ((y - m) / jnp.sqrt(v + EPS_BN)) * g.reshape(1, -1, 1, 1) \
            + b.reshape(1, -1, 1, 1)

    out = conv(x, standardize_weight(w1))
    out = jnp.maximum(bn(out, g1, b1), 0.0)
    out = conv(out, standardize_weight(w2))
    out = bn(out, g2, b2)
    return jnp.maximum(out + x, 0.0)


# ---------------------------------- main ----------------------------------- #

if __name__ == "__main__":
    N, Cin, H, W = 2, 4, 16, 16
    planes = 4   # inplanes == planes, stride=1, downsample=None

    key = jax.random.PRNGKey(0)
    kx, k1, k2 = jax.random.split(key, 3)
    x = jax.random.normal(kx, (N, Cin, H, W), jnp.float32)

    # kaiming_normal_(mode='fan_out', nonlinearity='relu'): std = sqrt(2 / (Cout*3*3))
    std = float(np.sqrt(2.0 / (planes * 9)))
    w1 = std * jax.random.normal(k1, (planes, Cin, 3, 3), jnp.float32)
    w2 = std * jax.random.normal(k2, (planes, planes, 3, 3), jnp.float32)

    gamma1 = jnp.ones((planes,), jnp.float32)
    beta1 = jnp.zeros((planes,), jnp.float32)
    gamma2 = jnp.ones((planes,), jnp.float32)
    beta2 = jnp.zeros((planes,), jnp.float32)

    out = jax.block_until_ready(
        resnet_basic_block(x, w1, w2, gamma1, beta1, gamma2, beta2))
    ref = jax.block_until_ready(
        reference_block(x, w1, w2, gamma1, beta1, gamma2, beta2))

    assert out.shape == (N, planes, H, W), out.shape
    np.testing.assert_allclose(np.asarray(out), np.asarray(ref), rtol=3e-2, atol=3e-2)
    print("KERNEL_OK")
</pallas_src>

<mosaic_0001>
module attributes {stable_mosaic.version = 11 : i64} {
  func.func @_conv1_kernel(%arg0: i32, %arg1: memref<1x16x16x128xf32, #tpu.memory_space<vmem>>, %arg2: memref<3x3x128x128xbf16, #tpu.memory_space<vmem>>, %arg3: memref<1x16x16x128xbf16, #tpu.memory_space<vmem>>, %arg4: memref<1x8x128xf32, #tpu.memory_space<vmem>>, %arg5: memref<18x25x128xf32, #tpu.memory_space<vmem>>) attributes {dimension_semantics = [#tpu.dimension_semantics<parallel>], iteration_bounds = array<i64: 2>, scalar_prefetch = 0 : i64, scratch_operands = 1 : i64, tpu.core_type = #tpu.core_type<tc>, window_params = [{transform_indices = @transform_0, window_bounds = array<i64: 1, 16, 16, 128>}, {pipeline_mode = #tpu.pipeline_mode<synchronous>, transform_indices = @transform_1, window_bounds = array<i64: 3, 3, 128, 128>}, {transform_indices = @transform_2, window_bounds = array<i64: 1, 16, 16, 128>}, {transform_indices = @transform_3, window_bounds = array<i64: 1, 8, 128>}]} {
    %cst = arith.constant 0.000000e+00 : f32
    %0 = vector.broadcast %cst : f32 to vector<18x25x128xf32>
    %c0 = arith.constant 0 : index
    %c0_0 = arith.constant 0 : index
    %c0_1 = arith.constant 0 : index
    %1 = vector.load %arg5[%c0, %c0_0, %c0_1] : memref<18x25x128xf32, #tpu.memory_space<vmem>>, vector<18x25x128xf32>
    tpu.vector_store %arg5[%c0, %c0_0, %c0_1], %0 {strides = array<i32>} : memref<18x25x128xf32, #tpu.memory_space<vmem>>, vector<18x25x128xf32>,
    %c0_2 = arith.constant 0 : index
    %c0_3 = arith.constant 0 : index
    %c0_4 = arith.constant 0 : index
    %c0_5 = arith.constant 0 : index
    %2 = vector.load %arg1[%c0_2, %c0_3, %c0_4, %c0_5] : memref<1x16x16x128xf32, #tpu.memory_space<vmem>>, vector<1x16x16x128xf32>
    %3 = vector.shape_cast %2 : vector<1x16x16x128xf32> to vector<16x16x128xf32>
    %c1 = arith.constant 1 : index
    %c8 = arith.constant 8 : index
    %c0_6 = arith.constant 0 : index
    %4 = vector.load %arg5[%c1, %c8, %c0_6] : memref<18x25x128xf32, #tpu.memory_space<vmem>>, vector<16x16x128xf32>
    tpu.vector_store %arg5[%c1, %c8, %c0_6], %3 {strides = array<i32>} : memref<18x25x128xf32, #tpu.memory_space<vmem>>, vector<16x16x128xf32>,
    %c0_7 = arith.constant 0 : index
    %c7 = arith.constant 7 : index
    %c0_8 = arith.constant 0 : index
    %5 = vector.load %arg5[%c0_7, %c7, %c0_8] : memref<18x25x128xf32, #tpu.memory_space<vmem>>, vector<16x16x128xf32>
    %6 = vector.shape_cast %5 : vector<16x16x128xf32> to vector<256x128xf32>
    %7 = arith.truncf %6 : vector<256x128xf32> to vector<256x128xbf16>
    %c0_9 = arith.constant 0 : index
    %c0_10 = arith.constant 0 : index
    %c0_11 = arith.constant 0 : index
    %c0_12 = arith.constant 0 : index
    %8 = vector.load %arg2[%c0_9, %c0_10, %c0_11, %c0_12] : memref<3x3x128x128xbf16, #tpu.memory_space<vmem>>, vector<1x1x128x128xbf16>
    %9 = vector.shape_cast %8 : vector<1x1x128x128xbf16> to vector<128x128xbf16>
    %cst_13 = arith.constant dense<0.000000e+00> : vector<256x128xf32>
    %10 = tpu.matmul %7, %9, %cst_13 {dimension_numbers = #tpu.dot_dimension_numbers<[1], [0], [0], [1], [0, 0, 1, 1], [], []>} : vector<256x128xbf16>, vector<128x128xbf16>, vector<256x128xf32> -> vector<256x128xf32>
    %c0_14 = arith.constant 0 : index
    %c8_15 = arith.constant 8 : index
    %c0_16 = arith.constant 0 : index
    %11 = vector.load %arg5[%c0_14, %c8_15, %c0_16] : memref<18x25x128xf32, #tpu.memory_space<vmem>>, vector<16x16x128xf32>
    %12 = vector.shape_cast %11 : vector<16x16x128xf32> to vector<256x128xf32>
    %13 = arith.truncf %12 : vector<256x128xf32> to vector<256x128xbf16>
    %c0_17 = arith.constant 0 : index
    %c1_18 = arith.constant 1 : index
    %c0_19 = arith.constant 0 : index
    %c0_20 = arith.constant 0 : index
    %14 = vector.load %arg2[%c0_17, %c1_18, %c0_19, %c0_20] : memref<3x3x128x128xbf16, #tpu.memory_space<vmem>>, vector<1x1x128x128xbf16>
    %15 = vector.shape_cast %14 : vector<1x1x128x128xbf16> to vector<128x128xbf16>
    %cst_21 = arith.constant dense<0.000000e+00> : vector<256x128xf32>
    %16 = tpu.matmul %13, %15, %cst_21 {dimension_numbers = #tpu.dot_dimension_numbers<[1], [0], [0], [1], [0, 0, 1, 1], [], []>} : vector<256x128xbf16>, vector<128x128xbf16>, vector<256x128xf32> -> vector<256x128xf32>
    %17 = arith.addf %10, %16 : vector<256x128xf32>
    %c0_22 = arith.constant 0 : index
    %c9 = arith.constant 9 : index
    %c0_23 = arith.constant 0 : index
    %18 = vector.load %arg5[%c0_22, %c9, %c0_23] : memref<18x25x128xf32, #tpu.memory_space<vmem>>, vector<16x16x128xf32>
    %19 = vector.shape_cast %18 : vector<16x16x128xf32> to vector<256x128xf32>
    %20 = arith.truncf %19 : vector<256x128xf32> to vector<256x128xbf16>
    %c0_24 = arith.constant 0 : index
    %c2 = arith.constant 2 : index
    %c0_25 = arith.constant 0 : index
    %c0_26 = arith.constant 0 : index
    %21 = vector.load %arg2[%c0_24, %c2, %c0_25, %c0_26] : memref<3x3x128x128xbf16, #tpu.memory_space<vmem>>, vector<1x1x128x128xbf16>
    %22 = vector.shape_cast %21 : vector<1x1x128x128xbf16> to vector<128x128xbf16>
    %cst_27 = arith.constant dense<0.000000e+00> : vector<256x128xf32>
    %23 = tpu.matmul %20, %22, %cst_27 {dimension_numbers = #tpu.dot_dimension_numbers<[1], [0], [0], [1], [0, 0, 1, 1], [], []>} : vector<256x128xbf16>, vector<128x128xbf16>, vector<256x128xf32> -> vector<256x128xf32>
    %24 = arith.addf %17, %23 : vector<256x128xf32>
    %c1_28 = arith.constant 1 : index
    %c7_29 = arith.constant 7 : index
    %c0_30 = arith.constant 0 : index
    %25 = vector.load %arg5[%c1_28, %c7_29, %c0_30] : memref<18x25x128xf32, #tpu.memory_space<vmem>>, vector<16x16x128xf32>
    %26 = vector.shape_cast %25 : vector<16x16x128xf32> to vector<256x128xf32>
    %27 = arith.truncf %26 : vector<256x128xf32> to vector<256x128xbf16>
    %c1_31 = arith.constant 1 : index
    %c0_32 = arith.constant 0 : index
    %c0_33 = arith.constant 0 : index
    %c0_34 = arith.constant 0 : index
    %28 = vector.load %arg2[%c1_31, %c0_32, %c0_33, %c0_34] : memref<3x3x128x128xbf16, #tpu.memory_space<vmem>>, vector<1x1x128x128xbf16>
    %29 = vector.shape_cast %28 : vector<1x1x128x128xbf16> to vector<128x128xbf16>
    %cst_35 = arith.constant dense<0.000000e+00> : vector<256x128xf32>
    %30 = tpu.matmul %27, %29, %cst_35 {dimension_numbers = #tpu.dot_dimension_numbers<[1], [0], [0], [1], [0, 0, 1, 1], [], []>} : vector<256x128xbf16>, vector<128x128xbf16>, vector<256x128xf32> -> vector<256x128xf32>
    %31 = arith.addf %24, %30 : vector<256x128xf32>
    %c1_36 = arith.constant 1 : index
    %c8_37 = arith.constant 8 : index
    %c0_38 = arith.constant 0 : index
    %32 = vector.load %arg5[%c1_36, %c8_37, %c0_38] : memref<18x25x128xf32, #tpu.memory_space<vmem>>, vector<16x16x128xf32>
    %33 = vector.shape_cast %32 : vector<16x16x128xf32> to vector<256x128xf32>
    %34 = arith.truncf %33 : vector<256x128xf32> to vector<256x128xbf16>
    %c1_39 = arith.constant 1 : index
    %c1_40 = arith.constant 1 : index
    %c0_41 = arith.constant 0 : index
    %c0_42 = arith.constant 0 : index
    %35 = vector.load %arg2[%c1_39, %c1_40, %c0_41, %c0_42] : memref<3x3x128x128xbf16, #tpu.memory_space<vmem>>, vector<1x1x128x128xbf16>
    %36 = vector.shape_cast %35 : vector<1x1x128x128xbf16> to vector<128x128xbf16>
    %cst_43 = arith.constant dense<0.000000e+00> : vector<256x128xf32>
    %37 = tpu.matmul %34, %36, %cst_43 {dimension_numbers = #tpu.dot_dimension_numbers<[1], [0], [0], [1], [0, 0, 1, 1], [], []>} : vector<256x128xbf16>, vector<128x128xbf16>, vector<256x128xf32> -> vector<256x128xf32>
    %38 = arith.addf %31, %37 : vector<256x128xf32>
    %c1_44 = arith.constant 1 : index
    %c9_45 = arith.constant 9 : index
    %c0_46 = arith.constant 0 : index
    %39 = vector.load %arg5[%c1_44, %c9_45, %c0_46] : memref<18x25x128xf32, #tpu.memory_space<vmem>>, vector<16x16x128xf32>
    %40 = vector.shape_cast %39 : vector<16x16x128xf32> to vector<256x128xf32>
    %41 = arith.truncf %40 : vector<256x128xf32> to vector<256x128xbf16>
    %c1_47 = arith.constant 1 : index
    %c2_48 = arith.constant 2 : index
    %c0_49 = arith.constant 0 : index
    %c0_50 = arith.constant 0 : index
    %42 = vector.load %arg2[%c1_47, %c2_48, %c0_49, %c0_50] : memref<3x3x128x128xbf16, #tpu.memory_space<vmem>>, vector<1x1x128x128xbf16>
    %43 = vector.shape_cast %42 : vector<1x1x128x128xbf16> to vector<128x128xbf16>
    %cst_51 = arith.constant dense<0.000000e+00> : vector<256x128xf32>
    %44 = tpu.matmul %41, %43, %cst_51 {dimension_numbers = #tpu.dot_dimension_numbers<[1], [0], [0], [1], [0, 0, 1, 1], [], []>} : vector<256x128xbf16>, vector<128x128xbf16>, vector<256x128xf32> -> vector<256x128xf32>
    %45 = arith.addf %38, %44 : vector<256x128xf32>
    %c2_52 = arith.constant 2 : index
    %c7_53 = arith.constant 7 : index
    %c0_54 = arith.constant 0 : index
    %46 = vector.load %arg5[%c2_52, %c7_53, %c0_54] : memref<18x25x128xf32, #tpu.memory_space<vmem>>, vector<16x16x128xf32>
    %47 = vector.shape_cast %46 : vector<16x16x128xf32> to vector<256x128xf32>
    %48 = arith.truncf %47 : vector<256x128xf32> to vector<256x128xbf16>
    %c2_55 = arith.constant 2 : index
    %c0_56 = arith.constant 0 : index
    %c0_57 = arith.constant 0 : index
    %c0_58 = arith.constant 0 : index
    %49 = vector.load %arg2[%c2_55, %c0_56, %c0_57, %c0_58] : memref<3x3x128x128xbf16, #tpu.memory_space<vmem>>, vector<1x1x128x128xbf16>
    %50 = vector.shape_cast %49 : vector<1x1x128x128xbf16> to vector<128x128xbf16>
    %cst_59 = arith.constant dense<0.000000e+00> : vector<256x128xf32>
    %51 = tpu.matmul %48, %50, %cst_59 {dimension_numbers = #tpu.dot_dimension_numbers<[1], [0], [0], [1], [0, 0, 1, 1], [], []>} : vector<256x128xbf16>, vector<128x128xbf16>, vector<256x128xf32> -> vector<256x128xf32>
    %52 = arith.addf %45, %51 : vector<256x128xf32>
    %c2_60 = arith.constant 2 : index
    %c8_61 = arith.constant 8 : index
    %c0_62 = arith.constant 0 : index
    %53 = vector.load %arg5[%c2_60, %c8_61, %c0_62] : memref<18x25x128xf32, #tpu.memory_space<vmem>>, vector<16x16x128xf32>
    %54 = vector.shape_cast %53 : vector<16x16x128xf32> to vector<256x128xf32>
    %55 = arith.truncf %54 : vector<256x128xf32> to vector<256x128xbf16>
    %c2_63 = arith.constant 2 : index
    %c1_64 = arith.constant 1 : index
    %c0_65 = arith.constant 0 : index
    %c0_66 = arith.constant 0 : index
    %56 = vector.load %arg2[%c2_63, %c1_64, %c0_65, %c0_66] : memref<3x3x128x128xbf16, #tpu.memory_space<vmem>>, vector<1x1x128x128xbf16>
    %57 = vector.shape_cast %56 : vector<1x1x128x128xbf16> to vector<128x128xbf16>
    %cst_67 = arith.constant dense<0.000000e+00> : vector<256x128xf32>
    %58 = tpu.matmul %55, %57, %cst_67 {dimension_numbers = #tpu.dot_dimension_numbers<[1], [0], [0], [1], [0, 0, 1, 1], [], []>} : vector<256x128xbf16>, vector<128x128xbf16>, vector<256x128xf32> -> vector<256x128xf32>
    %59 = arith.addf %52, %58 : vector<256x128xf32>
    %c2_68 = arith.constant 2 : index
    %c9_69 = arith.constant 9 : index
    %c0_70 = arith.constant 0 : index
    %60 = vector.load %arg5[%c2_68, %c9_69, %c0_70] : memref<18x25x128xf32, #tpu.memory_space<vmem>>, vector<16x16x128xf32>
    %61 = vector.shape_cast %60 : vector<16x16x128xf32> to vector<256x128xf32>
    %62 = arith.truncf %61 : vector<256x128xf32> to vector<256x128xbf16>
    %c2_71 = arith.constant 2 : index
    %c2_72 = arith.constant 2 : index
    %c0_73 = arith.constant 0 : index
    %c0_74 = arith.constant 0 : index
    %63 = vector.load %arg2[%c2_71, %c2_72, %c0_73, %c0_74] : memref<3x3x128x128xbf16, #tpu.memory_space<vmem>>, vector<1x1x128x128xbf16>
    %64 = vector.shape_cast %63 : vector<1x1x128x128xbf16> to vector<128x128xbf16>
    %cst_75 = arith.constant dense<0.000000e+00> : vector<256x128xf32>
    %65 = tpu.matmul %62, %64, %cst_75 {dimension_numbers = #tpu.dot_dimension_numbers<[1], [0], [0], [1], [0, 0, 1, 1], [], []>} : vector<256x128xbf16>, vector<128x128xbf16>, vector<256x128xf32> -> vector<256x128xf32>
    %66 = arith.addf %59, %65 : vector<256x128xf32>
    %67 = vector.shape_cast %66 : vector<256x128xf32> to vector<1x16x16x128xf32>
    %68 = arith.truncf %67 : vector<1x16x16x128xf32> to vector<1x16x16x128xbf16>
    %c0_76 = arith.constant 0 : index
    %c0_77 = arith.constant 0 : index
    %c0_78 = arith.constant 0 : index
    %c0_79 = arith.constant 0 : index
    %69 = vector.load %arg3[%c0_76, %c0_77, %c0_78, %c0_79] : memref<1x16x16x128xbf16, #tpu.memory_space<vmem>>, vector<1x16x16x128xbf16>
    tpu.vector_store %arg3[%c0_76, %c0_77, %c0_78, %c0_79], %68 {strides = array<i32>} : memref<1x16x16x128xbf16, #tpu.memory_space<vmem>>, vector<1x16x16x128xbf16>,
    %cst_80 = arith.constant dense<0.000000e+00> : vector<128xf32>
    %70 = vector.multi_reduction <add>, %66, %cst_80 [0] : vector<256x128xf32> to vector<128xf32>
    %71 = vector.shape_cast %70 : vector<128xf32> to vector<1x128xf32>
    %cst_81 = arith.constant 3.906250e-03 : f32
    %72 = vector.broadcast %cst_81 : f32 to vector<1x128xf32>
    %73 = arith.mulf %71, %72 : vector<1x128xf32>
    %74 = vector.broadcast %73 : vector<1x128xf32> to vector<256x128xf32>
    %75 = arith.subf %66, %74 : vector<256x128xf32>
    %76 = arith.mulf %75, %75 : vector<256x128xf32>
    %cst_82 = arith.constant dense<0.000000e+00> : vector<128xf32>
    %77 = vector.multi_reduction <add>, %76, %cst_82 [0] : vector<256x128xf32> to vector<128xf32>
    %78 = vector.shape_cast %77 : vector<128xf32> to vector<1x128xf32>
    %79 = tpu.iota {dimensions = array<i32: 0>} : vector<8x128xi32>
    %c0_i32 = arith.constant 0 : i32
    %80 = vector.broadcast %c0_i32 : i32 to vector<8x128xi32>
    %81 = arith.cmpi eq, %79, %80 : vector<8x128xi32>
    %82 = vector.shape_cast %71 : vector<1x128xf32> to vector<1x128xf32>
    %83 = vector.broadcast %82 : vector<1x128xf32> to vector<8x128xf32>
    %c1_i32 = arith.constant 1 : i32
    %84 = vector.broadcast %c1_i32 : i32 to vector<8x128xi32>
    %85 = arith.cmpi eq, %79, %84 : vector<8x128xi32>
    %86 = vector.shape_cast %78 : vector<1x128xf32> to vector<1x128xf32>
    %87 = vector.broadcast %86 : vector<1x128xf32> to vector<8x128xf32>
    %cst_83 = arith.constant 0.000000e+00 : f32
    %88 = vector.broadcast %cst_83 : f32 to vector<8x128xf32>
    %89 = arith.select %85, %87, %88 : vector<8x128xi1>, vector<8x128xf32>
    %90 = arith.select %81, %83, %89 : vector<8x128xi1>, vector<8x128xf32>
    %91 = vector.shape_cast %90 : vector<8x128xf32> to vector<1x8x128xf32>
    %c0_84 = arith.constant 0 : index
    %c0_85 = arith.constant 0 : index
    %c0_86 = arith.constant 0 : index
    %92 = vector.load %arg4[%c0_84, %c0_85, %c0_86] : memref<1x8x128xf32, #tpu.memory_space<vmem>>, vector<1x8x128xf32>
    tpu.vector_store %arg4[%c0_84, %c0_85, %c0_86], %91 {strides = array<i32>} : memref<1x8x128xf32, #tpu.memory_space<vmem>>, vector<1x8x128xf32>,
    return
  }
  func.func @transform_0(%arg0: i32) -> (i32, i32, i32, i32) {
    %c0_i32 = arith.constant 0 : i32
    %c0_i32_0 = arith.constant 0 : i32
    %c0_i32_1 = arith.constant 0 : i32
    %c0_i32_2 = arith.constant 0 : i32
    return %arg0, %c0_i32, %c0_i32_0, %c0_i32_1 : i32, i32, i32, i32
  }
  func.func @transform_1(%arg0: i32) -> (i32, i32, i32, i32) {
    %c0_i32 = arith.constant 0 : i32
    %c0_i32_0 = arith.constant 0 : i32
    %c0_i32_1 = arith.constant 0 : i32
    %c0_i32_2 = arith.constant 0 : i32
    %c0_i32_3 = arith.constant 0 : i32
    return %c0_i32, %c0_i32_0, %c0_i32_1, %c0_i32_2 : i32, i32, i32, i32
  }
  func.func @transform_2(%arg0: i32) -> (i32, i32, i32, i32) {
    %c0_i32 = arith.constant 0 : i32
    %c0_i32_0 = arith.constant 0 : i32
    %c0_i32_1 = arith.constant 0 : i32
    %c0_i32_2 = arith.constant 0 : i32
    return %arg0, %c0_i32, %c0_i32_0, %c0_i32_1 : i32, i32, i32, i32
  }
  func.func @transform_3(%arg0: i32) -> (i32, i32, i32) {
    %c0_i32 = arith.constant 0 : i32
    %c0_i32_0 = arith.constant 0 : i32
    %c0_i32_1 = arith.constant 0 : i32
    return %arg0, %c0_i32, %c0_i32_0 : i32, i32, i32
  }
}

module attributes {stable_mosaic.version = 11 : i64} {
  func.func @_bn_relu_conv2_kernel(%arg0: i32, %arg1: memref<1x16x16x128xbf16, #tpu.memory_space<vmem>>, %arg2: memref<1x128xf32, #tpu.memory_space<vmem>>, %arg3: memref<1x128xf32, #tpu.memory_space<vmem>>, %arg4: memref<3x3x128x128xbf16, #tpu.memory_space<vmem>>, %arg5: memref<1x16x16x128xbf16, #tpu.memory_space<vmem>>, %arg6: memref<1x8x128xf32, #tpu.memory_space<vmem>>, %arg7: memref<18x25x128xf32, #tpu.memory_space<vmem>>) attributes {dimension_semantics = [#tpu.dimension_semantics<parallel>], iteration_bounds = array<i64: 2>, scalar_prefetch = 0 : i64, scratch_operands = 1 : i64, tpu.core_type = #tpu.core_type<tc>, window_params = [{transform_indices = @transform_0, window_bounds = array<i64: 1, 16, 16, 128>}, {pipeline_mode = #tpu.pipeline_mode<synchronous>, transform_indices = @transform_1, window_bounds = array<i64: 1, 128>}, {pipeline_mode = #tpu.pipeline_mode<synchronous>, transform_indices = @transform_2, window_bounds = array<i64: 1, 128>}, {pipeline_mode = #tpu.pipeline_mode<synchronous>, transform_indices = @transform_3, window_bounds = array<i64: 3, 3, 128, 128>}, {transform_indices = @transform_4, window_bounds = array<i64: 1, 16, 16, 128>}, {transform_indices = @transform_5, window_bounds = array<i64: 1, 8, 128>}]} {
    %cst = arith.constant 0.000000e+00 : f32
    %0 = vector.broadcast %cst : f32 to vector<18x25x128xf32>
    %c0 = arith.constant 0 : index
    %c0_0 = arith.constant 0 : index
    %c0_1 = arith.constant 0 : index
    %1 = vector.load %arg7[%c0, %c0_0, %c0_1] : memref<18x25x128xf32, #tpu.memory_space<vmem>>, vector<18x25x128xf32>
    tpu.vector_store %arg7[%c0, %c0_0, %c0_1], %0 {strides = array<i32>} : memref<18x25x128xf32, #tpu.memory_space<vmem>>, vector<18x25x128xf32>,
    %c0_2 = arith.constant 0 : index
    %c0_3 = arith.constant 0 : index
    %2 = vector.load %arg2[%c0_2, %c0_3] : memref<1x128xf32, #tpu.memory_space<vmem>>, vector<1x128xf32>
    %3 = vector.shape_cast %2 : vector<1x128xf32> to vector<1x1x128xf32>
    %c0_4 = arith.constant 0 : index
    %c0_5 = arith.constant 0 : index
    %4 = vector.load %arg3[%c0_4, %c0_5] : memref<1x128xf32, #tpu.memory_space<vmem>>, vector<1x128xf32>
    %5 = vector.shape_cast %4 : vector<1x128xf32> to vector<1x1x128xf32>
    %c0_6 = arith.constant 0 : index
    %c0_7 = arith.constant 0 : index
    %c0_8 = arith.constant 0 : index
    %c0_9 = arith.constant 0 : index
    %6 = vector.load %arg1[%c0_6, %c0_7, %c0_8, %c0_9] : memref<1x16x16x128xbf16, #tpu.memory_space<vmem>>, vector<1x16x16x128xbf16>
    %7 = vector.shape_cast %6 : vector<1x16x16x128xbf16> to vector<16x16x128xbf16>
    %8 = arith.extf %7 : vector<16x16x128xbf16> to vector<16x16x128xf32>
    %9 = vector.broadcast %3 : vector<1x1x128xf32> to vector<16x16x128xf32>
    %10 = arith.mulf %8, %9 : vector<16x16x128xf32>
    %11 = vector.broadcast %5 : vector<1x1x128xf32> to vector<16x16x128xf32>
    %12 = arith.addf %10, %11 : vector<16x16x128xf32>
    %cst_10 = arith.constant 0.000000e+00 : f32
    %13 = vector.broadcast %cst_10 : f32 to vector<16x16x128xf32>
    %14 = arith.maximumf %12, %13 : vector<16x16x128xf32>
    %c1 = arith.constant 1 : index
    %c8 = arith.constant 8 : index
    %c0_11 = arith.constant 0 : index
    %15 = vector.load %arg7[%c1, %c8, %c0_11] : memref<18x25x128xf32, #tpu.memory_space<vmem>>, vector<16x16x128xf32>
    tpu.vector_store %arg7[%c1, %c8, %c0_11], %14 {strides = array<i32>} : memref<18x25x128xf32, #tpu.memory_space<vmem>>, vector<16x16x128xf32>,
    %c0_12 = arith.constant 0 : index
    %c7 = arith.constant 7 : index
    %c0_13 = arith.constant 0 : index
    %16 = vector.load %arg7[%c0_12, %c7, %c0_13] : memref<18x25x128xf32, #tpu.memory_space<vmem>>, vector<16x16x128xf32>
    %17 = vector.shape_cast %16 : vector<16x16x128xf32> to vector<256x128xf32>
    %18 = arith.truncf %17 : vector<256x128xf32> to vector<256x128xbf16>
    %c0_14 = arith.constant 0 : index
    %c0_15 = arith.constant 0 : index
    %c0_16 = arith.constant 0 : index
    %c0_17 = arith.constant 0 : index
    %19 = vector.load %arg4[%c0_14, %c0_15, %c0_16, %c0_17] : memref<3x3x128x128xbf16, #tpu.memory_space<vmem>>, vector<1x1x128x128xbf16>
    %20 = vector.shape_cast %19 : vector<1x1x128x128xbf16> to vector<128x128xbf16>
    %cst_18 = arith.constant dense<0.000000e+00> : vector<256x128xf32>
    %21 = tpu.matmul %18, %20, %cst_18 {dimension_numbers = #tpu.dot_dimension_numbers<[1], [0], [0], [1], [0, 0, 1, 1], [], []>} : vector<256x128xbf16>, vector<128x128xbf16>, vector<256x128xf32> -> vector<256x128xf32>
    %c0_19 = arith.constant 0 : index
    %c8_20 = arith.constant 8 : index
    %c0_21 = arith.constant 0 : index
    %22 = vector.load %arg7[%c0_19, %c8_20, %c0_21] : memref<18x25x128xf32, #tpu.memory_space<vmem>>, vector<16x16x128xf32>
    %23 = vector.shape_cast %22 : vector<16x16x128xf32> to vector<256x128xf32>
    %24 = arith.truncf %23 : vector<256x128xf32> to vector<256x128xbf16>
    %c0_22 = arith.constant 0 : index
    %c1_23 = arith.constant 1 : index
    %c0_24 = arith.constant 0 : index
    %c0_25 = arith.constant 0 : index
    %25 = vector.load %arg4[%c0_22, %c1_23, %c0_24, %c0_25] : memref<3x3x128x128xbf16, #tpu.memory_space<vmem>>, vector<1x1x128x128xbf16>
    %26 = vector.shape_cast %25 : vector<1x1x128x128xbf16> to vector<128x128xbf16>
    %cst_26 = arith.constant dense<0.000000e+00> : vector<256x128xf32>
    %27 = tpu.matmul %24, %26, %cst_26 {dimension_numbers = #tpu.dot_dimension_numbers<[1], [0], [0], [1], [0, 0, 1, 1], [], []>} : vector<256x128xbf16>, vector<128x128xbf16>, vector<256x128xf32> -> vector<256x128xf32>
    %28 = arith.addf %21, %27 : vector<256x128xf32>
    %c0_27 = arith.constant 0 : index
    %c9 = arith.constant 9 : index
    %c0_28 = arith.constant 0 : index
    %29 = vector.load %arg7[%c0_27, %c9, %c0_28] : memref<18x25x128xf32, #tpu.memory_space<vmem>>, vector<16x16x128xf32>
    %30 = vector.shape_cast %29 : vector<16x16x128xf32> to vector<256x128xf32>
    %31 = arith.truncf %30 : vector<256x128xf32> to vector<256x128xbf16>
    %c0_29 = arith.constant 0 : index
    %c2 = arith.constant 2 : index
    %c0_30 = arith.constant 0 : index
    %c0_31 = arith.constant 0 : index
    %32 = vector.load %arg4[%c0_29, %c2, %c0_30, %c0_31] : memref<3x3x128x128xbf16, #tpu.memory_space<vmem>>, vector<1x1x128x128xbf16>
    %33 = vector.shape_cast %32 : vector<1x1x128x128xbf16> to vector<128x128xbf16>
    %cst_32 = arith.constant dense<0.000000e+00> : vector<256x128xf32>
    %34 = tpu.matmul %31, %33, %cst_32 {dimension_numbers = #tpu.dot_dimension_numbers<[1], [0], [0], [1], [0, 0, 1, 1], [], []>} : vector<256x128xbf16>, vector<128x128xbf16>, vector<256x128xf32> -> vector<256x128xf32>
    %35 = arith.addf %28, %34 : vector<256x128xf32>
    %c1_33 = arith.constant 1 : index
    %c7_34 = arith.constant 7 : index
    %c0_35 = arith.constant 0 : index
    %36 = vector.load %arg7[%c1_33, %c7_34, %c0_35] : memref<18x25x128xf32, #tpu.memory_space<vmem>>, vector<16x16x128xf32>
    %37 = vector.shape_cast %36 : vector<16x16x128xf32> to vector<256x128xf32>
    %38 = arith.truncf %37 : vector<256x128xf32> to vector<256x128xbf16>
    %c1_36 = arith.constant 1 : index
    %c0_37 = arith.constant 0 : index
    %c0_38 = arith.constant 0 : index
    %c0_39 = arith.constant 0 : index
    %39 = vector.load %arg4[%c1_36, %c0_37, %c0_38, %c0_39] : memref<3x3x128x128xbf16, #tpu.memory_space<vmem>>, vector<1x1x128x128xbf16>
    %40 = vector.shape_cast %39 : vector<1x1x128x128xbf16> to vector<128x128xbf16>
    %cst_40 = arith.constant dense<0.000000e+00> : vector<256x128xf32>
    %41 = tpu.matmul %38, %40, %cst_40 {dimension_numbers = #tpu.dot_dimension_numbers<[1], [0], [0], [1], [0, 0, 1, 1], [], []>} : vector<256x128xbf16>, vector<128x128xbf16>, vector<256x128xf32> -> vector<256x128xf32>
    %42 = arith.addf %35, %41 : vector<256x128xf32>
    %c1_41 = arith.constant 1 : index
    %c8_42 = arith.constant 8 : index
    %c0_43 = arith.constant 0 : index
    %43 = vector.load %arg7[%c1_41, %c8_42, %c0_43] : memref<18x25x128xf32, #tpu.memory_space<vmem>>, vector<16x16x128xf32>
    %44 = vector.shape_cast %43 : vector<16x16x128xf32> to vector<256x128xf32>
    %45 = arith.truncf %44 : vector<256x128xf32> to vector<256x128xbf16>
    %c1_44 = arith.constant 1 : index
    %c1_45 = arith.constant 1 : index
    %c0_46 = arith.constant 0 : index
    %c0_47 = arith.constant 0 : index
    %46 = vector.load %arg4[%c1_44, %c1_45, %c0_46, %c0_47] : memref<3x3x128x128xbf16, #tpu.memory_space<vmem>>, vector<1x1x128x128xbf16>
    %47 = vector.shape_cast %46 : vector<1x1x128x128xbf16> to vector<128x128xbf16>
    %cst_48 = arith.constant dense<0.000000e+00> : vector<256x128xf32>
    %48 = tpu.matmul %45, %47, %cst_48 {dimension_numbers = #tpu.dot_dimension_numbers<[1], [0], [0], [1], [0, 0, 1, 1], [], []>} : vector<256x128xbf16>, vector<128x128xbf16>, vector<256x128xf32> -> vector<256x128xf32>
    %49 = arith.addf %42, %48 : vector<256x128xf32>
    %c1_49 = arith.constant 1 : index
    %c9_50 = arith.constant 9 : index
    %c0_51 = arith.constant 0 : index
    %50 = vector.load %arg7[%c1_49, %c9_50, %c0_51] : memref<18x25x128xf32, #tpu.memory_space<vmem>>, vector<16x16x128xf32>
    %51 = vector.shape_cast %50 : vector<16x16x128xf32> to vector<256x128xf32>
    %52 = arith.truncf %51 : vector<256x128xf32> to vector<256x128xbf16>
    %c1_52 = arith.constant 1 : index
    %c2_53 = arith.constant 2 : index
    %c0_54 = arith.constant 0 : index
    %c0_55 = arith.constant 0 : index
    %53 = vector.load %arg4[%c1_52, %c2_53, %c0_54, %c0_55] : memref<3x3x128x128xbf16, #tpu.memory_space<vmem>>, vector<1x1x128x128xbf16>
    %54 = vector.shape_cast %53 : vector<1x1x128x128xbf16> to vector<128x128xbf16>
    %cst_56 = arith.constant dense<0.000000e+00> : vector<256x128xf32>
    %55 = tpu.matmul %52, %54, %cst_56 {dimension_numbers = #tpu.dot_dimension_numbers<[1], [0], [0], [1], [0, 0, 1, 1], [], []>} : vector<256x128xbf16>, vector<128x128xbf16>, vector<256x128xf32> -> vector<256x128xf32>
    %56 = arith.addf %49, %55 : vector<256x128xf32>
    %c2_57 = arith.constant 2 : index
    %c7_58 = arith.constant 7 : index
    %c0_59 = arith.constant 0 : index
    %57 = vector.load %arg7[%c2_57, %c7_58, %c0_59] : memref<18x25x128xf32, #tpu.memory_space<vmem>>, vector<16x16x128xf32>
    %58 = vector.shape_cast %57 : vector<16x16x128xf32> to vector<256x128xf32>
    %59 = arith.truncf %58 : vector<256x128xf32> to vector<256x128xbf16>
    %c2_60 = arith.constant 2 : index
    %c0_61 = arith.constant 0 : index
    %c0_62 = arith.constant 0 : index
    %c0_63 = arith.constant 0 : index
    %60 = vector.load %arg4[%c2_60, %c0_61, %c0_62, %c0_63] : memref<3x3x128x128xbf16, #tpu.memory_space<vmem>>, vector<1x1x128x128xbf16>
    %61 = vector.shape_cast %60 : vector<1x1x128x128xbf16> to vector<128x128xbf16>
    %cst_64 = arith.constant dense<0.000000e+00> : vector<256x128xf32>
    %62 = tpu.matmul %59, %61, %cst_64 {dimension_numbers = #tpu.dot_dimension_numbers<[1], [0], [0], [1], [0, 0, 1, 1], [], []>} : vector<256x128xbf16>, vector<128x128xbf16>, vector<256x128xf32> -> vector<256x128xf32>
    %63 = arith.addf %56, %62 : vector<256x128xf32>
    %c2_65 = arith.constant 2 : index
    %c8_66 = arith.constant 8 : index
    %c0_67 = arith.constant 0 : index
    %64 = vector.load %arg7[%c2_65, %c8_66, %c0_67] : memref<18x25x128xf32, #tpu.memory_space<vmem>>, vector<16x16x128xf32>
    %65 = vector.shape_cast %64 : vector<16x16x128xf32> to vector<256x128xf32>
    %66 = arith.truncf %65 : vector<256x128xf32> to vector<256x128xbf16>
    %c2_68 = arith.constant 2 : index
    %c1_69 = arith.constant 1 : index
    %c0_70 = arith.constant 0 : index
    %c0_71 = arith.constant 0 : index
    %67 = vector.load %arg4[%c2_68, %c1_69, %c0_70, %c0_71] : memref<3x3x128x128xbf16, #tpu.memory_space<vmem>>, vector<1x1x128x128xbf16>
    %68 = vector.shape_cast %67 : vector<1x1x128x128xbf16> to vector<128x128xbf16>
    %cst_72 = arith.constant dense<0.000000e+00> : vector<256x128xf32>
    %69 = tpu.matmul %66, %68, %cst_72 {dimension_numbers = #tpu.dot_dimension_numbers<[1], [0], [0], [1], [0, 0, 1, 1], [], []>} : vector<256x128xbf16>, vector<128x128xbf16>, vector<256x128xf32> -> vector<256x128xf32>
    %70 = arith.addf %63, %69 : vector<256x128xf32>
    %c2_73 = arith.constant 2 : index
    %c9_74 = arith.constant 9 : index
    %c0_75 = arith.constant 0 : index
    %71 = vector.load %arg7[%c2_73, %c9_74, %c0_75] : memref<18x25x128xf32, #tpu.memory_space<vmem>>, vector<16x16x128xf32>
    %72 = vector.shape_cast %71 : vector<16x16x128xf32> to vector<256x128xf32>
    %73 = arith.truncf %72 : vector<256x128xf32> to vector<256x128xbf16>
    %c2_76 = arith.constant 2 : index
    %c2_77 = arith.constant 2 : index
    %c0_78 = arith.constant 0 : index
    %c0_79 = arith.constant 0 : index
    %74 = vector.load %arg4[%c2_76, %c2_77, %c0_78, %c0_79] : memref<3x3x128x128xbf16, #tpu.memory_space<vmem>>, vector<1x1x128x128xbf16>
    %75 = vector.shape_cast %74 : vector<1x1x128x128xbf16> to vector<128x128xbf16>
    %cst_80 = arith.constant dense<0.000000e+00> : vector<256x128xf32>
    %76 = tpu.matmul %73, %75, %cst_80 {dimension_numbers = #tpu.dot_dimension_numbers<[1], [0], [0], [1], [0, 0, 1, 1], [], []>} : vector<256x128xbf16>, vector<128x128xbf16>, vector<256x128xf32> -> vector<256x128xf32>
    %77 = arith.addf %70, %76 : vector<256x128xf32>
    %78 = vector.shape_cast %77 : vector<256x128xf32> to vector<1x16x16x128xf32>
    %79 = arith.truncf %78 : vector<1x16x16x128xf32> to vector<1x16x16x128xbf16>
    %c0_81 = arith.constant 0 : index
    %c0_82 = arith.constant 0 : index
    %c0_83 = arith.constant 0 : index
    %c0_84 = arith.constant 0 : index
    %80 = vector.load %arg5[%c0_81, %c0_82, %c0_83, %c0_84] : memref<1x16x16x128xbf16, #tpu.memory_space<vmem>>, vector<1x16x16x128xbf16>
    tpu.vector_store %arg5[%c0_81, %c0_82, %c0_83, %c0_84], %79 {strides = array<i32>} : memref<1x16x16x128xbf16, #tpu.memory_space<vmem>>, vector<1x16x16x128xbf16>,
    %cst_85 = arith.constant dense<0.000000e+00> : vector<128xf32>
    %81 = vector.multi_reduction <add>, %77, %cst_85 [0] : vector<256x128xf32> to vector<128xf32>
    %82 = vector.shape_cast %81 : vector<128xf32> to vector<1x128xf32>
    %cst_86 = arith.constant 3.906250e-03 : f32
    %83 = vector.broadcast %cst_86 : f32 to vector<1x128xf32>
    %84 = arith.mulf %82, %83 : vector<1x128xf32>
    %85 = vector.broadcast %84 : vector<1x128xf32> to vector<256x128xf32>
    %86 = arith.subf %77, %85 : vector<256x128xf32>
    %87 = arith.mulf %86, %86 : vector<256x128xf32>
    %cst_87 = arith.constant dense<0.000000e+00> : vector<128xf32>
    %88 = vector.multi_reduction <add>, %87, %cst_87 [0] : vector<256x128xf32> to vector<128xf32>
    %89 = vector.shape_cast %88 : vector<128xf32> to vector<1x128xf32>
    %90 = tpu.iota {dimensions = array<i32: 0>} : vector<8x128xi32>
    %c0_i32 = arith.constant 0 : i32
    %91 = vector.broadcast %c0_i32 : i32 to vector<8x128xi32>
    %92 = arith.cmpi eq, %90, %91 : vector<8x128xi32>
    %93 = vector.shape_cast %82 : vector<1x128xf32> to vector<1x128xf32>
    %94 = vector.broadcast %93 : vector<1x128xf32> to vector<8x128xf32>
    %c1_i32 = arith.constant 1 : i32
    %95 = vector.broadcast %c1_i32 : i32 to vector<8x128xi32>
    %96 = arith.cmpi eq, %90, %95 : vector<8x128xi32>
    %97 = vector.shape_cast %89 : vector<1x128xf32> to vector<1x128xf32>
    %98 = vector.broadcast %97 : vector<1x128xf32> to vector<8x128xf32>
    %cst_88 = arith.constant 0.000000e+00 : f32
    %99 = vector.broadcast %cst_88 : f32 to vector<8x128xf32>
    %100 = arith.select %96, %98, %99 : vector<8x128xi1>, vector<8x128xf32>
    %101 = arith.select %92, %94, %100 : vector<8x128xi1>, vector<8x128xf32>
    %102 = vector.shape_cast %101 : vector<8x128xf32> to vector<1x8x128xf32>
    %c0_89 = arith.constant 0 : index
    %c0_90 = arith.constant 0 : index
    %c0_91 = arith.constant 0 : index
    %103 = vector.load %arg6[%c0_89, %c0_90, %c0_91] : memref<1x8x128xf32, #tpu.memory_space<vmem>>, vector<1x8x128xf32>
    tpu.vector_store %arg6[%c0_89, %c0_90, %c0_91], %102 {strides = array<i32>} : memref<1x8x128xf32, #tpu.memory_space<vmem>>, vector<1x8x128xf32>,
    return
  }
  func.func @transform_0(%arg0: i32) -> (i32, i32, i32, i32) {
    %c0_i32 = arith.constant 0 : i32
    %c0_i32_0 = arith.constant 0 : i32
    %c0_i32_1 = arith.constant 0 : i32
    %c0_i32_2 = arith.constant 0 : i32
    return %arg0, %c0_i32, %c0_i32_0, %c0_i32_1 : i32, i32, i32, i32
  }
  func.func @transform_1(%arg0: i32) -> (i32, i32) {
    %c0_i32 = arith.constant 0 : i32
    %c0_i32_0 = arith.constant 0 : i32
    %c0_i32_1 = arith.constant 0 : i32
    return %c0_i32, %c0_i32_0 : i32, i32
  }
  func.func @transform_2(%arg0: i32) -> (i32, i32) {
    %c0_i32 = arith.constant 0 : i32
    %c0_i32_0 = arith.constant 0 : i32
    %c0_i32_1 = arith.constant 0 : i32
    return %c0_i32, %c0_i32_0 : i32, i32
  }
  func.func @transform_3(%arg0: i32) -> (i32, i32, i32, i32) {
    %c0_i32 = arith.constant 0 : i32
    %c0_i32_0 = arith.constant 0 : i32
    %c0_i32_1 = arith.constant 0 : i32
    %c0_i32_2 = arith.constant 0 : i32
    %c0_i32_3 = arith.constant 0 : i32
    return %c0_i32, %c0_i32_0, %c0_i32_1, %c0_i32_2 : i32, i32, i32, i32
  }
  func.func @transform_4(%arg0: i32) -> (i32, i32, i32, i32) {
    %c0_i32 = arith.constant 0 : i32
    %c0_i32_0 = arith.constant 0 : i32
    %c0_i32_1 = arith.constant 0 : i32
    %c0_i32_2 = arith.constant 0 : i32
    return %arg0, %c0_i32, %c0_i32_0, %c0_i32_1 : i32, i32, i32, i32
  }
  func.func @transform_5(%arg0: i32) -> (i32, i32, i32) {
    %c0_i32 = arith.constant 0 : i32
    %c0_i32_0 = arith.constant 0 : i32
    %c0_i32_1 = arith.constant 0 : i32
    return %arg0, %c0_i32, %c0_i32_0 : i32, i32, i32
  }
}

module attributes {stable_mosaic.version = 11 : i64} {
  func.func @_bn_add_relu_kernel(%arg0: i32, %arg1: memref<1x16x16x128xbf16, #tpu.memory_space<vmem>>, %arg2: memref<1x128xf32, #tpu.memory_space<vmem>>, %arg3: memref<1x128xf32, #tpu.memory_space<vmem>>, %arg4: memref<1x16x16x128xf32, #tpu.memory_space<vmem>>, %arg5: memref<1x16x16x128xf32, #tpu.memory_space<vmem>>) attributes {dimension_semantics = [#tpu.dimension_semantics<parallel>], iteration_bounds = array<i64: 2>, scalar_prefetch = 0 : i64, scratch_operands = 0 : i64, tpu.core_type = #tpu.core_type<tc>, window_params = [{transform_indices = @transform_0, window_bounds = array<i64: 1, 16, 16, 128>}, {pipeline_mode = #tpu.pipeline_mode<synchronous>, transform_indices = @transform_1, window_bounds = array<i64: 1, 128>}, {pipeline_mode = #tpu.pipeline_mode<synchronous>, transform_indices = @transform_2, window_bounds = array<i64: 1, 128>}, {transform_indices = @transform_3, window_bounds = array<i64: 1, 16, 16, 128>}, {transform_indices = @transform_4, window_bounds = array<i64: 1, 16, 16, 128>}]} {
    %c0 = arith.constant 0 : index
    %c0_0 = arith.constant 0 : index
    %0 = vector.load %arg2[%c0, %c0_0] : memref<1x128xf32, #tpu.memory_space<vmem>>, vector<1x128xf32>
    %1 = vector.shape_cast %0 : vector<1x128xf32> to vector<1x1x1x128xf32>
    %c0_1 = arith.constant 0 : index
    %c0_2 = arith.constant 0 : index
    %2 = vector.load %arg3[%c0_1, %c0_2] : memref<1x128xf32, #tpu.memory_space<vmem>>, vector<1x128xf32>
    %3 = vector.shape_cast %2 : vector<1x128xf32> to vector<1x1x1x128xf32>
    %c0_3 = arith.constant 0 : index
    %c0_4 = arith.constant 0 : index
    %c0_5 = arith.constant 0 : index
    %c0_6 = arith.constant 0 : index
    %4 = vector.load %arg1[%c0_3, %c0_4, %c0_5, %c0_6] : memref<1x16x16x128xbf16, #tpu.memory_space<vmem>>, vector<1x16x16x128xbf16>
    %5 = arith.extf %4 : vector<1x16x16x128xbf16> to vector<1x16x16x128xf32>
    %6 = vector.broadcast %1 : vector<1x1x1x128xf32> to vector<1x16x16x128xf32>
    %7 = arith.mulf %5, %6 : vector<1x16x16x128xf32>
    %8 = vector.broadcast %3 : vector<1x1x1x128xf32> to vector<1x16x16x128xf32>
    %9 = arith.addf %7, %8 : vector<1x16x16x128xf32>
    %c0_7 = arith.constant 0 : index
    %c0_8 = arith.constant 0 : index
    %c0_9 = arith.constant 0 : index
    %c0_10 = arith.constant 0 : index
    %10 = vector.load %arg4[%c0_7, %c0_8, %c0_9, %c0_10] : memref<1x16x16x128xf32, #tpu.memory_space<vmem>>, vector<1x16x16x128xf32>
    %11 = arith.addf %9, %10 : vector<1x16x16x128xf32>
    %cst = arith.constant 0.000000e+00 : f32
    %12 = vector.broadcast %cst : f32 to vector<1x16x16x128xf32>
    %13 = arith.maximumf %11, %12 : vector<1x16x16x128xf32>
    %c0_11 = arith.constant 0 : index
    %c0_12 = arith.constant 0 : index
    %c0_13 = arith.constant 0 : index
    %c0_14 = arith.constant 0 : index
    %14 = vector.load %arg5[%c0_11, %c0_12, %c0_13, %c0_14] : memref<1x16x16x128xf32, #tpu.memory_space<vmem>>, vector<1x16x16x128xf32>
    tpu.vector_store %arg5[%c0_11, %c0_12, %c0_13, %c0_14], %13 {strides = array<i32>} : memref<1x16x16x128xf32, #tpu.memory_space<vmem>>, vector<1x16x16x128xf32>,
    return
  }
  func.func @transform_0(%arg0: i32) -> (i32, i32, i32, i32) {
    %c0_i32 = arith.constant 0 : i32
    %c0_i32_0 = arith.constant 0 : i32
    %c0_i32_1 = arith.constant 0 : i32
    %c0_i32_2 = arith.constant 0 : i32
    return %arg0, %c0_i32, %c0_i32_0, %c0_i32_1 : i32, i32, i32, i32
  }
  func.func @transform_1(%arg0: i32) -> (i32, i32) {
    %c0_i32 = arith.constant 0 : i32
    %c0_i32_0 = arith.constant 0 : i32
    %c0_i32_1 = arith.constant 0 : i32
    return %c0_i32, %c0_i32_0 : i32, i32
  }
  func.func @transform_2(%arg0: i32) -> (i32, i32) {
    %c0_i32 = arith.constant 0 : i32
    %c0_i32_0 = arith.constant 0 : i32
    %c0_i32_1 = arith.constant 0 : i32
    return %c0_i32, %c0_i32_0 : i32, i32
  }
  func.func @transform_3(%arg0: i32) -> (i32, i32, i32, i32) {
    %c0_i32 = arith.constant 0 : i32
    %c0_i32_0 = arith.constant 0 : i32
    %c0_i32_1 = arith.constant 0 : i32
    %c0_i32_2 = arith.constant 0 : i32
    return %arg0, %c0_i32, %c0_i32_0, %c0_i32_1 : i32, i32, i32, i32
  }
  func.func @transform_4(%arg0: i32) -> (i32, i32, i32, i32) {
    %c0_i32 = arith.constant 0 : i32
    %c0_i32_0 = arith.constant 0 : i32
    %c0_i32_1 = arith.constant 0 : i32
    %c0_i32_2 = arith.constant 0 : i32
    return %arg0, %c0_i32, %c0_i32_0, %c0_i32_1 : i32, i32, i32, i32
  }
}

</mosaic_0001>

<bundles_post_ra>
// kernel: resnet_basic_block.5
= control target key start
LH: loop header
LB: loop body
LE: loop exit
PB: predicated region body
PF: predicated region fallthrough
CT: control target
= control target key end

     0   :  { %s687_s15 = smov 0   ;;  %s1010_s0 = inlined_call_operand.vmem [shape: bf16[2,16,16,128], index: 0, kind: input, shape index: {}]   ;;  %s1011_s1 = inlined_call_operand.vmem [shape: f32[1,128], index: 1, kind: input, shape index: {}]   ;;  %s1012_s2 = inlined_call_operand.vmem [shape: f32[1,128], index: 2, kind: input, shape index: {}]   ;;  %s1013_s3 = inlined_call_operand.vmem [shape: f32[2,16,16,128], index: 3, kind: input, shape index: {}, may-alias: {3,4}]   ;;  %s1014_s4 = inlined_call_operand.vmem [shape: f32[2,16,16,128], index: 4, kind: output, shape index: {}, may-alias: {3,4}]  }
   0x1 LB: > { %s549_s16 = sadd.s32 4294967295, %s660_s15   ;;  %p553_p0 = scmp.ge.s32.totalorder %s660_s15, 1  ;;  %s660_s15 = sphi %s687_s15, %s14_s15  }
   0x2   : > { %p172_p1 = scmp.lt.s32.totalorder %s660_s15, 3 }
   0x4   : > { %p173_p2 = pnand %p553_p0, %p172_p1 }
   0x5   : > { %p203_p3 = scmp.lt.s32.totalorder (!%p173_p2), %s549_s16, 1 }
   0x6   : > { %176 = sbr.rel (%p173_p2) target bundleno = 63 (0x3f), region = 36 }
   0xb   : > { %s1029_s16 = smov (!%p203_p3, %s549_s16), 1  ;;  %v722_v12 = vld [vmem:[%s1011_s1] ss:$0 sm:$0xff] }
   0xc   : > { %s562_s17 = sshll.u32 %s1029_s16, 7  ;;  %s563_s23 = sshll.u32 %s1029_s16, 8  ;;  %v755_v34 = vld [vmem:[%s1012_s2] ss:$0 sm:$0xff] }
   0xd   : > { %s701_s20 = scalar_lea.vmem %s1010_s0, %s562_s17  ;;  %s766_s28 = scalar_lea.vmem %s1013_s3, %s563_s23 }
   0xe   : > { %v566_v0 = vld [vmem:[%s701_s20] sm:$0xff]   ;;  %v629_v1 = vld [vmem:[%s701_s20 + $0x8] sm:$0xff]   ;;  %v630_v2 = vld [vmem:[%s701_s20 + $0x10] sm:$0xff]   ;;  %s823_s5 = scalar_lea.vmem %s1014_s4, %s563_s23 }
   0xf   : > { %v631_v3 = vld [vmem:[%s701_s20 + $0x18] sm:$0xff]   ;;  %v708_v4 = vld [vmem:[%s701_s20 + $0x20] sm:$0xff]   ;;  %v711_v5 = vld [vmem:[%s701_s20 + $0x28] sm:$0xff]   ;;  %v567_v6 = vunpack.c.l.bf16 %v566_v0  ;;  %v568_v7 = vunpack.c.h.bf16 %v566_v0  ;;  %v571_v8 = vunpack.c.l.bf16 %v629_v1  ;;  %v572_v9 = vunpack.c.h.bf16 %v629_v1 }
  0x10   : > { %v714_v10 = vld [vmem:[%s701_s20 + $0x30] sm:$0xff]   ;;  %v717_v11 = vld [vmem:[%s701_s20 + $0x38] sm:$0xff]   ;;  %v575_v13 = vunpack.c.l.bf16 %v630_v2  ;;  %v576_v14 = vunpack.c.h.bf16 %v630_v2  ;;  %v579_v15 = vunpack.c.l.bf16 %v631_v3  ;;  %v580_v16 = vunpack.c.h.bf16 %v631_v3  ;;  %v725_v17 = vld [vmem:[%s701_s20 + $0x40] sm:$0xff]  }
  0x11   : > { %v583_v18 = vunpack.c.l.bf16 %v708_v4  ;;  %v584_v19 = vunpack.c.h.bf16 %v708_v4  ;;  %v587_v20 = vunpack.c.l.bf16 %v711_v5  ;;  %v588_v21 = vunpack.c.h.bf16 %v711_v5  ;;  %v732_v22 = vld [vmem:[%s701_s20 + $0x48] sm:$0xff]   ;;  %v740_v27 = vld [vmem:[%s701_s20 + $0x50] sm:$0xff]   ;;  %v743_v28 = vld [vmem:[%s701_s20 + $0x58] sm:$0xff]  }
  0x12   : > { %v591_v23 = vunpack.c.l.bf16 %v714_v10  ;;  %v592_v24 = vunpack.c.h.bf16 %v714_v10  ;;  %v595_v25 = vunpack.c.l.bf16 %v717_v11  ;;  %v596_v26 = vunpack.c.h.bf16 %v717_v11  ;;  %v747_v30 = vld [vmem:[%s701_s20 + $0x60] sm:$0xff]   ;;  %v772_v42 = vld [vmem:[%s701_s20 + $0x68] sm:$0xff]   ;;  %v779_v47 = vld [vmem:[%s701_s20 + $0x70] sm:$0xff]  }
  0x13   : > { %v599_v29 = vunpack.c.l.bf16 %v725_v17  ;;  %v287_v31 = vmul.f32 %v722_v12, %v567_v6  ;;  %v288_v32 = vmul.f32 %v722_v12, %v568_v7  ;;  %v289_v33 = vmul.f32 %v722_v12, %v571_v8  ;;  %v783_v49 = vld [vmem:[%s701_s20 + $0x78] sm:$0xff]   ;;  %v354_v58 = vld [vmem:[%s766_s28] sm:$0xff]  ;;  %v355_v59 = vld [vmem:[%s766_s28 + $0x8] sm:$0xff] }
  0x14   : > { %v600_v35 = vunpack.c.h.bf16 %v725_v17  ;;  %v603_v36 = vunpack.c.l.bf16 %v732_v22  ;;  %v290_v38 = vmul.f32 %v722_v12, %v572_v9  ;;  %v291_v43 = vmul.f32 %v722_v12, %v575_v13  ;;  %v356_v60 = vld [vmem:[%s766_s28 + $0x10] sm:$0xff]  ;;  %v357_v1 = vld [vmem:[%s766_s28 + $0x18] sm:$0xff]  ;;  %v358_v6 = vld [vmem:[%s766_s28 + $0x20] sm:$0xff] }
  0x15   : > { %v292_v48 = vmul.f32 %v722_v12, %v576_v14  ;;  %v293_v50 = vmul.f32 %v722_v12, %v579_v15  ;;  %v322_v51 = vadd.f32 %v755_v34, %v287_v31  ;;  %v323_v52 = vadd.f32 %v755_v34, %v288_v32  ;;  %v359_v8 = vld [vmem:[%s766_s28 + $0x28] sm:$0xff]  ;;  %v869_v2 = vld [vmem:[%s766_s28 + $0xd0] sm:$0xff]  ;;  %v872_v62 = vld [vmem:[%s766_s28 + $0xd8] sm:$0xff] }
  0x16   : > { %v324_v53 = vadd.f32 %v755_v34, %v289_v33  ;;  %v294_v56 = vmul.f32 %v722_v12, %v580_v16  ;;  %v325_v57 = vadd.f32 %v755_v34, %v290_v38  ;;  %v295_v63 = vmul.f32 %v722_v12, %v583_v18  ;;  %v360_v18 = vld [vmem:[%s766_s28 + $0x30] sm:$0xff]  ;;  %v361_v33 = vld [vmem:[%s766_s28 + $0x38] sm:$0xff]  ;;  %v363_v38 = vld [vmem:[%s766_s28 + $0x48] sm:$0xff] }
  0x17   : > { %v326_v0 = vadd.f32 %v755_v34, %v291_v43  ;;  %v296_v3 = vmul.f32 %v722_v12, %v584_v19  ;;  %v297_v4 = vmul.f32 %v722_v12, %v587_v20  ;;  %v327_v5 = vadd.f32 %v755_v34, %v292_v48  ;;  %v875_v61 = vld [vmem:[%s766_s28 + $0xe0] sm:$0xff]  ;;  %v882_v40 = vld [vmem:[%s766_s28 + $0xe8] sm:$0xff] }
  0x18   : > { %v328_v7 = vadd.f32 %v755_v34, %v293_v50  ;;  %v386_v9 = vadd.f32 %v354_v58, %v322_v51  ;;  %v387_v10 = vadd.f32 %v355_v59, %v323_v52  ;;  %v388_v13 = vadd.f32 %v356_v60, %v324_v53  ;;  %v364_v50 = vld [vmem:[%s766_s28 + $0x50] sm:$0xff]  ;;  %v365_v51 = vld [vmem:[%s766_s28 + $0x58] sm:$0xff]  ;;  %v366_v52 = vld [vmem:[%s766_s28 + $0x60] sm:$0xff] }
  0x19   : > { %v298_v15 = vmul.f32 %v722_v12, %v588_v21  ;;  %v329_v16 = vadd.f32 %v755_v34, %v294_v56  ;;  %v389_v19 = vadd.f32 %v357_v1, %v325_v57  ;;  %v299_v20 = vmul.f32 %v722_v12, %v591_v23  ;;  %v362_v21 = vld [vmem:[%s766_s28 + $0x40] sm:$0xff]  ;;  %v367_v53 = vld [vmem:[%s766_s28 + $0x68] sm:$0xff]  ;;  %v368_v56 = vld [vmem:[%s766_s28 + $0x70] sm:$0xff] }
  0x1a   : > { %v300_v31 = vmul.f32 %v722_v12, %v592_v24  ;;  %v330_v32 = vadd.f32 %v755_v34, %v295_v63  ;;  %v390_v43 = vadd.f32 %v358_v6, %v326_v0  ;;  %v301_v23 = vmul.f32 %v722_v12, %v595_v25  ;;  %v836_v57 = vld [vmem:[%s766_s28 + $0x78] sm:$0xff]  ;;  %v839_v58 = vld [vmem:[%s766_s28 + $0x80] sm:$0xff]  ;;  %v842_v25 = vld [vmem:[%s766_s28 + $0x88] sm:$0xff] }
  0x1b   : > { %v331_v24 = vadd.f32 %v755_v34, %v296_v3  ;;  %v332_v48 = vadd.f32 %v755_v34, %v297_v4  ;;  %v845_v59 = vld [vmem:[%s766_s28 + $0x90] sm:$0xff]  ;;  %v848_v60 = vld [vmem:[%s766_s28 + $0x98] sm:$0xff]  ;;  %v851_v63 = vld [vmem:[%s766_s28 + $0xa0] sm:$0xff]  ;;  %v391_v14 = vadd.f32 %v359_v8, %v327_v5  ;;  %v392_v55 = vadd.f32 %v360_v18, %v328_v7 }
  0x1c   : > { %v854_v0 = vld [vmem:[%s766_s28 + $0xa8] sm:$0xff]  ;;  %v857_v1 = vld [vmem:[%s766_s28 + $0xb0] sm:$0xff]  ;;  %v860_v3 = vld [vmem:[%s766_s28 + $0xb8] sm:$0xff]  ;;  %v418_v54 = vmax.f32 %v386_v9, 0.0  ;;  %v419_v46 = vmax.f32 %v387_v10, 0.0  ;;  %v420_v45 = vmax.f32 %v388_v13, 0.0  ;;  %v302_v44 = vmul.f32 %v722_v12, %v596_v26 }
  0x1d   : > { %v863_v4 = vld [vmem:[%s766_s28 + $0xc0] sm:$0xff]  ;;  %v866_v6 = vld [vmem:[%s766_s28 + $0xc8] sm:$0xff]  ;;  %v333_v41 = vadd.f32 %v755_v34, %v298_v15  ;;  %v885_v5 = vld [vmem:[%s766_s28 + $0xf0] sm:$0xff]  ;;  %v393_v39 = vadd.f32 %v361_v33, %v329_v16  ;;  %v421_v37 = vmax.f32 %v389_v19, 0.0  ;;  %v303_v7 = vmul.f32 %v722_v12, %v599_v29 }
  0x1e   : > { %v888_v8 = vld [vmem:[%s766_s28 + $0xf8] sm:$0xff]  ;;  %v334_v11 = vadd.f32 %v755_v34, %v299_v20  ;;  %v394_v9 = vadd.f32 %v362_v21, %v330_v32  ;;  %v422_v26 = vmax.f32 %v390_v43, 0.0  ;;  %v304_v10 = vmul.f32 %v722_v12, %v600_v35 }
  0x1f   : > { %450 = vst [vmem:[%s823_s5] sm:$0xff] %v418_v54  ;;  %v335_v13 = vadd.f32 %v755_v34, %v300_v31  ;;  %v395_v15 = vadd.f32 %v363_v38, %v331_v24  ;;  %v423_v16 = vmax.f32 %v391_v14, 0.0  ;;  %v305_v29 = vmul.f32 %v722_v12, %v603_v36 }
  0x20   : > { %451 = vst [vmem:[%s823_s5 + $0x8] sm:$0xff] %v419_v46  ;;  %v336_v18 = vadd.f32 %v755_v34, %v301_v23  ;;  %v396_v19 = vadd.f32 %v364_v50, %v332_v48  ;;  %v424_v20 = vmax.f32 %v392_v55, 0.0  ;;  %v1015_v17 = vunpack.c.h.bf16 %v732_v22 }
  0x21   : > { %452 = vst [vmem:[%s823_s5 + $0x10] sm:$0xff] %v420_v45  ;;  %v337_v54 = vadd.f32 %v755_v34, %v302_v44  ;;  %v397_v31 = vadd.f32 %v365_v51, %v333_v41  ;;  %v425_v14 = vmax.f32 %v393_v39, 0.0  ;;  %v1016_v46 = vunpack.c.l.bf16 %v740_v27 }
  0x22   : > { %v306_v35 = vmul.f32 %v722_v12, %v1015_v17  ;;  %453 = vst [vmem:[%s823_s5 + $0x18] sm:$0xff] %v421_v37  ;;  %v338_v32 = vadd.f32 %v755_v34, %v303_v7  ;;  %v398_v33 = vadd.f32 %v366_v52, %v334_v11  ;;  %v426_v55 = vmax.f32 %v394_v9, 0.0 }
  0x23   : > { %v307_v36 = vmul.f32 %v722_v12, %v1016_v46  ;;  %454 = vst [vmem:[%s823_s5 + $0x20] sm:$0xff] %v422_v26  ;;  %v1017_v22 = vunpack.c.h.bf16 %v740_v27  ;;  %v339_v44 = vadd.f32 %v755_v34, %v304_v10  ;;  %v399_v41 = vadd.f32 %v367_v53, %v335_v13 }
  0x24   : > { %v427_v39 = vmax.f32 %v395_v15, 0.0  ;;  %455 = vst [vmem:[%s823_s5 + $0x28] sm:$0xff] %v423_v16  ;;  %v1018_v37 = vunpack.c.l.bf16 %v743_v28  ;;  %v340_v38 = vadd.f32 %v755_v34, %v305_v29  ;;  %v400_v43 = vadd.f32 %v368_v56, %v336_v18 }
  0x25   : > { %v308_v45 = vmul.f32 %v722_v12, %v1017_v22  ;;  %v428_v23 = vmax.f32 %v396_v19, 0.0  ;;  %456 = vst [vmem:[%s823_s5 + $0x30] sm:$0xff] %v424_v20  ;;  %v1019_v27 = vunpack.c.h.bf16 %v743_v28  ;;  %v341_v48 = vadd.f32 %v755_v34, %v306_v35 }
  0x26   : > { %v309_v21 = vmul.f32 %v722_v12, %v1018_v37  ;;  %v401_v50 = vadd.f32 %v836_v57, %v337_v54  ;;  %v429_v51 = vmax.f32 %v397_v31, 0.0  ;;  %457 = vst [vmem:[%s823_s5 + $0x38] sm:$0xff] %v425_v14  ;;  %v1020_v52 = vunpack.c.l.bf16 %v747_v30 }
  0x27   : > { %v310_v24 = vmul.f32 %v722_v12, %v1019_v27  ;;  %v342_v56 = vadd.f32 %v755_v34, %v307_v36  ;;  %v402_v7 = vadd.f32 %v839_v58, %v338_v32  ;;  %v430_v11 = vmax.f32 %v398_v33, 0.0  ;;  %458 = vst [vmem:[%s823_s5 + $0x40] sm:$0xff] %v426_v55 }
  0x28   : > { %v311_v53 = vmul.f32 %v722_v12, %v1020_v52  ;;  %v1021_v28 = vunpack.c.h.bf16 %v747_v30  ;;  %v343_v57 = vadd.f32 %v755_v34, %v308_v45  ;;  %v403_v26 = vadd.f32 %v842_v25, %v339_v44  ;;  %459 = vst [vmem:[%s823_s5 + $0x48] sm:$0xff] %v427_v39 }
  0x29   : > { %v431_v10 = vmax.f32 %v399_v41, 0.0  ;;  %v1022_v13 = vunpack.c.l.bf16 %v772_v42  ;;  %v344_v58 = vadd.f32 %v755_v34, %v309_v21  ;;  %v404_v16 = vadd.f32 %v845_v59, %v340_v38  ;;  %460 = vst [vmem:[%s823_s5 + $0x50] sm:$0xff] %v428_v23 }
  0x2a   : > { %v312_v9 = vmul.f32 %v722_v12, %v1021_v28  ;;  %v432_v29 = vmax.f32 %v400_v43, 0.0  ;;  %v1023_v30 = vunpack.c.h.bf16 %v772_v42  ;;  %v345_v25 = vadd.f32 %v755_v34, %v310_v24  ;;  %461 = vst [vmem:[%s823_s5 + $0x58] sm:$0xff] %v429_v51 }
  0x2b   : > { %v313_v15 = vmul.f32 %v722_v12, %v1022_v13  ;;  %v405_v19 = vadd.f32 %v848_v60, %v341_v48  ;;  %v433_v20 = vmax.f32 %v401_v50, 0.0  ;;  %v1024_v17 = vunpack.c.l.bf16 %v779_v47  ;;  %462 = vst [vmem:[%s823_s5 + $0x60] sm:$0xff] %v430_v11 }
  0x2c   : > { %v314_v18 = vmul.f32 %v722_v12, %v1023_v30  ;;  %v346_v59 = vadd.f32 %v755_v34, %v311_v53  ;;  %v406_v54 = vadd.f32 %v851_v63, %v342_v56  ;;  %v434_v31 = vmax.f32 %v402_v7, 0.0  ;;  %463 = vst [vmem:[%s823_s5 + $0x68] sm:$0xff] %v431_v10 }
  0x2d   : > { %v315_v35 = vmul.f32 %v722_v12, %v1024_v17  ;;  %v1025_v42 = vunpack.c.h.bf16 %v779_v47  ;;  %v347_v60 = vadd.f32 %v755_v34, %v312_v9  ;;  %v407_v46 = vadd.f32 %v854_v0, %v343_v57  ;;  %464 = vst [vmem:[%s823_s5 + $0x70] sm:$0xff] %v432_v29 }
  0x2e   : > { %v435_v36 = vmax.f32 %v403_v26, 0.0  ;;  %v1026_v32 = vunpack.c.l.bf16 %v783_v49  ;;  %v348_v63 = vadd.f32 %v755_v34, %v313_v15  ;;  %v408_v55 = vadd.f32 %v857_v1, %v344_v58  ;;  %465 = vst [vmem:[%s823_s5 + $0x78] sm:$0xff] %v433_v20 }
  0x2f   : > { %v316_v14 = vmul.f32 %v722_v12, %v1025_v42  ;;  %v436_v22 = vmax.f32 %v404_v16, 0.0  ;;  %v1027_v47 = vunpack.c.h.bf16 %v783_v49  ;;  %v349_v0 = vadd.f32 %v755_v34, %v314_v18  ;;  %466 = vst [vmem:[%s823_s5 + $0x80] sm:$0xff] %v434_v31 }
  0x30   : > { %v317_v33 = vmul.f32 %v722_v12, %v1026_v32  ;;  %v409_v44 = vadd.f32 %v860_v3, %v345_v25  ;;  %v437_v41 = vmax.f32 %v405_v19, 0.0  ;;  %v350_v39 = vadd.f32 %v755_v34, %v315_v35  ;;  %467 = vst [vmem:[%s823_s5 + $0x88] sm:$0xff] %v435_v36 }
  0x31   : > { %v318_v45 = vmul.f32 %v722_v12, %v1027_v47  ;;  %v410_v37 = vadd.f32 %v863_v4, %v346_v59  ;;  %v438_v21 = vmax.f32 %v406_v54, 0.0  ;;  %v351_v1 = vadd.f32 %v755_v34, %v316_v14  ;;  %468 = vst [vmem:[%s823_s5 + $0x90] sm:$0xff] %v436_v22 }
  0x32   : > { %v411_v49 = vadd.f32 %v866_v6, %v347_v60  ;;  %v439_v12 = vmax.f32 %v407_v46, 0.0  ;;  %v352_v38 = vadd.f32 %v755_v34, %v317_v33  ;;  %v412_v3 = vadd.f32 %v869_v2, %v348_v63  ;;  %469 = vst [vmem:[%s823_s5 + $0x98] sm:$0xff] %v437_v41 }
  0x33   : > { %v440_v43 = vmax.f32 %v408_v55, 0.0  ;;  %v353_v4 = vadd.f32 %v755_v34, %v318_v45  ;;  %v413_v23 = vadd.f32 %v872_v62, %v349_v0  ;;  %v441_v27 = vmax.f32 %v409_v44, 0.0  ;;  %470 = vst [vmem:[%s823_s5 + $0xa0] sm:$0xff] %v438_v21 }
  0x34   : > { %v414_v6 = vadd.f32 %v875_v61, %v350_v39  ;;  %v442_v24 = vmax.f32 %v410_v37, 0.0  ;;  %v415_v48 = vadd.f32 %v882_v40, %v351_v1  ;;  %v443_v2 = vmax.f32 %v411_v49, 0.0  ;;  %471 = vst [vmem:[%s823_s5 + $0xa8] sm:$0xff] %v439_v12 }
  0x35   : > { %v416_v34 = vadd.f32 %v885_v5, %v352_v38  ;;  %v444_v62 = vmax.f32 %v412_v3, 0.0  ;;  %472 = vst [vmem:[%s823_s5 + $0xb0] sm:$0xff] %v440_v43  ;;  %v417_v50 = vadd.f32 %v888_v8, %v353_v4  ;;  %v445_v51 = vmax.f32 %v413_v23, 0.0 }
  0x36   : > { %473 = vst [vmem:[%s823_s5 + $0xb8] sm:$0xff] %v441_v27  ;;  %v446_v61 = vmax.f32 %v414_v6, 0.0  ;;  %v447_v52 = vmax.f32 %v415_v48, 0.0 }
  0x37   : > { %474 = vst [vmem:[%s823_s5 + $0xc0] sm:$0xff] %v442_v24  ;;  %v448_v40 = vmax.f32 %v416_v34, 0.0  ;;  %v449_v53 = vmax.f32 %v417_v50, 0.0 }
  0x38   : > { %475 = vst [vmem:[%s823_s5 + $0xc8] sm:$0xff] %v443_v2 }
  0x39   : > { %476 = vst [vmem:[%s823_s5 + $0xd0] sm:$0xff] %v444_v62 }
  0x3a   : > { %477 = vst [vmem:[%s823_s5 + $0xd8] sm:$0xff] %v445_v51 }
  0x3b   : > { %478 = vst [vmem:[%s823_s5 + $0xe0] sm:$0xff] %v446_v61 }
  0x3c   : > { %479 = vst [vmem:[%s823_s5 + $0xe8] sm:$0xff] %v447_v52 }
  0x3d   : > { %480 = vst [vmem:[%s823_s5 + $0xf0] sm:$0xff] %v448_v40 }
  0x3e   : > { %481 = vst [vmem:[%s823_s5 + $0xf8] sm:$0xff] %v449_v53 }
  0x3f PF: > { %s14_s15 = sadd.s32 1, %s660_s15  }
  0x40   : > { %p11_p4 = scmp.ge.s32.totalorder %s14_s15, 4  }
  0x42   :  { %13 = sbr.rel (!%p11_p4) target bundleno = 1 (0x1), region = 69 }

// kernel: resnet_basic_block.3
= control target key start
LH: loop header
LB: loop body
LE: loop exit
PB: predicated region body
PF: predicated region fallthrough
CT: control target
= control target key end

     0   :  { %s3318_s12 = smov 0   ;;  %s4243_s0 = inlined_call_operand.vmem [shape: f32[2,16,16,128], index: 0, kind: input, shape index: {}]   ;;  %s4244_s1 = inlined_call_operand.vmem [shape: bf16[3,3,128,128], index: 1, kind: input, shape index: {}]   ;;  %s4245_s2 = inlined_call_operand.vmem [shape: bf16[2,16,16,128], index: 2, kind: output, shape index: {0}]   ;;  %s4246_s3 = inlined_call_operand.vmem [shape: f32[2,8,128], index: 3, kind: output, shape index: {1}]  }
   0x1 LB: > { %s2657_s13 = sadd.s32 4294967295, %s3294_s12   ;;  %p2661_p0 = scmp.ge.s32.totalorder %s3294_s12, 1  ;;  %s3294_s12 = sphi %s3318_s12, %s14_s12  }
   0x2   : > { %p140_p1 = scmp.lt.s32.totalorder %s3294_s12, 3 }
   0x4   : > { %p141_p2 = pnand %p2661_p0, %p140_p1 }
   0x6   : > { %144 = sbr.rel (%p141_p2) target bundleno = 846 (0x34e), region = 28 }
   0xb   : > { %v3102_v0 = vld [vmem:[%s4244_s1 + $0x78] sm:$0xff]  ;;  %p168_p3 = scmp.lt.s32.totalorder %s2657_s13, 1  ;;  %v3296_v1 = vmov 0.0   ;;  %v3101_v2 = vld [vmem:[%s4244_s1 + $0x70] sm:$0xff]  ;;  %v3100_v3 = vld [vmem:[%s4244_s1 + $0x68] sm:$0xff]  ;;  %v3297_v24 = vmov 0.0|0.0  }
   0xc   : > { %182 = vst [vmem:[#allocation2] sm:$0xff] %v3296_v1  ;;  %3254 = vmatpush.bf16.msra.mxu1 %v3102_v0  ;;  %3255 = vmatpush.bf16.msra.mxu2 %v3102_v0  ;;  %v3099_v6 = vld [vmem:[%s4244_s1 + $0x60] sm:$0xff]  ;;  %v3098_v7 = vld [vmem:[%s4244_s1 + $0x58] sm:$0xff]  ;;  %v3097_v8 = vld [vmem:[%s4244_s1 + $0x50] sm:$0xff] }
   0xd   : > { %s4292_s13 = smov (!%p168_p3, %s2657_s13), 1  ;;  %183 = vst [vmem:[#allocation2 + $0x8] sm:$0xff] %v3296_v1  ;;  %3256 = vmatpush.bf16.msra.mxu3 %v3102_v0  ;;  %496 = vmatpush.bf16.msra.mxu0 %v3102_v0  ;;  %v3096_v9 = vld [vmem:[%s4244_s1 + $0x48] sm:$0xff]  ;;  %v3095_v10 = vld [vmem:[%s4244_s1 + $0x40] sm:$0xff]  ;;  %v3110_v15 = vld [vmem:[%s4244_s1 + $0xb8] sm:$0xff] }
   0xe   : > { %184 = vst [vmem:[#allocation2 + $0x10] sm:$0xff] %v3296_v1  ;;  %s3085_s18 = sshll.u32 %s4292_s13, 8  ;;  %v3118_v16 = vld [vmem:[%s4244_s1 + $0xf8] sm:$0xff]  ;;  %v3109_v22 = vld [vmem:[%s4244_s1 + $0xb0] sm:$0xff]  ;;  %v3108_v27 = vld [vmem:[%s4244_s1 + $0xa8] sm:$0xff]  ;;  %s2666_s20 = sshll.u32 %s4292_s13, 3 }
   0xf   : > { %185 = vst [vmem:[#allocation2 + $0x18] sm:$0x1] %v3296_v1  ;;  %s3342_s21 = scalar_lea.vmem %s4243_s0, %s3085_s18  ;;  %v3094_v20 = vld [vmem:[%s4244_s1 + $0x38] sm:$0xff]  ;;  %v3117_v23 = vld [vmem:[%s4244_s1 + $0xf0] sm:$0xff]  ;;  %v3116_v28 = vld [vmem:[%s4244_s1 + $0xe8] sm:$0xff]  ;;  %s181_s24 = scalar_lea.vmem %s4246_s3, %s2666_s20 }
  0x10   : > { %186 = vst [vmem:[#allocation2 + $0x20] sm:$0xff] %v3296_v1  ;;  %3257 = vmatpush.bf16.msra.mxu1 %v3101_v2  ;;  %3258 = vmatpush.bf16.msra.mxu2 %v3101_v2  ;;  %v260_v4 = vld [vmem:[%s3342_s21 + $0x30] sm:$0xff]  ;;  %v261_v5 = vld [vmem:[%s3342_s21 + $0x38] sm:$0xff]  ;;  %v3092_v29 = vld [vmem:[%s4244_s1 + $0x28] sm:$0xff] }
  0x11   : > { %189 = vst [vmem:[#allocation2 + $0x38] sm:$0x1] %v3296_v1  ;;  %3259 = vmatpush.bf16.msra.mxu3 %v3101_v2  ;;  %497 = vmatpush.bf16.msra.mxu0 %v3101_v2  ;;  %v3385_v11 = vld [vmem:[%s3342_s21 + $0x70] sm:$0xff]  ;;  %v3388_v12 = vld [vmem:[%s3342_s21 + $0x78] sm:$0xff]  ;;  %v3404_v17 = vpack.c.bf16 %v261_v5, %v260_v4  ;;  %v3124_v30 = vld [vmem:[%s4244_s1 + $0x128] sm:$0xff] }
  0x12   : > { %293 = vst [vmem:[#allocation2 + $0x88] sm:$0xff] %v260_v4  ;;  %v3392_v13 = vld [vmem:[%s3342_s21 + $0xb0] sm:$0xff]  ;;  %v3395_v14 = vld [vmem:[%s3342_s21 + $0xb8] sm:$0xff]  ;;  %v3409_v18 = vpack.c.bf16 %v3388_v12, %v3385_v11  ;;  %v262_v31 = vld [vmem:[%s3342_s21 + $0x40] sm:$0xff] }
  0x13   : > { %294 = vst [vmem:[#allocation2 + $0x90] sm:$0xff] %v261_v5  ;;  %v427_v19 = vpack.c.bf16 %v3395_v14, %v3392_v13  ;;  %v3126_v21 = vld [vmem:[%s4244_s1 + $0x138] sm:$0xff]  ;;  %v3093_v25 = vld [vmem:[%s4244_s1 + $0x30] sm:$0xff]  ;;  %v3107_v32 = vld [vmem:[%s4244_s1 + $0xa0] sm:$0xff] }
  0x14   : > { %190 = vst [vmem:[#allocation2 + $0x40] sm:$0xff] %v3296_v1  ;;  %3260 = vmatpush.bf16.msra.mxu1 %v3100_v3  ;;  %3261 = vmatpush.bf16.msra.mxu2 %v3100_v3  ;;  %v3125_v26 = vld [vmem:[%s4244_s1 + $0x130] sm:$0xff]  ;;  %v3115_v33 = vld [vmem:[%s4244_s1 + $0xe0] sm:$0xff]  ;;  %v263_v34 = vld [vmem:[%s3342_s21 + $0x48] sm:$0xff] }
  0x15   : > { %193 = vst [vmem:[#allocation2 + $0x58] sm:$0x1] %v3296_v1  ;;  %3262 = vmatpush.bf16.msra.mxu3 %v3100_v3  ;;  %498 = vmatpush.bf16.msra.mxu0 %v3100_v3  ;;  %v270_v35 = vld [vmem:[%s3342_s21 + $0x80] sm:$0xff]  ;;  %v271_v36 = vld [vmem:[%s3342_s21 + $0x88] sm:$0xff]  ;;  %v3106_v43 = vld [vmem:[%s4244_s1 + $0x98] sm:$0xff]  ;;  %v3487_v45 = vpack.c.bf16 %v263_v34, %v262_v31 }
  0x16   : > { %194 = vst [vmem:[#allocation2 + $0x60] sm:$0xff] %v3296_v1  ;;  %v278_v37 = vld [vmem:[%s3342_s21 + $0xc0] sm:$0xff]  ;;  %v279_v38 = vld [vmem:[%s3342_s21 + $0xc8] sm:$0xff]  ;;  %v3114_v44 = vld [vmem:[%s4244_s1 + $0xd8] sm:$0xff]  ;;  %v3489_v46 = vpack.c.bf16 %v271_v36, %v270_v35 }
  0x17   : > { %197 = vst [vmem:[#allocation2 + $0x78] sm:$0x1] %v3296_v1  ;;  %v254_v39 = vld [vmem:[%s3342_s21] sm:$0xff]  ;;  %v255_v40 = vld [vmem:[%s3342_s21 + $0x8] sm:$0xff]  ;;  %v428_v47 = vpack.c.bf16 %v279_v38, %v278_v37  ;;  %v3090_v49 = vld [vmem:[%s4244_s1 + $0x18] sm:$0xff] }
  0x18   : > { %198 = vst [vmem:[#allocation2 + $0x80] sm:$0xff] %v3296_v1  ;;  %3263 = vmatpush.bf16.msra.mxu1 %v3099_v6  ;;  %3264 = vmatpush.bf16.msra.mxu2 %v3099_v6  ;;  %v3091_v41 = vld [vmem:[%s4244_s1 + $0x20] sm:$0xff]  ;;  %v3492_v48 = vpack.c.bf16 %v255_v40, %v254_v39  ;;  %v3122_v50 = vld [vmem:[%s4244_s1 + $0x118] sm:$0xff]  ;;  %v3105_v51 = vld [vmem:[%s4244_s1 + $0x90] sm:$0xff] }
  0x19   : > { %201 = vst [vmem:[#allocation2 + $0x98] sm:$0x1] %v3296_v1  ;;  %3265 = vmatpush.bf16.msra.mxu3 %v3099_v6  ;;  %499 = vmatpush.bf16.msra.mxu0 %v3099_v6  ;;  %v3123_v42 = vld [vmem:[%s4244_s1 + $0x120] sm:$0xff]  ;;  %v3113_v52 = vld [vmem:[%s4244_s1 + $0xd0] sm:$0xff]  ;;  %v3104_v55 = vld [vmem:[%s4244_s1 + $0x88] sm:$0xff] }
  0x1a   : > { %202 = vst [vmem:[#allocation2 + $0xa0] sm:$0xff] %v3296_v1  ;;  %v3089_v53 = vld [vmem:[%s4244_s1 + $0x10] sm:$0xff]  ;;  %v3112_v56 = vld [vmem:[%s4244_s1 + $0xc8] sm:$0xff]  ;;  %v265_v58 = vld [vmem:[%s3342_s21 + $0x58] sm:$0xff] }
  0x1b   : > { %205 = vst [vmem:[#allocation2 + $0xb8] sm:$0x1] %v3296_v1  ;;  %v3121_v54 = vld [vmem:[%s4244_s1 + $0x110] sm:$0xff]  ;;  %v3088_v59 = vld [vmem:[%s4244_s1 + $0x8] sm:$0xff]  ;;  %v3103_v62 = vld [vmem:[%s4244_s1 + $0x80] sm:$0xff] }
  0x1c   : > { %206 = vst [vmem:[#allocation2 + $0xc0] sm:$0xff] %v3296_v1  ;;  %3266 = vmatpush.bf16.msra.mxu1 %v3098_v7  ;;  %3267 = vmatpush.bf16.msra.mxu2 %v3098_v7  ;;  %v264_v57 = vld [vmem:[%s3342_s21 + $0x50] sm:$0xff]  ;;  %v3120_v60 = vld [vmem:[%s4244_s1 + $0x108] sm:$0xff]  ;;  %v3111_v63 = vld [vmem:[%s4244_s1 + $0xc0] sm:$0xff] }
  0x1d   : > { %209 = vst [vmem:[#allocation2 + $0xd8] sm:$0x1] %v3296_v1  ;;  %3268 = vmatpush.bf16.msra.mxu3 %v3098_v7  ;;  %500 = vmatpush.bf16.msra.mxu0 %v3098_v7  ;;  %v272_v61 = vld [vmem:[%s3342_s21 + $0x90] sm:$0xff]  ;;  %v273_v0 = vld [vmem:[%s3342_s21 + $0x98] sm:$0xff]  ;;  %v3087_v5 = vld [vmem:[%s4244_s1] sm:$0xff]  ;;  %v3547_v7 = vpack.c.bf16 %v265_v58, %v264_v57 }
  0x1e   : > { %210 = vst [vmem:[#allocation2 + $0xe0] sm:$0xff] %v3296_v1  ;;  %v281_v2 = vld [vmem:[%s3342_s21 + $0xd8] sm:$0xff]  ;;  %v256_v3 = vld [vmem:[%s3342_s21 + $0x10] sm:$0xff]  ;;  %v3119_v6 = vld [vmem:[%s4244_s1 + $0x100] sm:$0xff] }
  0x1f   : > { %213 = vst [vmem:[#allocation2 + $0xf8] sm:$0x1] %v3296_v1  ;;  %v257_v4 = vld [vmem:[%s3342_s21 + $0x18] sm:$0xff] }
  0x20   : > { %214 = vst [vmem:[#allocation2 + $0x100] sm:$0xff] %v3296_v1  ;;  %3269 = vmatpush.bf16.msra.mxu1 %v3097_v8  ;;  %3270 = vmatpush.bf16.msra.mxu2 %v3097_v8 }
  0x21   : > { %217 = vst [vmem:[#allocation2 + $0x118] sm:$0x1] %v3296_v1  ;;  %3271 = vmatpush.bf16.msra.mxu3 %v3097_v8  ;;  %501 = vmatpush.bf16.msra.mxu0 %v3097_v8  ;;  %v3549_v8 = vpack.c.bf16 %v273_v0, %v272_v61 }
  0x22   : > { %218 = vst [vmem:[#allocation2 + $0x120] sm:$0xff] %v3296_v1 }
  0x23   : > { %221 = vst [vmem:[#allocation2 + $0x138] sm:$0x1] %v3296_v1 }
  0x24   : > { %222 = vst [vmem:[#allocation2 + $0x140] sm:$0xff] %v3296_v1  ;;  %3272 = vmatpush.bf16.msra.mxu1 %v3096_v9  ;;  %3273 = vmatpush.bf16.msra.mxu2 %v3096_v9 }
  0x25   : > { %225 = vst [vmem:[#allocation2 + $0x158] sm:$0x1] %v3296_v1  ;;  %3274 = vmatpush.bf16.msra.mxu3 %v3096_v9  ;;  %502 = vmatpush.bf16.msra.mxu0 %v3096_v9 }
  0x26   : > { %226 = vst [vmem:[#allocation2 + $0x160] sm:$0xff] %v3296_v1 }
  0x27   : > { %229 = vst [vmem:[#allocation2 + $0x178] sm:$0x1] %v3296_v1 }
  0x28   : > { %230 = vst [vmem:[#allocation2 + $0x180] sm:$0xff] %v3296_v1  ;;  %3275 = vmatpush.bf16.msra.mxu1 %v3095_v10  ;;  %3276 = vmatpush.bf16.msra.mxu2 %v3095_v10 }
  0x29   : > { %233 = vst [vmem:[#allocation2 + $0x198] sm:$0x1] %v3296_v1  ;;  %3277 = vmatpush.bf16.msra.mxu3 %v3095_v10  ;;  %503 = vmatpush.bf16.msra.mxu0 %v3095_v10  ;;  %v3551_v10 = vpack.c.bf16 %v257_v4, %v256_v3 }
  0x2a   : > { %234 = vst [vmem:[#allocation2 + $0x1a0] sm:$0xff] %v3296_v1 }
  0x2b   : > { %237 = vst [vmem:[#allocation2 + $0x1b8] sm:$0x1] %v3296_v1  ;;  %524 = vmatmul.bf16.vlgmr.msra.gmra.mxu1 %v3404_v17  ;;  %544 = vmatmul.bf16.vlgmr.msra.gmra.mxu2 %v3409_v18 }
  0x2c   : > { %835 = vmatpush.bf16.msrb.mxu2 %v3110_v15  ;;  %238 = vst [vmem:[#allocation2 + $0x1c0] sm:$0xff] %v3296_v1  ;;  %564 = vmatmul.bf16.vlgmr.msra.gmra.mxu3 %v427_v19  ;;  %v282_v15 = vld [vmem:[%s3342_s21 + $0xe0] sm:$0xff]  ;;  %v3150_v19 = vld [vmem:[%s4244_s1 + $0x1f8] sm:$0xff] }
  0x2d   : > { %1069 = vmatpush.bf16.msrb.mxu3 %v3118_v16  ;;  %241 = vst [vmem:[#allocation2 + $0x1d8] sm:$0x1] %v3296_v1  ;;  %504 = vmatmul.bf16.vlgmr.msra.gmra.mxu0 %v3297_v24  ;;  %v3142_v16 = vld [vmem:[%s4244_s1 + $0x1b8] sm:$0xff]  ;;  %v259_v24 = vld [vmem:[%s3342_s21 + $0x28] sm:$0xff] }
  0x2e   : > { %242 = vst [vmem:[#allocation2 + $0x1e0] sm:$0xff] %v3296_v1  ;;  %633 = vmatpush.bf16.msrb.mxu1 %v3094_v20  ;;  %1303 = vmatpush.bf16.msrb.mxu0 %v3126_v21  ;;  %v3134_v20 = vld [vmem:[%s4244_s1 + $0x178] sm:$0xff]  ;;  %v283_v21 = vld [vmem:[%s3342_s21 + $0xe8] sm:$0xff] }
  0x2f   : > { %245 = vst [vmem:[#allocation2 + $0x1f8] sm:$0x1] %v3296_v1 }
  0x30   : > { %836 = vmatpush.bf16.msrb.mxu2 %v3109_v22  ;;  %246 = vst [vmem:[#allocation2 + $0x200] sm:$0xff] %v3296_v1  ;;  %v3158_v22 = vld [vmem:[%s4244_s1 + $0x238] sm:$0xff] }
  0x31   : > { %1070 = vmatpush.bf16.msrb.mxu3 %v3117_v23  ;;  %249 = vst [vmem:[#allocation2 + $0x218] sm:$0x1] %v3296_v1  ;;  %v258_v23 = vld [vmem:[%s3342_s21 + $0x20] sm:$0xff] }
  0x32   : > { %250 = vst [vmem:[#allocation2 + $0x220] sm:$0xff] %v3296_v1  ;;  %634 = vmatpush.bf16.msrb.mxu1 %v3093_v25  ;;  %1304 = vmatpush.bf16.msrb.mxu0 %v3125_v26 }
  0x33   : > { %251 = vst [vmem:[#allocation2 + $0x228] sm:$0xff] %v3296_v1 }
  0x34   : > { %837 = vmatpush.bf16.msrb.mxu2 %v3108_v27  ;;  %252 = vst [vmem:[#allocation2 + $0x230] sm:$0xff] %v3296_v1  ;;  %v430_v27 = vpack.c.bf16 %v283_v21, %v282_v15 }
  0x35   : > { %1071 = vmatpush.bf16.msrb.mxu3 %v3116_v28  ;;  %253 = vst [vmem:[#allocation2 + $0x238] sm:$0x1] %v3296_v1  ;;  %v280_v1 = vld [vmem:[%s3342_s21 + $0xd0] sm:$0xff]  ;;  %v418_v28 = vpack.c.bf16 %v259_v24, %v258_v23 }
  0x36   : > { %301 = vst [vmem:[#allocation2 + $0x108] sm:$0xff] %v3385_v11  ;;  %635 = vmatpush.bf16.msrb.mxu1 %v3092_v29  ;;  %1305 = vmatpush.bf16.msrb.mxu0 %v3124_v30  ;;  %v429_v9 = vpack.c.bf16 %v281_v2, %v280_v1  ;;  %v266_v11 = vld [vmem:[%s3342_s21 + $0x60] sm:$0xff]  ;;  %v320_v30 = vld [vmem:[#allocation2 + $0xf] sm:$0xff] }
  0x37   : > { %302 = vst [vmem:[#allocation2 + $0x110] sm:$0xff] %v3388_v12  ;;  %v267_v12 = vld [vmem:[%s3342_s21 + $0x68] sm:$0xff] }
  0x38   : > { %838 = vmatpush.bf16.msrb.mxu2 %v3107_v32  ;;  %309 = vst [vmem:[#allocation2 + $0x188] sm:$0xff] %v3392_v13  ;;  %v274_v13 = vld [vmem:[%s3342_s21 + $0xa0] sm:$0xff]  ;;  %v3576_v25 = vpack.c.bf16 %v267_v12, %v266_v11  ;;  %v723_v32 = vld [vmem:[#allocation2 + $0x11] sm:$0xff] }
  0x39   : > { %1072 = vmatpush.bf16.msrb.mxu3 %v3115_v33  ;;  %310 = vst [vmem:[#allocation2 + $0x190] sm:$0xff] %v3395_v14  ;;  %v275_v14 = vld [vmem:[%s3342_s21 + $0xa8] sm:$0xff] }
  0x3a   : > { %295 = vst [vmem:[#allocation2 + $0xa8] sm:$0xff] %v262_v31  ;;  %636 = vmatpush.bf16.msrb.mxu1 %v3091_v41  ;;  %1306 = vmatpush.bf16.msrb.mxu0 %v3123_v42  ;;  %v3578_v26 = vpack.c.bf16 %v275_v14, %v274_v13  ;;  %v319_v29 = vld [vmem:[#allocation2 + $0x7] sm:$0xff]  ;;  %v3157_v41 = vld [vmem:[%s4244_s1 + $0x230] sm:$0xff] }
  0x3b   : > { %296 = vst [vmem:[#allocation2 + $0xb0] sm:$0xff] %v263_v34  ;;  %529 = vmatmul.bf16.gmra.mxu1 %v3487_v45  ;;  %549 = vmatmul.bf16.gmra.mxu2 %v3489_v46  ;;  %v722_v31 = vld [vmem:[#allocation2 + $0x9] sm:$0xff] }
  0x3c   : > { %839 = vmatpush.bf16.msrb.mxu2 %v3106_v43  ;;  %303 = vst [vmem:[#allocation2 + $0x128] sm:$0xff] %v270_v35  ;;  %569 = vmatmul.bf16.gmra.mxu3 %v428_v47  ;;  %v351_v35 = vpack.c.bf16 %v320_v30, %v319_v29 }
  0x3d   : > { %1073 = vmatpush.bf16.msrb.mxu3 %v3114_v44  ;;  %304 = vst [vmem:[#allocation2 + $0x130] sm:$0xff] %v271_v36  ;;  %509 = vmatmul.bf16.gmra.mxu0 %v3492_v48  ;;  %v754_v36 = vpack.c.bf16 %v723_v32, %v722_v31 }
  0x3e   : > { %311 = vst [vmem:[#allocation2 + $0x1a8] sm:$0xff] %v278_v37  ;;  %637 = vmatpush.bf16.msrb.mxu1 %v3090_v49  ;;  %1307 = vmatpush.bf16.msrb.mxu0 %v3122_v50 }
  0x3f   : > { %312 = vst [vmem:[#allocation2 + $0x1b0] sm:$0xff] %v279_v38  ;;  %v3141_v38 = vld [vmem:[%s4244_s1 + $0x1b0] sm:$0xff] }
  0x40   : > { %840 = vmatpush.bf16.msrb.mxu2 %v3105_v51  ;;  %287 = vst [vmem:[#allocation2 + $0x28] sm:$0xff] %v254_v39  ;;  %v3149_v39 = vld [vmem:[%s4244_s1 + $0x1f0] sm:$0xff] }
  0x41   : > { %1074 = vmatpush.bf16.msrb.mxu3 %v3113_v52  ;;  %288 = vst [vmem:[#allocation2 + $0x30] sm:$0xff] %v255_v40  ;;  %v3133_v40 = vld [vmem:[%s4244_s1 + $0x170] sm:$0xff] }
  0x42   : > { %297 = vst [vmem:[#allocation2 + $0xc8] sm:$0xff] %v264_v57  ;;  %638 = vmatpush.bf16.msrb.mxu1 %v3089_v53  ;;  %1308 = vmatpush.bf16.msrb.mxu0 %v3121_v54  ;;  %v3148_v57 = vld [vmem:[%s4244_s1 + $0x1e8] sm:$0xff] }
  0x43   : > { %298 = vst [vmem:[#allocation2 + $0xd0] sm:$0xff] %v265_v58  ;;  %v3132_v58 = vld [vmem:[%s4244_s1 + $0x168] sm:$0xff] }
  0x44   : > { %841 = vmatpush.bf16.msrb.mxu2 %v3104_v55  ;;  %305 = vst [vmem:[#allocation2 + $0x148] sm:$0xff] %v272_v61 }
  0x45   : > { %1075 = vmatpush.bf16.msrb.mxu3 %v3112_v56  ;;  %306 = vst [vmem:[#allocation2 + $0x150] sm:$0xff] %v273_v0  ;;  %v3140_v56 = vld [vmem:[%s4244_s1 + $0x1a8] sm:$0xff] }
  0x46   : > { %313 = vst [vmem:[#allocation2 + $0x1c8] sm:$0xff] %v280_v1  ;;  %639 = vmatpush.bf16.msrb.mxu1 %v3088_v59  ;;  %1309 = vmatpush.bf16.msrb.mxu0 %v3120_v60  ;;  %v3156_v59 = vld [vmem:[%s4244_s1 + $0x228] sm:$0xff] }
  0x47   : > { %314 = vst [vmem:[#allocation2 + $0x1d0] sm:$0xff] %v281_v2  ;;  %v956_v33 = vld [vmem:[#allocation2 + $0x27] sm:$0xff] }
  0x48   : > { %842 = vmatpush.bf16.msrb.mxu2 %v3103_v62  ;;  %289 = vst [vmem:[#allocation2 + $0x48] sm:$0xff] %v256_v3  ;;  %v957_v34 = vld [vmem:[#allocation2 + $0x2f] sm:$0xff]  ;;  %v962_v62 = vld [vmem:[#allocation2 + $0x87] sm:$0xff] }
  0x49   : > { %1076 = vmatpush.bf16.msrb.mxu3 %v3111_v63  ;;  %290 = vst [vmem:[#allocation2 + $0x50] sm:$0xff] %v257_v4  ;;  %v988_v37 = vpack.c.bf16 %v957_v34, %v956_v33  ;;  %v724_v42 = vld [vmem:[#allocation2 + $0x29] sm:$0xff]  ;;  %v725_v43 = vld [vmem:[#allocation2 + $0x31] sm:$0xff] }
  0x4a   : > { %299 = vst [vmem:[#allocation2 + $0xe8] sm:$0xff] %v266_v11  ;;  %640 = vmatpush.bf16.msrb.mxu1 %v3087_v5  ;;  %1310 = vmatpush.bf16.msrb.mxu0 %v3119_v6  ;;  %v963_v63 = vld [vmem:[#allocation2 + $0x8f] sm:$0xff]  ;;  %v964_v4 = vld [vmem:[#allocation2 + $0xa7] sm:$0xff] }
  0x4b   : > { %300 = vst [vmem:[#allocation2 + $0xf0] sm:$0xff] %v267_v12  ;;  %534 = vmatmul.bf16.gmra.mxu1 %v3547_v7  ;;  %554 = vmatmul.bf16.gmra.mxu2 %v3549_v8  ;;  %v3620_v1 = vpack.c.bf16 %v963_v63, %v962_v62  ;;  %v730_v2 = vld [vmem:[#allocation2 + $0x89] sm:$0xff]  ;;  %v731_v3 = vld [vmem:[#allocation2 + $0x91] sm:$0xff]  ;;  %v3147_v12 = vld [vmem:[%s4244_s1 + $0x1e0] sm:$0xff] }
  0x4c   : > { %307 = vst [vmem:[#allocation2 + $0x168] sm:$0xff] %v274_v13  ;;  %574 = vmatmul.bf16.gmra.mxu3 %v429_v9  ;;  %1772 = vmatpush.bf16.msra.mxu2 %v3142_v16  ;;  %v965_v5 = vld [vmem:[#allocation2 + $0xaf] sm:$0xff]  ;;  %v3625_v6 = vpack.c.bf16 %v731_v3, %v730_v2 }
  0x4d   : > { %514 = vmatmul.bf16.gmra.mxu0 %v3551_v10  ;;  %308 = vst [vmem:[#allocation2 + $0x170] sm:$0xff] %v275_v14  ;;  %2006 = vmatpush.bf16.msra.mxu3 %v3150_v19  ;;  %v3155_v19 = vld [vmem:[%s4244_s1 + $0x220] sm:$0xff] }
  0x4e   : > { %315 = vst [vmem:[#allocation2 + $0x1e8] sm:$0xff] %v282_v15  ;;  %1537 = vmatpush.bf16.msra.mxu1 %v3134_v20  ;;  %2240 = vmatpush.bf16.msra.mxu0 %v3158_v22  ;;  %v3131_v15 = vld [vmem:[%s4244_s1 + $0x160] sm:$0xff]  ;;  %v732_v20 = vld [vmem:[#allocation2 + $0xa9] sm:$0xff] }
  0x4f   : > { %316 = vst [vmem:[#allocation2 + $0x1f0] sm:$0xff] %v283_v21  ;;  %v958_v44 = vld [vmem:[#allocation2 + $0x47] sm:$0xff]  ;;  %v733_v21 = vld [vmem:[#allocation2 + $0xb1] sm:$0xff] }
  0x50   : > { %291 = vst [vmem:[#allocation2 + $0x68] sm:$0xff] %v258_v23  ;;  %1773 = vmatpush.bf16.msra.mxu2 %v3141_v38  ;;  %v959_v47 = vld [vmem:[#allocation2 + $0x4f] sm:$0xff]  ;;  %v966_v22 = vld [vmem:[#allocation2 + $0xc7] sm:$0xff] }
  0x51   : > { %292 = vst [vmem:[#allocation2 + $0x70] sm:$0xff] %v259_v24  ;;  %2007 = vmatpush.bf16.msra.mxu3 %v3149_v39  ;;  %v3597_v49 = vpack.c.bf16 %v959_v47, %v958_v44  ;;  %v726_v50 = vld [vmem:[#allocation2 + $0x49] sm:$0xff]  ;;  %v727_v51 = vld [vmem:[#allocation2 + $0x51] sm:$0xff] }
  0x52   : > { %1538 = vmatpush.bf16.msra.mxu1 %v3133_v40  ;;  %2241 = vmatpush.bf16.msra.mxu0 %v3157_v41  ;;  %v3602_v54 = vpack.c.bf16 %v727_v51, %v726_v50  ;;  %v967_v23 = vld [vmem:[#allocation2 + $0xcf] sm:$0xff]  ;;  %v968_v38 = vld [vmem:[#allocation2 + $0xe7] sm:$0xff]  ;;  %v3138_v47 = vld [vmem:[%s4244_s1 + $0x198] sm:$0xff] }
  0x53   : > { %v993_v30 = vpack.c.bf16 %v967_v23, %v966_v22  ;;  %v969_v39 = vld [vmem:[#allocation2 + $0xef] sm:$0xff]  ;;  %v3146_v50 = vld [vmem:[%s4244_s1 + $0x1d8] sm:$0xff] }
  0x54   : > { %1774 = vmatpush.bf16.msra.mxu2 %v3140_v56  ;;  %v3154_v56 = vld [vmem:[%s4244_s1 + $0x218] sm:$0xff] }
  0x55   : > { %2008 = vmatpush.bf16.msra.mxu3 %v3148_v57  ;;  %v736_v57 = vld [vmem:[#allocation2 + $0xe9] sm:$0xff] }
  0x56   : > { %1539 = vmatpush.bf16.msra.mxu1 %v3132_v58  ;;  %2242 = vmatpush.bf16.msra.mxu0 %v3156_v59  ;;  %v737_v58 = vld [vmem:[#allocation2 + $0xf1] sm:$0xff]  ;;  %v970_v59 = vld [vmem:[#allocation2 + $0x107] sm:$0xff] }
  0x57   : > { %v960_v52 = vld [vmem:[#allocation2 + $0x67] sm:$0xff]  ;;  %v3710_v63 = vpack.c.bf16 %v737_v58, %v736_v57 }
  0x58   : > { %v961_v53 = vld [vmem:[#allocation2 + $0x6f] sm:$0xff] }
  0x59   : > { %v990_v55 = vpack.c.bf16 %v961_v53, %v960_v52  ;;  %v728_v60 = vld [vmem:[#allocation2 + $0x69] sm:$0xff]  ;;  %v729_v61 = vld [vmem:[#allocation2 + $0x71] sm:$0xff]  ;;  %2009 = vmatpush.bf16.msra.mxu3 %v3147_v12 }
  0x5a   : > { %v3618_v0 = vpack.c.bf16 %v729_v61, %v728_v60  ;;  %1540 = vmatpush.bf16.msra.mxu1 %v3131_v15  ;;  %2243 = vmatpush.bf16.msra.mxu0 %v3155_v19  ;;  %v971_v60 = vld [vmem:[#allocation2 + $0x10f] sm:$0xff] }
  0x5b   : > { %539 = vmatmul.bf16.gmra.mxu1 %v3576_v25  ;;  %559 = vmatmul.bf16.gmra.mxu2 %v3578_v26  ;;  %v3714_v3 = vpack.c.bf16 %v971_v60, %v970_v59  ;;  %v738_v15 = vld [vmem:[#allocation2 + $0x109] sm:$0xff]  ;;  %v739_v19 = vld [vmem:[#allocation2 + $0x111] sm:$0xff] }
  0x5c   : > { %579 = vmatmul.bf16.gmra.mxu3 %v430_v27  ;;  %v3153_v59 = vld [vmem:[%s4244_s1 + $0x210] sm:$0xff] }
  0x5d   : > { %519 = vmatmul.bf16.gmra.mxu0 %v418_v28  ;;  %2010 = vmatpush.bf16.msra.mxu3 %v3146_v50 }
  0x5e   : > { %2244 = vmatpush.bf16.msra.mxu0 %v3154_v56 }
  0x62   : > { %2245 = vmatpush.bf16.msra.mxu0 %v3153_v59 }
  0x6b   : > { %641 = vmatmul.bf16.vlgmr.msrb.gmra.mxu1 %v351_v35  ;;  %843 = vmatmul.bf16.vlgmr.msrb.gmra.mxu2 %v754_v36  ;;  %v734_v36 = vld [vmem:[#allocation2 + $0xc9] sm:$0xff] }
  0x6c   : > { %1077 = vmatmul.bf16.vlgmr.msrb.gmra.mxu3 %v988_v37 }
  0x6d   : > { %1311 = vmatmul.bf16.vlgmr.msrb.gmra.mxu0 %v3492_v48  ;;  %v3595_v48 = vpack.c.bf16 %v725_v43, %v724_v42 }
  0x7b   : > { %646 = vmatmul.bf16.gmra.mxu1 %v988_v37  ;;  %848 = vmatmul.bf16.gmra.mxu2 %v3595_v48  ;;  %v735_v37 = vld [vmem:[#allocation2 + $0xd1] sm:$0xff] }
  0x7c   : > { %1082 = vmatmul.bf16.gmra.mxu3 %v3597_v49  ;;  %v3678_v42 = vpack.c.bf16 %v735_v37, %v734_v36 }
  0x7d   : > { %1316 = vmatmul.bf16.gmra.mxu0 %v3551_v10  ;;  %v992_v10 = vpack.c.bf16 %v965_v5, %v964_v4 }
  0x8b   : > { %651 = vmatmul.bf16.gmra.mxu1 %v3597_v49  ;;  %853 = vmatmul.bf16.gmra.mxu2 %v3602_v54 }
  0x8c   : > { %1087 = vmatmul.bf16.gmra.mxu3 %v990_v55 }
  0x8d   : > { %1321 = vmatmul.bf16.gmra.mxu0 %v418_v28  ;;  %v3658_v28 = vpack.c.bf16 %v733_v21, %v732_v20  ;;  %v972_v20 = vld [vmem:[#allocation2 + $0x127] sm:$0xff]  ;;  %v973_v21 = vld [vmem:[#allocation2 + $0x12f] sm:$0xff] }
  0x9b   : > { %656 = vmatmul.bf16.gmra.mxu1 %v990_v55  ;;  %858 = vmatmul.bf16.gmra.mxu2 %v3618_v0 }
  0x9c   : > { %1092 = vmatmul.bf16.gmra.mxu3 %v3620_v1 }
  0x9d   : > { %1326 = vmatmul.bf16.gmra.mxu0 %v3404_v17  ;;  %v3139_v17 = vld [vmem:[%s4244_s1 + $0x1a0] sm:$0xff] }
  0x9e   : > { %1775 = vmatpush.bf16.msra.mxu2 %v3139_v17 }
  0xa2   : > { %1776 = vmatpush.bf16.msra.mxu2 %v3138_v47 }
  0xa8   : > { %v3627_v9 = vpop.f32.mrf.mxu1 }
  0xaa   : > { %v3629_v11 = vpop.f32.mrf.mxu0 }
  0xab   : > { %661 = vmatmul.bf16.gmra.mxu1 %v3620_v1  ;;  %863 = vmatmul.bf16.gmra.mxu2 %v3625_v6 }
  0xac   : > { %1097 = vmatmul.bf16.gmra.mxu3 %v992_v10 }
  0xad   : > { %1331 = vmatmul.bf16.gmra.mxu0 %v3487_v45 }
  0xae   : > { %v3640_v13 = vpop.f32.mrf.mxu2 }
  0xaf   : > { %v3642_v14 = vpop.f32.mrf.mxu3 }
  0xb0   : > { %v3647_v16 = vpop.f32.mrf.mxu1 }
  0xb2   : > { %v3649_v45 = vpop.f32.mrf.mxu0 }
  0xb6   : > { %v3654_v24 = vpop.f32.mrf.mxu2 }
  0xb7   : > { %v3656_v27 = vpop.f32.mrf.mxu3 }
  0xb8   : > { %v3660_v29 = vpop.f32.mrf.mxu1 }
  0xba   : > { %v3662_v31 = vpop.f32.mrf.mxu0 }
  0xbb   : > { %666 = vmatmul.bf16.gmra.mxu1 %v992_v10  ;;  %868 = vmatmul.bf16.gmra.mxu2 %v3658_v28 }
  0xbc   : > { %1102 = vmatmul.bf16.gmra.mxu3 %v993_v30 }
  0xbd   : > { %1336 = vmatmul.bf16.gmra.mxu0 %v3547_v7  ;;  %v994_v7 = vpack.c.bf16 %v969_v39, %v968_v38  ;;  %v3137_v39 = vld [vmem:[%s4244_s1 + $0x190] sm:$0xff] }
  0xbe   : > { %v3666_v32 = vpop.f32.mrf.mxu2  ;;  %1777 = vmatpush.bf16.msra.mxu2 %v3137_v39 }
  0xbf   : > { %v3668_v33 = vpop.f32.mrf.mxu3 }
  0xc0   : > { %v3670_v34 = vpop.f32.mrf.mxu1 }
  0xc2   : > { %v3672_v35 = vpop.f32.mrf.mxu0 }
  0xc6   : > { %v3674_v40 = vpop.f32.mrf.mxu2 }
  0xc7   : > { %v3676_v41 = vpop.f32.mrf.mxu3 }
  0xc8   : > { %v3680_v43 = vpop.f32.mrf.mxu1 }
  0xca   : > { %v3682_v44 = vpop.f32.mrf.mxu0 }
  0xcb   : > { %671 = vmatmul.bf16.gmra.mxu1 %v993_v30  ;;  %873 = vmatmul.bf16.gmra.mxu2 %v3678_v42  ;;  %v3733_v30 = vpack.c.bf16 %v739_v19, %v738_v15  ;;  %v740_v15 = vld [vmem:[#allocation2 + $0x129] sm:$0xff]  ;;  %v741_v19 = vld [vmem:[#allocation2 + $0x131] sm:$0xff] }
  0xcc   : > { %1107 = vmatmul.bf16.gmra.mxu3 %v994_v7  ;;  %v3754_v39 = vpack.c.bf16 %v741_v19, %v740_v15 }
  0xcd   : > { %1341 = vmatmul.bf16.gmra.mxu0 %v3576_v25  ;;  %v3130_v25 = vld [vmem:[%s4244_s1 + $0x158] sm:$0xff] }
  0xce   : > { %v3692_v51 = vpop.f32.mrf.mxu2  ;;  %1541 = vmatpush.bf16.msra.mxu1 %v3130_v25 }
  0xcf   : > { %v3694_v52 = vpop.f32.mrf.mxu3 }
  0xd0   : > { %v3696_v53 = vpop.f32.mrf.mxu1 }
  0xd2   : > { %v3698_v55 = vpop.f32.mrf.mxu0 }
  0xd6   : > { %v3706_v61 = vpop.f32.mrf.mxu2 }
  0xd7   : > { %v3708_v62 = vpop.f32.mrf.mxu3 }
  0xd8   : > { %v3712_v2 = vpop.f32.mrf.mxu1 }
  0xda   : > { %v3716_v4 = vpop.f32.mrf.mxu0 }
  0xdb   : > { %676 = vmatmul.bf16.gmra.mxu1 %v994_v7  ;;  %878 = vmatmul.bf16.gmra.mxu2 %v3710_v63  ;;  %v3145_v7 = vld [vmem:[%s4244_s1 + $0x1d0] sm:$0xff] }
  0xdc   : > { %1112 = vmatmul.bf16.gmra.mxu3 %v3714_v3 }
  0xdd   : > { %1346 = vmatmul.bf16.gmra.mxu0 %v3409_v18  ;;  %v996_v18 = vpack.c.bf16 %v973_v21, %v972_v20  ;;  %2011 = vmatpush.bf16.msra.mxu3 %v3145_v7  ;;  %v974_v20 = vld [vmem:[#allocation2 + $0x147] sm:$0xff]  ;;  %v975_v21 = vld [vmem:[#allocation2 + $0x14f] sm:$0xff] }
  0xde   : > { %v3721_v5 = vpop.f32.mrf.mxu2 }
  0xdf   : > { %v3723_v10 = vpop.f32.mrf.mxu3 }
  0xe0   : > { %v3725_v17 = vpop.f32.mrf.mxu1 }
  0xe2   : > { %v3727_v12 = vpop.f32.mrf.mxu0 }
  0xe6   : > { %v3729_v22 = vpop.f32.mrf.mxu2 }
  0xe7   : > { %v3731_v23 = vpop.f32.mrf.mxu3 }
  0xe8   : > { %v642_v36 = vpop.f32.mrf.mxu1 }
  0xe9   : > { %v643_v37 = vadd.f32 %v642_v36, %v3629_v11 }
  0xea   : > { %v1312_v38 = vpop.f32.mrf.mxu0 }
  0xeb   : > { %681 = vmatmul.bf16.gmra.mxu1 %v3714_v3  ;;  %883 = vmatmul.bf16.gmra.mxu2 %v3733_v30 }
  0xec   : > { %1117 = vmatmul.bf16.gmra.mxu3 %v996_v18 }
  0xed   : > { %1351 = vmatmul.bf16.gmra.mxu0 %v3489_v46  ;;  %v3129_v46 = vld [vmem:[%s4244_s1 + $0x150] sm:$0xff] }
  0xee   : > { %v844_v47 = vpop.f32.mrf.mxu2  ;;  %1542 = vmatpush.bf16.msra.mxu1 %v3129_v46 }
  0xef   : > { %v924_v11 = vadd.f32 %v844_v47, %v643_v37  ;;  %v1078_v50 = vpop.f32.mrf.mxu3  ;;  %v3756_v47 = vpack.c.bf16 %v975_v21, %v974_v20 }
  0xf0   : > { %v644_v25 = vpop.f32.mrf.mxu1 }
  0xf1   : > { %v1158_v56 = vadd.f32 %v1078_v50, %v924_v11  ;;  %v645_v57 = vadd.f32 %v644_v25, %v3649_v45 }
  0xf2   : > { %v1314_v58 = vpop.f32.mrf.mxu0 }
  0xf3   : > { %v3752_v60 = vadd.f32 %v1312_v38, %v1158_v56 }
  0xf6   : > { %v846_v36 = vpop.f32.mrf.mxu2 }
  0xf7   : > { %v925_v37 = vadd.f32 %v846_v36, %v645_v57  ;;  %v1080_v45 = vpop.f32.mrf.mxu3  ;;  %v976_v36 = vld [vmem:[#allocation2 + $0x167] sm:$0xff] }
  0xf8   : > { %v647_v7 = vpop.f32.mrf.mxu1 }
  0xf9   : > { %v1159_v11 = vadd.f32 %v1080_v45, %v925_v37  ;;  %v648_v50 = vadd.f32 %v647_v7, %v3662_v31  ;;  %v742_v31 = vld [vmem:[#allocation2 + $0x149] sm:$0xff] }
  0xfa   : > { %v1317_v25 = vpop.f32.mrf.mxu0  ;;  %v977_v37 = vld [vmem:[#allocation2 + $0x16f] sm:$0xff] }
  0xfb   : > { %686 = vmatmul.bf16.gmra.mxu1 %v996_v18  ;;  %888 = vmatmul.bf16.gmra.mxu2 %v3754_v39  ;;  %v3760_v38 = vadd.f32 %v1314_v58, %v1159_v11  ;;  %v743_v18 = vld [vmem:[#allocation2 + $0x151] sm:$0xff] }
  0xfc   : > { %1122 = vmatmul.bf16.gmra.mxu3 %v3756_v47  ;;  %v3767_v11 = vpack.c.bf16 %v743_v18, %v742_v31 }
  0xfd   : > { %4255 = vst [vmem:[#allocation3_spill] sm:$0xff] %v3760_v38  ;;  %1356 = vmatmul.bf16.gmra.mxu0 %v3549_v8  ;;  %v3769_v38 = vpack.c.bf16 %v977_v37, %v976_v36  ;;  %v3152_v36 = vld [vmem:[%s4244_s1 + $0x208] sm:$0xff] }
  0xfe   : > { %v849_v56 = vpop.f32.mrf.mxu2  ;;  %2246 = vmatpush.bf16.msra.mxu0 %v3152_v36 }
  0xff   : > { %v926_v57 = vadd.f32 %v849_v56, %v648_v50  ;;  %v1083_v46 = vpop.f32.mrf.mxu3 }
 0x100   : > { %v649_v59 = vpop.f32.mrf.mxu1 }
 0x101   : > { %v1160_v15 = vadd.f32 %v1083_v46, %v926_v57  ;;  %v650_v19 = vadd.f32 %v649_v59, %v3672_v35  ;;  %v3144_v46 = vld [vmem:[%s4244_s1 + $0x1c8] sm:$0xff] }
 0x102   : > { %v1319_v20 = vpop.f32.mrf.mxu0  ;;  %2012 = vmatpush.bf16.msra.mxu3 %v3144_v46 }
 0x103   : > { %v3765_v21 = vadd.f32 %v1317_v25, %v1160_v15  ;;  %v3136_v25 = vld [vmem:[%s4244_s1 + $0x188] sm:$0xff] }
 0x104   : > { %1778 = vmatpush.bf16.msra.mxu2 %v3136_v25 }
 0x106   : > { %v851_v58 = vpop.f32.mrf.mxu2 }
 0x107   : > { %v927_v45 = vadd.f32 %v851_v58, %v650_v19  ;;  %v1085_v7 = vpop.f32.mrf.mxu3  ;;  %v744_v58 = vld [vmem:[#allocation2 + $0x169] sm:$0xff] }
 0x108   : > { %v652_v8 = vpop.f32.mrf.mxu1 }
 0x109   : > { %v1161_v50 = vadd.f32 %v1085_v7, %v927_v45  ;;  %v653_v56 = vadd.f32 %v652_v8, %v3682_v44  ;;  %v745_v45 = vld [vmem:[#allocation2 + $0x171] sm:$0xff]  ;;  %v978_v7 = vld [vmem:[#allocation2 + $0x187] sm:$0xff] }
 0x10a   : > { %v1322_v57 = vpop.f32.mrf.mxu0  ;;  %v979_v8 = vld [vmem:[#allocation2 + $0x18f] sm:$0xff] }
 0x10b   : > { %691 = vmatmul.bf16.gmra.mxu1 %v3756_v47  ;;  %893 = vmatmul.bf16.gmra.mxu2 %v3767_v11  ;;  %v3774_v35 = vadd.f32 %v1319_v20, %v1161_v50  ;;  %v1212_v50 = vld [vmem:[#allocation2 + $0x188] sm:$0xff] }
 0x10c   : > { %1127 = vmatmul.bf16.gmra.mxu3 %v3769_v38 }
 0x10d   : > { %4256 = vst [vmem:[#allocation4_spill] sm:$0xff] %v3774_v35  ;;  %1361 = vmatmul.bf16.gmra.mxu0 %v3578_v26  ;;  %v3128_v26 = vld [vmem:[%s4244_s1 + $0x148] sm:$0xff] }
 0x10e   : > { %v854_v44 = vpop.f32.mrf.mxu2  ;;  %1543 = vmatpush.bf16.msra.mxu1 %v3128_v26 }
 0x10f   : > { %v928_v59 = vadd.f32 %v854_v44, %v653_v56  ;;  %v1088_v15 = vpop.f32.mrf.mxu3  ;;  %v1213_v56 = vld [vmem:[#allocation2 + $0x190] sm:$0xff]  ;;  %v3793_v44 = vpack.c.bf16 %v745_v45, %v744_v58 }
 0x110   : > { %v654_v19 = vpop.f32.mrf.mxu1 }
 0x111   : > { %v1162_v20 = vadd.f32 %v1088_v15, %v928_v59  ;;  %v655_v31 = vadd.f32 %v654_v19, %v3698_v55  ;;  %v3795_v15 = vpack.c.bf16 %v979_v8, %v978_v7  ;;  %v3797_v19 = vpack.c.bf16 %v1213_v56, %v1212_v50 }
 0x112   : > { %v1324_v18 = vpop.f32.mrf.mxu0 }
 0x113   : > { %v3791_v37 = vadd.f32 %v1322_v57, %v1162_v20  ;;  %4258 = vst [vmem:[#allocation6_spill] sm:$0xff] %v3797_v19 }
 0x115   : > { %4257 = vst [vmem:[#allocation5_spill] sm:$0xff] %v3791_v37 }
 0x116   : > { %v856_v55 = vpop.f32.mrf.mxu2 }
 0x117   : > { %v929_v25 = vadd.f32 %v856_v55, %v655_v31  ;;  %v1090_v46 = vpop.f32.mrf.mxu3  ;;  %v746_v55 = vld [vmem:[#allocation2 + $0x189] sm:$0xff] }
 0x118   : > { %v657_v59 = vpop.f32.mrf.mxu1 }
 0x119   : > { %v1163_v26 = vadd.f32 %v1090_v46, %v929_v25  ;;  %v658_v57 = vadd.f32 %v657_v59, %v3716_v4  ;;  %v747_v25 = vld [vmem:[#allocation2 + $0x191] sm:$0xff]  ;;  %v980_v46 = vld [vmem:[#allocation2 + $0x1a7] sm:$0xff] }
 0x11a   : > { %v1327_v20 = vpop.f32.mrf.mxu0  ;;  %v981_v59 = vld [vmem:[#allocation2 + $0x1af] sm:$0xff] }
 0x11b   : > { %696 = vmatmul.bf16.gmra.mxu1 %v3769_v38  ;;  %898 = vmatmul.bf16.gmra.mxu2 %v3793_v44  ;;  %v3802_v36 = vadd.f32 %v1324_v18, %v1163_v26  ;;  %v1214_v18 = vld [vmem:[#allocation2 + $0x1a8] sm:$0xff]  ;;  %v1215_v26 = vld [vmem:[#allocation2 + $0x1b0] sm:$0xff] }
 0x11c   : > { %1132 = vmatmul.bf16.gmra.mxu3 %v3795_v15 }
 0x11d   : > { %4259 = vst [vmem:[#allocation7_spill] sm:$0xff] %v3802_v36  ;;  %1366 = vmatmul.bf16.gmra.mxu0 %v3797_v19  ;;  %v3809_v19 = vpack.c.bf16 %v747_v25, %v746_v55 }
 0x11e   : > { %v859_v31 = vpop.f32.mrf.mxu2 }
 0x11f   : > { %v930_v58 = vadd.f32 %v859_v31, %v658_v57  ;;  %v1093_v45 = vpop.f32.mrf.mxu3  ;;  %4261 = vst [vmem:[#allocation9_spill] sm:$0xff] %v3809_v19  ;;  %v3811_v31 = vpack.c.bf16 %v981_v59, %v980_v46  ;;  %v3127_v46 = vld [vmem:[%s4244_s1 + $0x140] sm:$0xff] }
 0x120   : > { %v659_v7 = vpop.f32.mrf.mxu1  ;;  %v3151_v59 = vld [vmem:[%s4244_s1 + $0x200] sm:$0xff]  ;;  %1544 = vmatpush.bf16.msra.mxu1 %v3127_v46 }
 0x121   : > { %v1164_v8 = vadd.f32 %v1093_v45, %v930_v58  ;;  %v660_v50 = vadd.f32 %v659_v7, %v3727_v12  ;;  %4262 = vst [vmem:[#allocation10_spill] sm:$0xff] %v3811_v31  ;;  %v3813_v58 = vpack.c.bf16 %v1215_v26, %v1214_v18  ;;  %v3835_v18 = vld [vmem:[%s3342_s21 + $0xf0] sm:$0xff]  ;;  %v3838_v26 = vld [vmem:[%s3342_s21 + $0xf8] sm:$0xff]  ;;  %2247 = vmatpush.bf16.msra.mxu0 %v3151_v59  ;;  %s3086_s21 = sshll.u32 %s4292_s13, 7 }
 0x122   : > { %v1329_v56 = vpop.f32.mrf.mxu0  ;;  %317 = vst [vmem:[#allocation2 + $0x208] sm:$0xff] %v3835_v18  ;;  %s3974_s19 = scalar_lea.vmem %s4245_s2, %s3086_s21 }
 0x123   : > { %v3807_v4 = vadd.f32 %v1327_v20, %v1164_v8  ;;  %4263 = vst [vmem:[#allocation11_spill] sm:$0xff] %v3813_v58 }
 0x124   : > { %318 = vst [vmem:[#allocation2 + $0x210] sm:$0xff] %v3838_v26 }
 0x125   : > { %4260 = vst [vmem:[#allocation8_spill] sm:$0xff] %v3807_v4 }
 0x126   : > { %v861_v36 = vpop.f32.mrf.mxu2 }
 0x127   : > { %v931_v37 = vadd.f32 %v861_v36, %v660_v50  ;;  %v1095_v35 = vpop.f32.mrf.mxu3  ;;  %v3135_v36 = vld [vmem:[%s4244_s1 + $0x180] sm:$0xff] }
 0x128   : > { %v662_v57 = vpop.f32.mrf.mxu1  ;;  %1779 = vmatpush.bf16.msra.mxu2 %v3135_v36  ;;  %v982_v36 = vld [vmem:[#allocation2 + $0x1c7] sm:$0xff] }
 0x129   : > { %v1165_v12 = vadd.f32 %v1095_v35, %v931_v37  ;;  %v3143_v35 = vld [vmem:[%s4244_s1 + $0x1c0] sm:$0xff]  ;;  %v663_v37 = vadd.f32 %v662_v57, %v3627_v9  ;;  %v748_v57 = vld [vmem:[#allocation2 + $0x1a9] sm:$0xff] }
 0x12a   : > { %v1332_v45 = vpop.f32.mrf.mxu0  ;;  %2013 = vmatpush.bf16.msra.mxu3 %v3143_v35 }
 0x12b   : > { %701 = vmatmul.bf16.gmra.mxu1 %v3795_v15  ;;  %903 = vmatmul.bf16.gmra.mxu2 %v3809_v19  ;;  %v3817_v20 = vadd.f32 %v1329_v56, %v1165_v12  ;;  %v749_v12 = vld [vmem:[#allocation2 + $0x1b1] sm:$0xff] }
 0x12c   : > { %1137 = vmatmul.bf16.gmra.mxu3 %v3811_v31 }
 0x12d   : > { %4264 = vst [vmem:[#allocation12_spill] sm:$0xff] %v3817_v20  ;;  %1371 = vmatmul.bf16.gmra.mxu0 %v3813_v58  ;;  %v3845_v58 = vpack.c.bf16 %v749_v12, %v748_v57 }
 0x12e   : > { %v864_v7 = vpop.f32.mrf.mxu2 }
 0x12f   : > { %v932_v8 = vadd.f32 %v864_v7, %v663_v37  ;;  %v1098_v50 = vpop.f32.mrf.mxu3  ;;  %v983_v37 = vld [vmem:[#allocation2 + $0x1cf] sm:$0xff]  ;;  %4266 = vst [vmem:[#allocation14_spill] sm:$0xff] %v3845_v58 }
 0x130   : > { %v664_v56 = vpop.f32.mrf.mxu1  ;;  %v1216_v7 = vld [vmem:[#allocation2 + $0x1c8] sm:$0xff]  ;;  %v3847_v46 = vpack.c.bf16 %v983_v37, %v982_v36 }
 0x131   : > { %v1166_v55 = vadd.f32 %v1098_v50, %v932_v8  ;;  %v665_v35 = vadd.f32 %v664_v56, %v3647_v16  ;;  %v1217_v8 = vld [vmem:[#allocation2 + $0x1d0] sm:$0xff] }
 0x132   : > { %v1334_v25 = vpop.f32.mrf.mxu0  ;;  %v3849_v59 = vpack.c.bf16 %v1217_v8, %v1216_v7  ;;  %v751_v8 = vld [vmem:[#allocation2 + $0x1d1] sm:$0xff] }
 0x133   : > { %v3842_v9 = vadd.f32 %v1332_v45, %v1166_v55 }
 0x134   : > { %4267 = vst [vmem:[#allocation15_spill] sm:$0xff] %v3849_v59 }
 0x135   : > { %4265 = vst [vmem:[#allocation13_spill] sm:$0xff] %v3842_v9  ;;  %v1219_v9 = vld [vmem:[#allocation2 + $0x1f0] sm:$0xff] }
 0x136   : > { %v866_v50 = vpop.f32.mrf.mxu2 }
 0x137   : > { %v933_v20 = vadd.f32 %v866_v50, %v665_v35  ;;  %v1100_v4 = vpop.f32.mrf.mxu3  ;;  %v984_v50 = vld [vmem:[#allocation2 + $0x1e7] sm:$0xff] }
 0x138   : > { %v667_v19 = vpop.f32.mrf.mxu1 }
 0x139   : > { %v1167_v45 = vadd.f32 %v1100_v4, %v933_v20  ;;  %v668_v56 = vadd.f32 %v667_v19, %v3660_v29  ;;  %v750_v20 = vld [vmem:[#allocation2 + $0x1c9] sm:$0xff] }
 0x13a   : > { %v1337_v55 = vpop.f32.mrf.mxu0  ;;  %v3861_v29 = vpack.c.bf16 %v751_v8, %v750_v20  ;;  %v753_v8 = vld [vmem:[#allocation2 + $0x1f1] sm:$0xff] }
 0x13b   : > { %706 = vmatmul.bf16.gmra.mxu1 %v3811_v31  ;;  %908 = vmatmul.bf16.gmra.mxu2 %v3845_v58  ;;  %v3853_v16 = vadd.f32 %v1334_v25, %v1167_v45  ;;  %v985_v45 = vld [vmem:[#allocation2 + $0x1ef] sm:$0xff] }
 0x13c   : > { %1142 = vmatmul.bf16.gmra.mxu3 %v3847_v46 }
 0x13d   : > { %4268 = vst [vmem:[#allocation16_spill] sm:$0xff] %v3853_v16  ;;  %1376 = vmatmul.bf16.gmra.mxu0 %v3849_v59  ;;  %v1218_v16 = vld [vmem:[#allocation2 + $0x1e8] sm:$0xff] }
 0x13e   : > { %v869_v57 = vpop.f32.mrf.mxu2 }
 0x13f   : > { %v934_v12 = vadd.f32 %v869_v57, %v668_v56  ;;  %v1103_v36 = vpop.f32.mrf.mxu3  ;;  %v3863_v56 = vpack.c.bf16 %v985_v45, %v984_v50  ;;  %v3865_v57 = vpack.c.bf16 %v1219_v9, %v1218_v16 }
 0x140   : > { %v669_v35 = vpop.f32.mrf.mxu1 }
 0x141   : > { %v1168_v37 = vadd.f32 %v1103_v36, %v934_v12  ;;  %v670_v25 = vadd.f32 %v669_v35, %v3670_v34 }
 0x142   : > { %v1339_v7 = vpop.f32.mrf.mxu0 }
 0x143   : > { %v3858_v4 = vadd.f32 %v1337_v55, %v1168_v37 }
 0x145   : > { %4269 = vst [vmem:[#allocation17_spill] sm:$0xff] %v3858_v4 }
 0x146   : > { %v871_v58 = vpop.f32.mrf.mxu2 }
 0x147   : > { %v935_v59 = vadd.f32 %v871_v58, %v670_v25  ;;  %v1105_v31 = vpop.f32.mrf.mxu3  ;;  %v987_v25 = vld [vmem:[#allocation2 + $0x20f] sm:$0xff] }
 0x148   : > { %v672_v19 = vpop.f32.mrf.mxu1 }
 0x149   : > { %v1169_v55 = vadd.f32 %v1105_v31, %v935_v59  ;;  %v673_v58 = vadd.f32 %v672_v19, %v3680_v43  ;;  %v752_v59 = vld [vmem:[#allocation2 + $0x1e9] sm:$0xff] }
 0x14a   : > { %v1342_v12 = vpop.f32.mrf.mxu0  ;;  %v3877_v4 = vpack.c.bf16 %v753_v8, %v752_v59 }
 0x14b   : > { %711 = vmatmul.bf16.gmra.mxu1 %v3847_v46  ;;  %913 = vmatmul.bf16.gmra.mxu2 %v3861_v29  ;;  %v3869_v34 = vadd.f32 %v1339_v7, %v1169_v55  ;;  %v986_v7 = vld [vmem:[#allocation2 + $0x207] sm:$0xff] }
 0x14c   : > { %1147 = vmatmul.bf16.gmra.mxu3 %v3863_v56  ;;  %v3879_v19 = vpack.c.bf16 %v987_v25, %v986_v7  ;;  %v1894_v7 = vld [vmem:[#allocation2 + $0x50] sm:$0xff] }
 0x14d   : > { %4270 = vst [vmem:[#allocation18_spill] sm:$0xff] %v3869_v34  ;;  %1381 = vmatmul.bf16.gmra.mxu0 %v3865_v57 }
 0x14e   : > { %v874_v36 = vpop.f32.mrf.mxu2 }
 0x14f   : > { %v936_v35 = vadd.f32 %v874_v36, %v673_v58  ;;  %v1108_v37 = vpop.f32.mrf.mxu3  ;;  %v3883_v58 = vpack.c.bf16 %v3838_v26, %v3835_v18 }
 0x150   : > { %v674_v20 = vpop.f32.mrf.mxu1 }
 0x151   : > { %v1170_v9 = vadd.f32 %v1108_v37, %v936_v35  ;;  %v675_v50 = vadd.f32 %v674_v20, %v3696_v53 }
 0x152   : > { %v1344_v16 = vpop.f32.mrf.mxu0 }
 0x153   : > { %v3874_v31 = vadd.f32 %v1342_v12, %v1170_v9 }
 0x155   : > { %4271 = vst [vmem:[#allocation19_spill] sm:$0xff] %v3874_v31 }
 0x156   : > { %v876_v45 = vpop.f32.mrf.mxu2 }
 0x157   : > { %v937_v55 = vadd.f32 %v876_v45, %v675_v50  ;;  %v1110_v34 = vpop.f32.mrf.mxu3  ;;  %v1893_v50 = vld [vmem:[#allocation2 + $0x48] sm:$0xff] }
 0x158   : > { %v677_v43 = vpop.f32.mrf.mxu1 }
 0x159   : > { %v1171_v12 = vadd.f32 %v1110_v34, %v937_v55  ;;  %v678_v35 = vadd.f32 %v677_v43, %v3712_v2 }
 0x15a   : > { %v1347_v36 = vpop.f32.mrf.mxu0 }
 0x15b   : > { %716 = vmatmul.bf16.gmra.mxu1 %v3863_v56  ;;  %918 = vmatmul.bf16.gmra.mxu2 %v3877_v4  ;;  %v3887_v53 = vadd.f32 %v1344_v16, %v1171_v12  ;;  %v1925_v12 = vpack.c.bf16 %v1894_v7, %v1893_v50  ;;  %v1662_v50 = vld [vmem:[#allocation2 + $0x6f] sm:$0xff] }
 0x15c   : > { %1152 = vmatmul.bf16.gmra.mxu3 %v3879_v19 }
 0x15d   : > { %4272 = vst [vmem:[#allocation20_spill] sm:$0xff] %v3887_v53  ;;  %1386 = vmatmul.bf16.gmra.mxu0 %v3883_v58 }
 0x15e   : > { %v879_v37 = vpop.f32.mrf.mxu2 }
 0x15f   : > { %v938_v20 = vadd.f32 %v879_v37, %v678_v35  ;;  %v1113_v9 = vpop.f32.mrf.mxu3 }
 0x160   : > { %v679_v59 = vpop.f32.mrf.mxu1 }
 0x161   : > { %v1172_v18 = vadd.f32 %v1113_v9, %v938_v20  ;;  %v680_v8 = vadd.f32 %v679_v59, %v3725_v17  ;;  %v1426_v59 = vld [vmem:[#allocation2 + $0x49] sm:$0xff] }
 0x162   : > { %v1349_v26 = vpop.f32.mrf.mxu0 }
 0x163   : > { %v3892_v34 = vadd.f32 %v1347_v36, %v1172_v18 }
 0x166   : > { %v881_v16 = vpop.f32.mrf.mxu2 }
 0x167   : > { %v939_v25 = vadd.f32 %v881_v16, %v680_v8  ;;  %v1115_v45 = vpop.f32.mrf.mxu3  ;;  %v1427_v8 = vld [vmem:[#allocation2 + $0x51] sm:$0xff] }
 0x168   : > { %v682_v55 = vpop.f32.mrf.mxu1 }
 0x169   : > { %v1173_v53 = vadd.f32 %v1115_v45, %v939_v25  ;;  %v683_v17 = vadd.f32 %v682_v55, %v3640_v13  ;;  %v1457_v13 = vpack.c.bf16 %v1427_v8, %v1426_v59 }
 0x16a   : > { %v1352_v31 = vpop.f32.mrf.mxu0 }
 0x16b   : > { %1545 = vmatmul.bf16.vlgmr.msra.gmra.mxu1 %v3595_v48  ;;  %1780 = vmatmul.bf16.vlgmr.msra.gmra.mxu2 %v3597_v49  ;;  %v3897_v2 = vadd.f32 %v1349_v26, %v1173_v53  ;;  %v1661_v48 = vld [vmem:[#allocation2 + $0x67] sm:$0xff]  ;;  %v1896_v26 = vld [vmem:[#allocation2 + $0x70] sm:$0xff] }
 0x16c   : > { %2014 = vmatmul.bf16.vlgmr.msra.gmra.mxu3 %v1925_v12  ;;  %v1895_v53 = vld [vmem:[#allocation2 + $0x68] sm:$0xff]  ;;  %v1692_v25 = vpack.c.bf16 %v1662_v50, %v1661_v48 }
 0x16d   : > { %2248 = vmatmul.bf16.vlgmr.msra.gmra.mxu0 %v3602_v54  ;;  %v1926_v55 = vpack.c.bf16 %v1896_v26, %v1895_v53  ;;  %v1897_v50 = vld [vmem:[#allocation2 + $0x88] sm:$0xff] }
 0x16e   : > { %v884_v43 = vpop.f32.mrf.mxu2 }
 0x16f   : > { %v940_v36 = vadd.f32 %v884_v43, %v683_v17  ;;  %v1118_v35 = vpop.f32.mrf.mxu3 }
 0x170   : > { %v684_v37 = vpop.f32.mrf.mxu1 }
 0x171   : > { %v1174_v20 = vadd.f32 %v1118_v35, %v940_v36  ;;  %v685_v49 = vadd.f32 %v684_v37, %v3654_v24 }
 0x172   : > { %v1354_v9 = vpop.f32.mrf.mxu0 }
 0x173   : > { %v3901_v18 = vadd.f32 %v1352_v31, %v1174_v20 }
 0x176   : > { %v886_v7 = vpop.f32.mrf.mxu2 }
 0x177   : > { %v941_v54 = vadd.f32 %v886_v7, %v685_v49  ;;  %v1120_v16 = vpop.f32.mrf.mxu3  ;;  %v1898_v49 = vld [vmem:[#allocation2 + $0x90] sm:$0xff] }
 0x178   : > { %v687_v45 = vpop.f32.mrf.mxu1 }
 0x179   : > { %v1175_v12 = vadd.f32 %v1120_v16, %v941_v54  ;;  %v688_v24 = vadd.f32 %v687_v45, %v3666_v32  ;;  %v1927_v54 = vpack.c.bf16 %v1898_v49, %v1897_v50 }
 0x17a   : > { %v1357_v17 = vpop.f32.mrf.mxu0 }
 0x17b   : > { %1550 = vmatmul.bf16.gmra.mxu1 %v1457_v13  ;;  %1785 = vmatmul.bf16.gmra.mxu2 %v1692_v25  ;;  %v3904_v31 = vadd.f32 %v1354_v9, %v1175_v12 }
 0x17c   : > { %2019 = vmatmul.bf16.gmra.mxu3 %v1926_v55 }
 0x17d   : > { %2253 = vmatmul.bf16.gmra.mxu0 %v3618_v0 }
 0x17e   : > { %v889_v43 = vpop.f32.mrf.mxu2 }
 0x17f   : > { %v942_v36 = vadd.f32 %v889_v43, %v688_v24  ;;  %v1123_v35 = vpop.f32.mrf.mxu3  ;;  %v1430_v43 = vld [vmem:[#allocation2 + $0x89] sm:$0xff] }
 0x180   : > { %v689_v37 = vpop.f32.mrf.mxu1 }
 0x181   : > { %v1176_v20 = vadd.f32 %v1123_v35, %v942_v36  ;;  %v690_v48 = vadd.f32 %v689_v37, %v3674_v40  ;;  %v1431_v35 = vld [vmem:[#allocation2 + $0x91] sm:$0xff] }
 0x182   : > { %v1359_v59 = vpop.f32.mrf.mxu0  ;;  %v1666_v37 = vld [vmem:[#allocation2 + $0xaf] sm:$0xff] }
 0x183   : > { %v3908_v8 = vadd.f32 %v1357_v17, %v1176_v20  ;;  %v1899_v20 = vld [vmem:[#allocation2 + $0xa8] sm:$0xff] }
 0x186   : > { %v891_v53 = vpop.f32.mrf.mxu2 }
 0x187   : > { %v943_v9 = vadd.f32 %v891_v53, %v690_v48  ;;  %v1125_v26 = vpop.f32.mrf.mxu3 }
 0x188   : > { %v692_v7 = vpop.f32.mrf.mxu1 }
 0x189   : > { %v1177_v16 = vadd.f32 %v1125_v26, %v943_v9  ;;  %v693_v40 = vadd.f32 %v692_v7, %v3692_v51  ;;  %v1459_v51 = vpack.c.bf16 %v1431_v35, %v1430_v43  ;;  %v1433_v43 = vld [vmem:[#allocation2 + $0xb1] sm:$0xff]  ;;  %v1667_v35 = vld [vmem:[#allocation2 + $0xc7] sm:$0xff] }
 0x18a   : > { %v1362_v13 = vpop.f32.mrf.mxu0 }
 0x18b   : > { %1555 = vmatmul.bf16.gmra.mxu1 %v3618_v0  ;;  %1790 = vmatmul.bf16.gmra.mxu2 %v3620_v1  ;;  %v3913_v32 = vadd.f32 %v1359_v59, %v1177_v16  ;;  %v1665_v0 = vld [vmem:[#allocation2 + $0xa7] sm:$0xff]  ;;  %v1900_v59 = vld [vmem:[#allocation2 + $0xb0] sm:$0xff] }
 0x18c   : > { %2024 = vmatmul.bf16.gmra.mxu3 %v1927_v54  ;;  %v1694_v49 = vpack.c.bf16 %v1666_v37, %v1665_v0  ;;  %v1928_v9 = vpack.c.bf16 %v1900_v59, %v1899_v20  ;;  %v1668_v0 = vld [vmem:[#allocation2 + $0xcf] sm:$0xff] }
 0x18d   : > { %2258 = vmatmul.bf16.gmra.mxu0 %v3625_v6  ;;  %v1901_v37 = vld [vmem:[#allocation2 + $0xc8] sm:$0xff] }
 0x18e   : > { %v894_v25 = vpop.f32.mrf.mxu2 }
 0x18f   : > { %v944_v45 = vadd.f32 %v894_v25, %v693_v40  ;;  %v1128_v55 = vpop.f32.mrf.mxu3 }
 0x190   : > { %v694_v12 = vpop.f32.mrf.mxu1 }
 0x191   : > { %v1178_v17 = vadd.f32 %v1128_v55, %v944_v45  ;;  %v695_v1 = vadd.f32 %v694_v12, %v3706_v61  ;;  %v1432_v12 = vld [vmem:[#allocation2 + $0xa9] sm:$0xff] }
 0x192   : > { %v1364_v24 = vpop.f32.mrf.mxu0 }
 0x193   : > { %v3917_v36 = vadd.f32 %v1362_v13, %v1178_v17 }
 0x196   : > { %v896_v48 = vpop.f32.mrf.mxu2 }
 0x197   : > { %v945_v6 = vadd.f32 %v896_v48, %v695_v1  ;;  %v1130_v50 = vpop.f32.mrf.mxu3  ;;  %v1902_v1 = vld [vmem:[#allocation2 + $0xd0] sm:$0xff]  ;;  %v1695_v48 = vpack.c.bf16 %v1668_v0, %v1667_v35  ;;  %v1903_v35 = vld [vmem:[#allocation2 + $0xe8] sm:$0xff] }
 0x198   : > { %v697_v53 = vpop.f32.mrf.mxu1  ;;  %v1904_v0 = vld [vmem:[#allocation2 + $0xf0] sm:$0xff] }
 0x199   : > { %v1179_v26 = vadd.f32 %v1130_v50, %v945_v6  ;;  %v698_v61 = vadd.f32 %v697_v53, %v3721_v5  ;;  %v1460_v5 = vpack.c.bf16 %v1433_v43, %v1432_v12  ;;  %v1929_v50 = vpack.c.bf16 %v1902_v1, %v1901_v37  ;;  %v1669_v12 = vld [vmem:[#allocation2 + $0xe7] sm:$0xff]  ;;  %v1670_v43 = vld [vmem:[#allocation2 + $0xef] sm:$0xff] }
 0x19a   : > { %v1367_v7 = vpop.f32.mrf.mxu0  ;;  %v1696_v1 = vpack.c.bf16 %v1670_v43, %v1669_v12 }
 0x19b   : > { %1560 = vmatmul.bf16.gmra.mxu1 %v1459_v51  ;;  %1795 = vmatmul.bf16.gmra.mxu2 %v1694_v49  ;;  %v3920_v54 = vadd.f32 %v1364_v24, %v1179_v26 }
 0x19c   : > { %2029 = vmatmul.bf16.gmra.mxu3 %v1928_v9 }
 0x19d   : > { %2263 = vmatmul.bf16.gmra.mxu0 %v3658_v28 }
 0x19e   : > { %v899_v16 = vpop.f32.mrf.mxu2 }
 0x19f   : > { %v946_v13 = vadd.f32 %v899_v16, %v698_v61  ;;  %v1133_v40 = vpop.f32.mrf.mxu3 }
 0x1a0   : > { %v699_v25 = vpop.f32.mrf.mxu1 }
 0x1a1   : > { %v1180_v45 = vadd.f32 %v1133_v40, %v946_v13  ;;  %v700_v24 = vadd.f32 %v699_v25, %v3729_v22  ;;  %v1434_v40 = vld [vmem:[#allocation2 + $0xc9] sm:$0xff] }
 0x1a2   : > { %v1369_v55 = vpop.f32.mrf.mxu0 }
 0x1a3   : > { %v3924_v17 = vadd.f32 %v1367_v7, %v1180_v45  ;;  %v1435_v45 = vld [vmem:[#allocation2 + $0xd1] sm:$0xff] }
 0x1a6   : > { %v901_v20 = vpop.f32.mrf.mxu2 }
 0x1a7   : > { %v947_v28 = vadd.f32 %v901_v20, %v700_v24  ;;  %v1135_v59 = vpop.f32.mrf.mxu3 }
 0x1a8   : > { %v702_v6 = vpop.f32.mrf.mxu1 }
 0x1a9   : > { %v1181_v51 = vadd.f32 %v1135_v59, %v947_v28  ;;  %v703_v22 = vadd.f32 %v702_v6, %v3642_v14  ;;  %v1461_v14 = vpack.c.bf16 %v1435_v45, %v1434_v40  ;;  %v1930_v28 = vpack.c.bf16 %v1904_v0, %v1903_v35 }
 0x1aa   : > { %v1372_v49 = vpop.f32.mrf.mxu0 }
 0x1ab   : > { %1565 = vmatmul.bf16.gmra.mxu1 %v1460_v5  ;;  %1800 = vmatmul.bf16.gmra.mxu2 %v1695_v48  ;;  %v3927_v53 = vadd.f32 %v1369_v55, %v1181_v51 }
 0x1ac   : > { %2034 = vmatmul.bf16.gmra.mxu3 %v1929_v50 }
 0x1ad   : > { %2268 = vmatmul.bf16.gmra.mxu0 %v3678_v42 }
 0x1ae   : > { %v904_v9 = vpop.f32.mrf.mxu2 }
 0x1af   : > { %v948_v26 = vadd.f32 %v904_v9, %v703_v22  ;;  %v1138_v7 = vpop.f32.mrf.mxu3 }
 0x1b0   : > { %v704_v61 = vpop.f32.mrf.mxu1 }
 0x1b1   : > { %v1182_v16 = vadd.f32 %v1138_v7, %v948_v26  ;;  %v705_v55 = vadd.f32 %v704_v61, %v3656_v27  ;;  %v1905_v61 = vld [vmem:[#allocation2 + $0x108] sm:$0xff] }
 0x1b2   : > { %v1374_v13 = vpop.f32.mrf.mxu0 }
 0x1b3   : > { %v3931_v25 = vadd.f32 %v1372_v49, %v1182_v16  ;;  %v1906_v16 = vld [vmem:[#allocation2 + $0x110] sm:$0xff] }
 0x1b4   : > { %v1931_v43 = vpack.c.bf16 %v1906_v16, %v1905_v61 }
 0x1b6   : > { %v906_v24 = vpop.f32.mrf.mxu2 }
 0x1b7   : > { %v949_v42 = vadd.f32 %v906_v24, %v705_v55  ;;  %v1140_v37 = vpop.f32.mrf.mxu3 }
 0x1b8   : > { %v707_v20 = vpop.f32.mrf.mxu1 }
 0x1b9   : > { %v1183_v59 = vadd.f32 %v1140_v37, %v949_v42  ;;  %v708_v27 = vadd.f32 %v707_v20, %v3668_v33  ;;  %v1438_v20 = vld [vmem:[#allocation2 + $0x109] sm:$0xff] }
 0x1ba   : > { %v1377_v5 = vpop.f32.mrf.mxu0 }
 0x1bb   : > { %1570 = vmatmul.bf16.gmra.mxu1 %v1461_v14  ;;  %1805 = vmatmul.bf16.gmra.mxu2 %v1696_v1  ;;  %v3934_v48 = vadd.f32 %v1374_v13, %v1183_v59  ;;  %v1439_v59 = vld [vmem:[#allocation2 + $0x111] sm:$0xff] }
 0x1bc   : > { %2039 = vmatmul.bf16.gmra.mxu3 %v1930_v28 }
 0x1bd   : > { %2273 = vmatmul.bf16.gmra.mxu0 %v3710_v63 }
 0x1be   : > { %v909_v6 = vpop.f32.mrf.mxu2 }
 0x1bf   : > { %v950_v50 = vadd.f32 %v909_v6, %v708_v27  ;;  %v1143_v51 = vpop.f32.mrf.mxu3  ;;  %v1907_v27 = vld [vmem:[#allocation2 + $0x128] sm:$0xff]  ;;  %v1908_v6 = vld [vmem:[#allocation2 + $0x130] sm:$0xff] }
 0x1c0   : > { %v709_v49 = vpop.f32.mrf.mxu1 }
 0x1c1   : > { %v1184_v22 = vadd.f32 %v1143_v51, %v950_v50  ;;  %v710_v7 = vadd.f32 %v709_v49, %v3676_v41 }
 0x1c2   : > { %v1379_v9 = vpop.f32.mrf.mxu0 }
 0x1c3   : > { %v3938_v26 = vadd.f32 %v1377_v5, %v1184_v22  ;;  %v1674_v5 = vld [vmem:[#allocation2 + $0x12f] sm:$0xff] }
 0x1c6   : > { %v911_v40 = vpop.f32.mrf.mxu2 }
 0x1c7   : > { %v951_v13 = vadd.f32 %v911_v40, %v710_v7  ;;  %v1145_v45 = vpop.f32.mrf.mxu3 }
 0x1c8   : > { %v712_v12 = vpop.f32.mrf.mxu1 }
 0x1c9   : > { %v1185_v55 = vadd.f32 %v1145_v45, %v951_v13  ;;  %v713_v41 = vadd.f32 %v712_v12, %v3694_v52  ;;  %v1463_v52 = vpack.c.bf16 %v1439_v59, %v1438_v20 }
 0x1ca   : > { %v1382_v35 = vpop.f32.mrf.mxu0 }
 0x1cb   : > { %1575 = vmatmul.bf16.gmra.mxu1 %v3710_v63  ;;  %1810 = vmatmul.bf16.gmra.mxu2 %v3714_v3  ;;  %v3943_v33 = vadd.f32 %v1379_v9, %v1185_v55  ;;  %v1673_v63 = vld [vmem:[#allocation2 + $0x127] sm:$0xff]  ;;  %v1932_v9 = vpack.c.bf16 %v1908_v6, %v1907_v27 }
 0x1cc   : > { %2044 = vmatmul.bf16.gmra.mxu3 %v1931_v43  ;;  %v1698_v49 = vpack.c.bf16 %v1674_v5, %v1673_v63 }
 0x1cd   : > { %2278 = vmatmul.bf16.gmra.mxu0 %v3733_v30 }
 0x1ce   : > { %v914_v0 = vpop.f32.mrf.mxu2 }
 0x1cf   : > { %v952_v24 = vadd.f32 %v914_v0, %v713_v41  ;;  %v1148_v42 = vpop.f32.mrf.mxu3  ;;  %v1909_v0 = vld [vmem:[#allocation2 + $0x148] sm:$0xff] }
 0x1d0   : > { %v714_v37 = vpop.f32.mrf.mxu1 }
 0x1d1   : > { %v1186_v14 = vadd.f32 %v1148_v42, %v952_v24  ;;  %v715_v3 = vadd.f32 %v714_v37, %v3708_v62  ;;  %v1910_v24 = vld [vmem:[#allocation2 + $0x150] sm:$0xff] }
 0x1d2   : > { %v1384_v1 = vpop.f32.mrf.mxu0  ;;  %v1933_v20 = vpack.c.bf16 %v1910_v24, %v1909_v0  ;;  %v4274_v0 = vld [vmem:[#allocation4_spill] sm:$0xff] }
 0x1d3   : > { %v3947_v28 = vadd.f32 %v1382_v35, %v1186_v14 }
 0x1d6   : > { %v916_v50 = vpop.f32.mrf.mxu2 }
 0x1d7   : > { %v953_v30 = vadd.f32 %v916_v50, %v715_v3  ;;  %v1150_v51 = vpop.f32.mrf.mxu3 }
 0x1d8   : > { %v717_v22 = vpop.f32.mrf.mxu1 }
 0x1d9   : > { %v1187_v7 = vadd.f32 %v1150_v51, %v953_v30  ;;  %v718_v62 = vadd.f32 %v717_v22, %v3723_v10  ;;  %v4273_v30 = vld [vmem:[#allocation3_spill] sm:$0xff] }
 0x1da   : > { %v1387_v61 = vpop.f32.mrf.mxu0 }
 0x1db   : > { %1580 = vmatmul.bf16.gmra.mxu1 %v1463_v52  ;;  %1815 = vmatmul.bf16.gmra.mxu2 %v1698_v49  ;;  %v3950_v16 = vadd.f32 %v1384_v1, %v1187_v7  ;;  %v1911_v52 = vld [vmem:[#allocation2 + $0x168] sm:$0xff]  ;;  %v1912_v49 = vld [vmem:[#allocation2 + $0x170] sm:$0xff] }
 0x1dc   : > { %2049 = vmatmul.bf16.gmra.mxu3 %v1932_v9 }
 0x1dd   : > { %2283 = vmatmul.bf16.gmra.mxu0 %v3754_v39 }
 0x1de   : > { %v919_v40 = vpop.f32.mrf.mxu2 }
 0x1df   : > { %v954_v13 = vadd.f32 %v919_v40, %v718_v62  ;;  %v1153_v45 = vpop.f32.mrf.mxu3 }
 0x1e0   : > { %v719_v12 = vpop.f32.mrf.mxu1 }
 0x1e1   : > { %v1188_v43 = vadd.f32 %v1153_v45, %v954_v13  ;;  %v720_v41 = vadd.f32 %v719_v12, %v3731_v23 }
 0x1e2   : > { %v1389_v55 = vpop.f32.mrf.mxu0 }
 0x1e3   : > { %v3954_v35 = vadd.f32 %v1387_v61, %v1188_v43  ;;  %v1934_v61 = vpack.c.bf16 %v1912_v49, %v1911_v52 }
 0x1e6   : > { %v921_v42 = vpop.f32.mrf.mxu2 }
 0x1e7   : > { %v955_v37 = vadd.f32 %v921_v42, %v720_v41  ;;  %v1155_v14 = vpop.f32.mrf.mxu3 }
 0x1e8   : > { %v1546_v1 = vpop.f32.mrf.mxu1 }
 0x1e9   : > { %v1189_v59 = vadd.f32 %v1155_v14, %v955_v37  ;;  %v1626_v27 = vadd.f32 %v1546_v1, %v3752_v60 }
 0x1ea   : > { %v2249_v63 = vpop.f32.mrf.mxu0 }
 0x1eb   : > { %1585 = vmatmul.bf16.gmra.mxu1 %v3754_v39  ;;  %1820 = vmatmul.bf16.gmra.mxu2 %v3756_v47  ;;  %v3959_v10 = vadd.f32 %v1389_v55, %v1189_v59 }
 0x1ec   : > { %2054 = vmatmul.bf16.gmra.mxu3 %v1933_v20 }
 0x1ed   : > { %2288 = vmatmul.bf16.gmra.mxu0 %v3767_v11 }
 0x1ee   : > { %v1781_v23 = vpop.f32.mrf.mxu2 }
 0x1ef   : > { %v2015_v5 = vpop.f32.mrf.mxu3  ;;  %v1861_v50 = vadd.f32 %v1781_v23, %v1626_v27 }
 0x1f0   : > { %v1548_v3 = vpop.f32.mrf.mxu1 }
 0x1f1   : > { %v1627_v51 = vadd.f32 %v1548_v3, %v4273_v30  ;;  %v2095_v22 = vadd.f32 %v2015_v5, %v1861_v50  ;;  %v4276_v3 = vld [vmem:[#allocation9_spill] sm:$0xff] }
 0x1f2   : > { %v2251_v6 = vpop.f32.mrf.mxu0 }
 0x1f3   : > { %v3965_v13 = vadd.f32 %v2249_v63, %v2095_v22  ;;  %v4278_v22 = vld [vmem:[#allocation7_spill] sm:$0xff] }
 0x1f6   : > { %v1783_v39 = vpop.f32.mrf.mxu2 }
 0x1f7   : > { %v1862_v47 = vadd.f32 %v1783_v39, %v1627_v51  ;;  %v2017_v9 = vpop.f32.mrf.mxu3  ;;  %v4277_v51 = vld [vmem:[#allocation5_spill] sm:$0xff] }
 0x1f8   : > { %v1551_v7 = vpop.f32.mrf.mxu1 }
 0x1f9   : > { %v2096_v62 = vadd.f32 %v2017_v9, %v1862_v47 }
 0x1fa   : > { %v2254_v40 = vpop.f32.mrf.mxu0 }
 0x1fb   : > { %v3967_v45 = vadd.f32 %v2251_v6, %v2096_v62  ;;  %1590 = vmatmul.bf16.gmra.mxu1 %v3767_v11  ;;  %1825 = vmatmul.bf16.gmra.mxu2 %v3769_v38  ;;  %v1628_v11 = vadd.f32 %v1551_v7, %v3765_v21  ;;  %v4275_v21 = vld [vmem:[#allocation6_spill] sm:$0xff] }
 0x1fc   : > { %2059 = vmatmul.bf16.gmra.mxu3 %v1934_v61 }
 0x1fd   : > { %2293 = vmatmul.bf16.gmra.mxu0 %v3793_v44  ;;  %v3162_v60 = vpack.c.bf16 %v3967_v45, %v3965_v13 }
 0x1fe   : > { %v1786_v12 = vpop.f32.mrf.mxu2 }
 0x1ff   : > { %3163 = vst [vmem:[%s3974_s19] sm:$0xff] %v3162_v60   ;;  %v2020_v43 = vpop.f32.mrf.mxu3  ;;  %v1863_v38 = vadd.f32 %v1786_v12, %v1628_v11  ;;  %v4281_v11 = vld [vmem:[#allocation14_spill] sm:$0xff] }
 0x200   : > { %v1553_v55 = vpop.f32.mrf.mxu1 }
 0x201   : > { %v1629_v24 = vadd.f32 %v1553_v55, %v4274_v0  ;;  %v2097_v37 = vadd.f32 %v2020_v43, %v1863_v38  ;;  %v4279_v43 = vld [vmem:[#allocation10_spill] sm:$0xff]  ;;  %v4280_v55 = vld [vmem:[#allocation11_spill] sm:$0xff] }
 0x202   : > { %v2256_v41 = vpop.f32.mrf.mxu0 }
 0x203   : > { %v3982_v23 = vadd.f32 %v2254_v40, %v2097_v37 }
 0x206   : > { %v1788_v42 = vpop.f32.mrf.mxu2 }
 0x207   : > { %v1864_v14 = vadd.f32 %v1788_v42, %v1629_v24  ;;  %v2022_v1 = vpop.f32.mrf.mxu3  ;;  %v4282_v42 = vld [vmem:[#allocation8_spill] sm:$0xff] }
 0x208   : > { %v1556_v20 = vpop.f32.mrf.mxu1 }
 0x209   : > { %v2098_v59 = vadd.f32 %v2022_v1, %v1864_v14  ;;  %v1630_v52 = vadd.f32 %v1556_v20, %v4277_v51  ;;  %v4283_v20 = vld [vmem:[#allocation12_spill] sm:$0xff] }
 0x20a   : > { %v2259_v63 = vpop.f32.mrf.mxu0 }
 0x20b   : > { %v3984_v5 = vadd.f32 %v2256_v41, %v2098_v59  ;;  %1595 = vmatmul.bf16.gmra.mxu1 %v3793_v44  ;;  %1830 = vmatmul.bf16.gmra.mxu2 %v3795_v15 }
 0x20c   : > { %2064 = vmatmul.bf16.gmra.mxu3 %v4275_v21 }
 0x20d   : > { %2298 = vmatmul.bf16.gmra.mxu0 %v4276_v3  ;;  %v3167_v27 = vpack.c.bf16 %v3984_v5, %v3982_v23 }
 0x20e   : > { %v1791_v6 = vpop.f32.mrf.mxu2 }
 0x20f   : > { %3239 = vst [vmem:[%s3974_s19 + $0x8] sm:$0xff] %v3167_v27   ;;  %v2025_v50 = vpop.f32.mrf.mxu3  ;;  %v1865_v39 = vadd.f32 %v1791_v6, %v1630_v52 }
 0x210   : > { %v1558_v30 = vpop.f32.mrf.mxu1 }
 0x211   : > { %v1631_v47 = vadd.f32 %v1558_v30, %v4278_v22  ;;  %v2099_v15 = vadd.f32 %v2025_v50, %v1865_v39 }
 0x212   : > { %v2261_v49 = vpop.f32.mrf.mxu0 }
 0x213   : > { %v3995_v60 = vadd.f32 %v2259_v63, %v2099_v15  ;;  %v4285_v15 = vld [vmem:[#allocation13_spill] sm:$0xff] }
 0x216   : > { %v1793_v44 = vpop.f32.mrf.mxu2 }
 0x217   : > { %v1866_v9 = vadd.f32 %v1793_v44, %v1631_v47  ;;  %v2027_v7 = vpop.f32.mrf.mxu3 }
 0x218   : > { %v1561_v61 = vpop.f32.mrf.mxu1 }
 0x219   : > { %v2100_v62 = vadd.f32 %v2027_v7, %v1866_v9  ;;  %v1632_v37 = vadd.f32 %v1561_v61, %v4282_v42 }
 0x21a   : > { %v2264_v40 = vpop.f32.mrf.mxu0 }
 0x21b   : > { %v3997_v12 = vadd.f32 %v2261_v49, %v2100_v62  ;;  %1600 = vmatmul.bf16.gmra.mxu1 %v4276_v3  ;;  %1835 = vmatmul.bf16.gmra.mxu2 %v4279_v43  ;;  %v4284_v49 = vld [vmem:[#allocation15_spill] sm:$0xff]  ;;  %v4286_v62 = vld [vmem:[#allocation16_spill] sm:$0xff] }
 0x21c   : > { %2069 = vmatmul.bf16.gmra.mxu3 %v4280_v55 }
 0x21d   : > { %2303 = vmatmul.bf16.gmra.mxu0 %v4281_v11  ;;  %v3172_v41 = vpack.c.bf16 %v3997_v12, %v3995_v60 }
 0x21e   : > { %v1796_v38 = vpop.f32.mrf.mxu2 }
 0x21f   : > { %3240 = vst [vmem:[%s3974_s19 + $0x10] sm:$0xff] %v3172_v41   ;;  %v2030_v0 = vpop.f32.mrf.mxu3  ;;  %v1867_v1 = vadd.f32 %v1796_v38, %v1632_v37 }
 0x220   : > { %v1563_v24 = vpop.f32.mrf.mxu1 }
 0x221   : > { %v1633_v59 = vadd.f32 %v1563_v24, %v4283_v20  ;;  %v2101_v21 = vadd.f32 %v2030_v0, %v1867_v1 }
 0x222   : > { %v2266_v14 = vpop.f32.mrf.mxu0 }
 0x223   : > { %v4008_v51 = vadd.f32 %v2264_v40, %v2101_v21 }
 0x226   : > { %v1798_v63 = vpop.f32.mrf.mxu2 }
 0x227   : > { %v1868_v3 = vadd.f32 %v1798_v63, %v1633_v59  ;;  %v2032_v27 = vpop.f32.mrf.mxu3  ;;  %v4287_v59 = vld [vmem:[#allocation17_spill] sm:$0xff] }
 0x228   : > { %v1566_v6 = vpop.f32.mrf.mxu1 }
 0x229   : > { %v2102_v50 = vadd.f32 %v2032_v27, %v1868_v3  ;;  %v1634_v9 = vadd.f32 %v1566_v6, %v4285_v15  ;;  %v4288_v27 = vld [vmem:[#allocation18_spill] sm:$0xff] }
 0x22a   : > { %v2269_v30 = vpop.f32.mrf.mxu0 }
 0x22b   : > { %v4010_v52 = vadd.f32 %v2266_v14, %v2102_v50  ;;  %1605 = vmatmul.bf16.gmra.mxu1 %v4281_v11  ;;  %1840 = vmatmul.bf16.gmra.mxu2 %v3847_v46  ;;  %v2156_v50 = vld [vmem:[#allocation2 + $0x211] sm:$0xff] }
 0x22c   : > { %2074 = vmatmul.bf16.gmra.mxu3 %v4284_v49 }
 0x22d   : > { %2308 = vmatmul.bf16.gmra.mxu0 %v3861_v29  ;;  %v3177_v39 = vpack.c.bf16 %v4010_v52, %v4008_v51 }
 0x22e   : > { %v1801_v22 = vpop.f32.mrf.mxu2 }
 0x22f   : > { %3241 = vst [vmem:[%s3974_s19 + $0x18] sm:$0xff] %v3177_v39   ;;  %v2035_v47 = vpop.f32.mrf.mxu3  ;;  %v1869_v61 = vadd.f32 %v1801_v22, %v1634_v9 }
 0x230   : > { %v1568_v44 = vpop.f32.mrf.mxu1 }
 0x231   : > { %v1635_v40 = vadd.f32 %v1568_v44, %v4286_v62  ;;  %v2103_v46 = vadd.f32 %v2035_v47, %v1869_v61 }
 0x232   : > { %v2271_v7 = vpop.f32.mrf.mxu0 }
 0x233   : > { %v4021_v24 = vadd.f32 %v2269_v30, %v2103_v46 }
 0x236   : > { %v1803_v43 = vpop.f32.mrf.mxu2 }
 0x237   : > { %v1870_v55 = vadd.f32 %v1803_v43, %v1635_v40  ;;  %v2037_v11 = vpop.f32.mrf.mxu3  ;;  %v4289_v43 = vld [vmem:[#allocation19_spill] sm:$0xff] }
 0x238   : > { %v1571_v41 = vpop.f32.mrf.mxu1 }
 0x239   : > { %v2104_v38 = vadd.f32 %v2037_v11, %v1870_v55  ;;  %v1636_v63 = vadd.f32 %v1571_v41, %v4287_v59  ;;  %v1689_v41 = vld [vmem:[#allocation2 + $0x227] sm:$0xff] }
 0x23a   : > { %v2274_v0 = vpop.f32.mrf.mxu0 }
 0x23b   : > { %v4023_v42 = vadd.f32 %v2271_v7, %v2104_v38  ;;  %1610 = vmatmul.bf16.gmra.mxu1 %v3861_v29  ;;  %1845 = vmatmul.bf16.gmra.mxu2 %v3863_v56  ;;  %v2155_v29 = vld [vmem:[#allocation2 + $0x209] sm:$0xff] }
 0x23c   : > { %2079 = vmatmul.bf16.gmra.mxu3 %v3865_v57  ;;  %v2173_v22 = vpack.c.bf16 %v2156_v50, %v2155_v29  ;;  %v1690_v38 = vld [vmem:[#allocation2 + $0x22f] sm:$0xff] }
 0x23d   : > { %2313 = vmatmul.bf16.gmra.mxu0 %v3877_v4  ;;  %v3182_v37 = vpack.c.bf16 %v4023_v42, %v4021_v24  ;;  %v1706_v59 = vpack.c.bf16 %v1690_v38, %v1689_v41 }
 0x23e   : > { %v1806_v14 = vpop.f32.mrf.mxu2 }
 0x23f   : > { %3242 = vst [vmem:[%s3974_s19 + $0x20] sm:$0xff] %v3182_v37   ;;  %v2040_v1 = vpop.f32.mrf.mxu3  ;;  %v1871_v3 = vadd.f32 %v1806_v14, %v1636_v63  ;;  %v2157_v37 = vld [vmem:[#allocation2 + $0x229] sm:$0xff] }
 0x240   : > { %v1573_v20 = vpop.f32.mrf.mxu1 }
 0x241   : > { %v1637_v6 = vadd.f32 %v1573_v20, %v4288_v27  ;;  %v2105_v57 = vadd.f32 %v2040_v1, %v1871_v3 }
 0x242   : > { %v2276_v21 = vpop.f32.mrf.mxu0 }
 0x243   : > { %v4034_v15 = vadd.f32 %v2274_v0, %v2105_v57  ;;  %v4290_v0 = vld [vmem:[#allocation20_spill] sm:$0xff] }
 0x246   : > { %v1808_v56 = vpop.f32.mrf.mxu2 }
 0x247   : > { %v1872_v30 = vadd.f32 %v1808_v56, %v1637_v6  ;;  %v2042_v49 = vpop.f32.mrf.mxu3 }
 0x248   : > { %v1576_v39 = vpop.f32.mrf.mxu1 }
 0x249   : > { %v2106_v47 = vadd.f32 %v2042_v49, %v1872_v30  ;;  %v1638_v46 = vadd.f32 %v1576_v39, %v4289_v43 }
 0x24a   : > { %v2279_v44 = vpop.f32.mrf.mxu0 }
 0x24b   : > { %v4036_v9 = vadd.f32 %v2276_v21, %v2106_v47  ;;  %1615 = vmatmul.bf16.gmra.mxu1 %v3877_v4  ;;  %1850 = vmatmul.bf16.gmra.mxu2 %v3879_v19  ;;  %v2158_v19 = vld [vmem:[#allocation2 + $0x231] sm:$0xff]  ;;  %v3287_v21 = vld [vmem:[#allocation2] sm:$0xff] }
 0x24c   : > { %2084 = vmatmul.bf16.gmra.mxu3 %v3883_v58  ;;  %v1940_v3 = vpack.c.bf16 %v3287_v21, %v3287_v21  ;;  %v2174_v27 = vpack.c.bf16 %v2158_v19, %v2157_v37 }
 0x24d   : > { %2318 = vmatmul.bf16.gmra.mxu0 %v2173_v22  ;;  %v3187_v7 = vpack.c.bf16 %v4036_v9, %v4034_v15 }
 0x24e   : > { %v1811_v61 = vpop.f32.mrf.mxu2 }
 0x24f   : > { %3243 = vst [vmem:[%s3974_s19 + $0x28] sm:$0xff] %v3187_v7   ;;  %v2045_v62 = vpop.f32.mrf.mxu3  ;;  %v1873_v11 = vadd.f32 %v1811_v61, %v1638_v46 }
 0x250   : > { %v1578_v40 = vpop.f32.mrf.mxu1 }
 0x251   : > { %v1639_v4 = vadd.f32 %v1578_v40, %v4290_v0  ;;  %v2107_v58 = vadd.f32 %v2045_v62, %v1873_v11 }
 0x252   : > { %v2281_v55 = vpop.f32.mrf.mxu0 }
 0x253   : > { %v4046_v50 = vadd.f32 %v2279_v44, %v2107_v58 }
 0x256   : > { %v1813_v14 = vpop.f32.mrf.mxu2 }
 0x257   : > { %v1874_v1 = vadd.f32 %v1813_v14, %v1639_v4  ;;  %v2047_v20 = vpop.f32.mrf.mxu3 }
 0x258   : > { %v1581_v63 = vpop.f32.mrf.mxu1 }
 0x259   : > { %v2108_v6 = vadd.f32 %v2047_v20, %v1874_v1  ;;  %v1640_v47 = vadd.f32 %v1581_v63, %v3892_v34 }
 0x25a   : > { %v2284_v29 = vpop.f32.mrf.mxu0 }
 0x25b   : > { %v4048_v56 = vadd.f32 %v2281_v55, %v2108_v6  ;;  %1620 = vmatmul.bf16.gmra.mxu1 %v2173_v22  ;;  %1855 = vmatmul.bf16.gmra.mxu2 %v1706_v59 }
 0x25c   : > { %2089 = vmatmul.bf16.gmra.mxu3 %v1940_v3 }
 0x25d   : > { %2323 = vmatmul.bf16.gmra.mxu0 %v2174_v27  ;;  %v3192_v57 = vpack.c.bf16 %v4048_v56, %v4046_v50 }
 0x25e   : > { %v1816_v30 = vpop.f32.mrf.mxu2 }
 0x25f   : > { %3244 = vst [vmem:[%s3974_s19 + $0x30] sm:$0xff] %v3192_v57   ;;  %v2050_v49 = vpop.f32.mrf.mxu3  ;;  %v1875_v61 = vadd.f32 %v1816_v30, %v1640_v47 }
 0x260   : > { %v1583_v39 = vpop.f32.mrf.mxu1 }
 0x261   : > { %v1641_v44 = vadd.f32 %v1583_v39, %v3897_v2  ;;  %v2109_v40 = vadd.f32 %v2050_v49, %v1875_v61 }
 0x262   : > { %v2286_v7 = vpop.f32.mrf.mxu0 }
 0x263   : > { %v4055_v41 = vadd.f32 %v2284_v29, %v2109_v40 }
 0x266   : > { %v1818_v62 = vpop.f32.mrf.mxu2 }
 0x267   : > { %v1876_v22 = vadd.f32 %v1818_v62, %v1641_v44  ;;  %v2052_v43 = vpop.f32.mrf.mxu3 }
 0x268   : > { %v1586_v46 = vpop.f32.mrf.mxu1 }
 0x269   : > { %v2110_v55 = vadd.f32 %v2052_v43, %v1876_v22  ;;  %v1642_v2 = vadd.f32 %v1586_v46, %v3901_v18 }
 0x26a   : > { %v2289_v11 = vpop.f32.mrf.mxu0 }
 0x26b   : > { %v4057_v38 = vadd.f32 %v2286_v7, %v2110_v55 }
 0x26d   : > { %v3197_v0 = vpack.c.bf16 %v4057_v38, %v4055_v41 }
 0x26e   : > { %v1821_v4 = vpop.f32.mrf.mxu2 }
 0x26f   : > { %3245 = vst [vmem:[%s3974_s19 + $0x38] sm:$0xff] %v3197_v0   ;;  %v2055_v34 = vpop.f32.mrf.mxu3  ;;  %v1877_v14 = vadd.f32 %v1821_v4, %v1642_v2 }
 0x270   : > { %v1588_v37 = vpop.f32.mrf.mxu1 }
 0x271   : > { %v1643_v58 = vadd.f32 %v1588_v37, %v3904_v31  ;;  %v2111_v20 = vadd.f32 %v2055_v34, %v1877_v14 }
 0x272   : > { %v2291_v19 = vpop.f32.mrf.mxu0 }
 0x273   : > { %v4064_v6 = vadd.f32 %v2289_v11, %v2111_v20 }
 0x276   : > { %v1823_v1 = vpop.f32.mrf.mxu2 }
 0x277   : > { %v1878_v59 = vadd.f32 %v1823_v1, %v1643_v58  ;;  %v2057_v63 = vpop.f32.mrf.mxu3 }
 0x278   : > { %v1591_v21 = vpop.f32.mrf.mxu1 }
 0x279   : > { %v2112_v3 = vadd.f32 %v2057_v63, %v1878_v59  ;;  %v1644_v31 = vadd.f32 %v1591_v21, %v3908_v8  ;;  %v2425_v63 = vadd.f32 %v3967_v45, %v3965_v13 }
 0x27a   : > { %v2294_v27 = vpop.f32.mrf.mxu0 }
 0x27b   : > { %v4066_v29 = vadd.f32 %v2291_v19, %v2112_v3 }
 0x27d   : > { %v3202_v57 = vpack.c.bf16 %v4066_v29, %v4064_v6 }
 0x27e   : > { %v1826_v30 = vpop.f32.mrf.mxu2 }
 0x27f   : > { %3246 = vst [vmem:[%s3974_s19 + $0x40] sm:$0xff] %v3202_v57   ;;  %v2060_v18 = vpop.f32.mrf.mxu3  ;;  %v1879_v47 = vadd.f32 %v1826_v30, %v1644_v31 }
 0x280   : > { %v1593_v49 = vpop.f32.mrf.mxu1 }
 0x281   : > { %v1645_v7 = vadd.f32 %v1593_v49, %v3913_v32  ;;  %v2113_v44 = vadd.f32 %v2060_v18, %v1879_v47 }
 0x282   : > { %v2296_v39 = vpop.f32.mrf.mxu0 }
 0x283   : > { %v4073_v55 = vadd.f32 %v2294_v27, %v2113_v44  ;;  %v2426_v27 = vadd.f32 %v2425_v63, %v3982_v23 }
 0x285   : > { %v2427_v30 = vadd.f32 %v2426_v27, %v3984_v5 }
 0x286   : > { %v1828_v61 = vpop.f32.mrf.mxu2 }
 0x287   : > { %v1880_v62 = vadd.f32 %v1828_v61, %v1645_v7  ;;  %v2062_v40 = vpop.f32.mrf.mxu3  ;;  %v2428_v49 = vadd.f32 %v2427_v30, %v3995_v60 }
 0x288   : > { %v1596_v22 = vpop.f32.mrf.mxu1 }
 0x289   : > { %v2114_v43 = vadd.f32 %v2062_v40, %v1880_v62  ;;  %v1646_v32 = vadd.f32 %v1596_v22, %v3917_v36  ;;  %v2429_v47 = vadd.f32 %v2428_v49, %v3997_v12 }
 0x28a   : > { %v2299_v46 = vpop.f32.mrf.mxu0 }
 0x28b   : > { %v4075_v11 = vadd.f32 %v2296_v39, %v2114_v43  ;;  %v2430_v44 = vadd.f32 %v2429_v47, %v4008_v51 }
 0x28d   : > { %v3207_v0 = vpack.c.bf16 %v4075_v11, %v4073_v55  ;;  %v2431_v40 = vadd.f32 %v2430_v44, %v4010_v52 }
 0x28e   : > { %v1831_v4 = vpop.f32.mrf.mxu2 }
 0x28f   : > { %3247 = vst [vmem:[%s3974_s19 + $0x48] sm:$0xff] %v3207_v0   ;;  %v2065_v8 = vpop.f32.mrf.mxu3  ;;  %v1881_v2 = vadd.f32 %v1831_v4, %v1646_v32 }
 0x290   : > { %v1598_v34 = vpop.f32.mrf.mxu1 }
 0x291   : > { %v1647_v19 = vadd.f32 %v1598_v34, %v3920_v54  ;;  %v2115_v58 = vadd.f32 %v2065_v8, %v1881_v2 }
 0x292   : > { %v2301_v37 = vpop.f32.mrf.mxu0 }
 0x293   : > { %v4085_v57 = vadd.f32 %v2299_v46, %v2115_v58  ;;  %v2432_v46 = vadd.f32 %v2431_v40, %v4021_v24 }
 0x295   : > { %v2433_v32 = vadd.f32 %v2432_v46, %v4023_v42 }
 0x296   : > { %v1833_v14 = vpop.f32.mrf.mxu2 }
 0x297   : > { %v1882_v1 = vadd.f32 %v1833_v14, %v1647_v19  ;;  %v2067_v20 = vpop.f32.mrf.mxu3  ;;  %v2434_v2 = vadd.f32 %v2433_v32, %v4034_v15 }
 0x298   : > { %v1601_v59 = vpop.f32.mrf.mxu1 }
 0x299   : > { %v2116_v21 = vadd.f32 %v2067_v20, %v1882_v1  ;;  %v1648_v7 = vadd.f32 %v1601_v59, %v3924_v17 }
 0x29a   : > { %v2304_v3 = vpop.f32.mrf.mxu0 }
 0x29b   : > { %v4087_v36 = vadd.f32 %v2301_v37, %v2116_v21 }
 0x29d   : > { %v3212_v54 = vpack.c.bf16 %v4087_v36, %v4085_v57 }
 0x29e   : > { %v1836_v18 = vpop.f32.mrf.mxu2 }
 0x29f   : > { %3248 = vst [vmem:[%s3974_s19 + $0x50] sm:$0xff] %v3212_v54   ;;  %v2070_v31 = vpop.f32.mrf.mxu3  ;;  %v1883_v62 = vadd.f32 %v1836_v18, %v1648_v7 }
 0x2a0   : > { %v1603_v39 = vpop.f32.mrf.mxu1 }
 0x2a1   : > { %v1649_v22 = vadd.f32 %v1603_v39, %v3927_v53  ;;  %v2117_v0 = vadd.f32 %v2070_v31, %v1883_v62  ;;  %v2435_v53 = vadd.f32 %v2434_v2, %v4036_v9 }
 0x2a2   : > { %v2306_v61 = vpop.f32.mrf.mxu0 }
 0x2a3   : > { %v4102_v19 = vadd.f32 %v2304_v3, %v2117_v0  ;;  %v2436_v20 = vadd.f32 %v2435_v53, %v4046_v50 }
 0x2a5   : > { %v2437_v21 = vadd.f32 %v2436_v20, %v4048_v56 }
 0x2a6   : > { %v1838_v43 = vpop.f32.mrf.mxu2 }
 0x2a7   : > { %v1884_v4 = vadd.f32 %v1838_v43, %v1649_v22  ;;  %v2072_v8 = vpop.f32.mrf.mxu3  ;;  %v2438_v3 = vadd.f32 %v2437_v21, %v4055_v41 }
 0x2a8   : > { %v1606_v34 = vpop.f32.mrf.mxu1 }
 0x2a9   : > { %v2118_v37 = vadd.f32 %v2072_v8, %v1884_v4  ;;  %v1650_v27 = vadd.f32 %v1606_v34, %v3931_v25  ;;  %v2439_v18 = vadd.f32 %v2438_v3, %v4057_v38 }
 0x2aa   : > { %v2309_v17 = vpop.f32.mrf.mxu0 }
 0x2ab   : > { %v4104_v14 = vadd.f32 %v2306_v61, %v2118_v37  ;;  %v2440_v39 = vadd.f32 %v2439_v18, %v4064_v6 }
 0x2ad   : > { %v3217_v58 = vpack.c.bf16 %v4104_v14, %v4102_v19  ;;  %v2441_v62 = vadd.f32 %v2440_v39, %v4066_v29 }
 0x2ae   : > { %v1841_v1 = vpop.f32.mrf.mxu2 }
 0x2af   : > { %3249 = vst [vmem:[%s3974_s19 + $0x58] sm:$0xff] %v3217_v58   ;;  %v2075_v59 = vpop.f32.mrf.mxu3  ;;  %v1885_v54 = vadd.f32 %v1841_v1, %v1650_v27  ;;  %v2442_v22 = vadd.f32 %v2441_v62, %v4073_v55 }
 0x2b0   : > { %v1608_v63 = vpop.f32.mrf.mxu1 }
 0x2b1   : > { %v1651_v49 = vadd.f32 %v1608_v63, %v3934_v48  ;;  %v2119_v47 = vadd.f32 %v2075_v59, %v1885_v54  ;;  %v2443_v48 = vadd.f32 %v2442_v22, %v4075_v11 }
 0x2b2   : > { %v2311_v30 = vpop.f32.mrf.mxu0 }
 0x2b3   : > { %v4119_v43 = vadd.f32 %v2309_v17, %v2119_v47  ;;  %v2444_v34 = vadd.f32 %v2443_v48, %v4085_v57 }
 0x2b5   : > { %v2445_v53 = vadd.f32 %v2444_v34, %v4087_v36 }
 0x2b6   : > { %v1843_v31 = vpop.f32.mrf.mxu2 }
 0x2b7   : > { %v1886_v7 = vadd.f32 %v1843_v31, %v1651_v49  ;;  %v2077_v61 = vpop.f32.mrf.mxu3  ;;  %v2446_v58 = vadd.f32 %v2445_v53, %v4102_v19 }
 0x2b8   : > { %v1611_v44 = vpop.f32.mrf.mxu1 }
 0x2b9   : > { %v2120_v40 = vadd.f32 %v2077_v61, %v1886_v7  ;;  %v1652_v4 = vadd.f32 %v1611_v44, %v3938_v26  ;;  %v2447_v20 = vadd.f32 %v2446_v58, %v4104_v14 }
 0x2ba   : > { %v2314_v25 = vpop.f32.mrf.mxu0 }
 0x2bb   : > { %v4121_v46 = vadd.f32 %v2311_v30, %v2120_v40  ;;  %v2448_v26 = vadd.f32 %v2447_v20, %v4119_v43 }
 0x2bd   : > { %v3222_v0 = vpack.c.bf16 %v4121_v46, %v4119_v43  ;;  %v2449_v54 = vadd.f32 %v2448_v26, %v4121_v46 }
 0x2be   : > { %v1846_v8 = vpop.f32.mrf.mxu2 }
 0x2bf   : > { %3250 = vst [vmem:[%s3974_s19 + $0x60] sm:$0xff] %v3222_v0   ;;  %v1887_v32 = vadd.f32 %v1846_v8, %v1652_v4  ;;  %v2080_v37 = vpop.f32.mrf.mxu3 }
 0x2c0   : > { %v1613_v2 = vpop.f32.mrf.mxu1 }
 0x2c1   : > { %v2121_v1 = vadd.f32 %v2080_v37, %v1887_v32  ;;  %v1653_v59 = vadd.f32 %v1613_v2, %v3943_v33 }
 0x2c2   : > { %v2316_v17 = vpop.f32.mrf.mxu0 }
 0x2c3   : > { %v4134_v21 = vadd.f32 %v2314_v25, %v2121_v1 }
 0x2c5   : > { %v2450_v49 = vadd.f32 %v2449_v54, %v4134_v21 }
 0x2c6   : > { %v1848_v63 = vpop.f32.mrf.mxu2 }
 0x2c7   : > { %v1888_v27 = vadd.f32 %v1848_v63, %v1653_v59  ;;  %v2082_v30 = vpop.f32.mrf.mxu3 }
 0x2c8   : > { %v1616_v3 = vpop.f32.mrf.mxu1 }
 0x2c9   : > { %v2122_v18 = vadd.f32 %v2082_v30, %v1888_v27  ;;  %v1654_v7 = vadd.f32 %v1616_v3, %v3947_v28 }
 0x2ca   : > { %v2319_v39 = vpop.f32.mrf.mxu0 }
 0x2cb   : > { %v4138_v31 = vadd.f32 %v2316_v17, %v2122_v18 }
 0x2cd   : > { %v3227_v33 = vpack.c.bf16 %v4138_v31, %v4134_v21  ;;  %v2451_v47 = vadd.f32 %v2450_v49, %v4138_v31 }
 0x2ce   : > { %v1851_v61 = vpop.f32.mrf.mxu2 }
 0x2cf   : > { %3251 = vst [vmem:[%s3974_s19 + $0x68] sm:$0xff] %v3227_v33   ;;  %v1889_v44 = vadd.f32 %v1851_v61, %v1654_v7  ;;  %v2085_v62 = vpop.f32.mrf.mxu3 }
 0x2d0   : > { %v1618_v40 = vpop.f32.mrf.mxu1 }
 0x2d1   : > { %v2123_v25 = vadd.f32 %v2085_v62, %v1889_v44  ;;  %v1655_v0 = vadd.f32 %v1618_v40, %v3950_v16 }
 0x2d2   : > { %v2321_v4 = vpop.f32.mrf.mxu0 }
 0x2d3   : > { %v4145_v22 = vadd.f32 %v2319_v39, %v2123_v25 }
 0x2d5   : > { %v2452_v48 = vadd.f32 %v2451_v47, %v4145_v22 }
 0x2d6   : > { %v1853_v8 = vpop.f32.mrf.mxu2 }
 0x2d7   : > { %v1890_v34 = vadd.f32 %v1853_v8, %v1655_v0  ;;  %v2087_v32 = vpop.f32.mrf.mxu3 }
 0x2d8   : > { %v1621_v37 = vpop.f32.mrf.mxu1 }
 0x2d9   : > { %v2124_v2 = vadd.f32 %v2087_v32, %v1890_v34  ;;  %v1656_v58 = vadd.f32 %v1621_v37, %v3954_v35 }
 0x2da   : > { %v2324_v59 = vpop.f32.mrf.mxu0 }
 0x2db   : > { %v4149_v28 = vadd.f32 %v2321_v4, %v2124_v2 }
 0x2dd   : > { %v3232_v53 = vpack.c.bf16 %v4149_v28, %v4145_v22  ;;  %v2453_v17 = vadd.f32 %v2452_v48, %v4149_v28 }
 0x2de   : > { %v1856_v1 = vpop.f32.mrf.mxu2 }
 0x2df   : > { %3252 = vst [vmem:[%s3974_s19 + $0x70] sm:$0xff] %v3232_v53   ;;  %v1891_v20 = vadd.f32 %v1856_v1, %v1656_v58  ;;  %v2090_v16 = vpop.f32.mrf.mxu3 }
 0x2e0   : > { %v1623_v26 = vpop.f32.mrf.mxu1 }
 0x2e1   : > { %v2125_v63 = vadd.f32 %v2090_v16, %v1891_v20  ;;  %v1657_v3 = vadd.f32 %v1623_v26, %v3959_v10 }
 0x2e2   : > { %v2326_v33 = vpop.f32.mrf.mxu0 }
 0x2e3   : > { %v4156_v27 = vadd.f32 %v2324_v59, %v2125_v63 }
 0x2e5   : > { %v2454_v30 = vadd.f32 %v2453_v17, %v4156_v27 }
 0x2e6   : > { %v1858_v54 = vpop.f32.mrf.mxu2 }
 0x2e7   : > { %v1892_v18 = vadd.f32 %v1858_v54, %v1657_v3  ;;  %v2092_v49 = vpop.f32.mrf.mxu3 }
 0x2e9   : > { %v2126_v39 = vadd.f32 %v2092_v49, %v1892_v18 }
 0x2eb   : > { %v4160_v35 = vadd.f32 %v2326_v33, %v2126_v39 }
 0x2ed   : > { %v3237_v47 = vpack.c.bf16 %v4160_v35, %v4156_v27  ;;  %v2455_v7 = vadd.f32 %v2454_v30, %v4160_v35 }
 0x2ef   : > { %3253 = vst [vmem:[%s3974_s19 + $0x78] sm:$0xff] %v3237_v47   ;;  %v2456_v61 = vrot.slane %v2455_v7, 4 }
 0x2f1   : > { %v2457_v44 = vadd.f32 %v2456_v61, %v2455_v7 }
 0x2f3   : > { %v2458_v62 = vrot.slane %v2457_v44, 2 }
 0x2f5   : > { %v2459_v40 = vadd.f32 %v2458_v62, %v2457_v44 }
 0x2f7   : > { %v2460_v25 = vrot.slane %v2459_v40, 1 }
 0x2f9   : > { %v4166_v48 = vadd.f32 %v2460_v25, %v2459_v40 }
 0x2fb   : > { %v4169_v10 = vmul.f32 0.00390625, %v4166_v48 }
 0x2fd   : > { %v2463_v0 = vsub.f32 %v3965_v13, %v4169_v10  ;;  %v2464_v4 = vsub.f32 %v3967_v45, %v4169_v10  ;;  %v2465_v8 = vsub.f32 %v3982_v23, %v4169_v10  ;;  %v2466_v37 = vsub.f32 %v3984_v5, %v4169_v10 }
 0x2fe   : > { %v2467_v2 = vsub.f32 %v3995_v60, %v4169_v10  ;;  %v2468_v58 = vsub.f32 %v3997_v12, %v4169_v10  ;;  %v2469_v45 = vsub.f32 %v4008_v51, %v4169_v10  ;;  %v2470_v16 = vsub.f32 %v4010_v52, %v4169_v10 }
 0x2ff   : > { %v2495_v34 = vmul.f32 %v2463_v0, %v2463_v0  ;;  %v2496_v32 = vmul.f32 %v2464_v4, %v2464_v4  ;;  %v2497_v53 = vmul.f32 %v2465_v8, %v2465_v8  ;;  %v2498_v13 = vmul.f32 %v2466_v37, %v2466_v37 }
 0x300   : > { %v2499_v20 = vmul.f32 %v2467_v2, %v2467_v2  ;;  %v2500_v59 = vmul.f32 %v2468_v58, %v2468_v58  ;;  %v2471_v60 = vsub.f32 %v4021_v24, %v4169_v10  ;;  %v2501_v63 = vmul.f32 %v2469_v45, %v2469_v45 }
 0x301   : > { %v2527_v17 = vadd.f32 %v2496_v32, %v2495_v34  ;;  %v2472_v12 = vsub.f32 %v4023_v42, %v4169_v10  ;;  %v2502_v30 = vmul.f32 %v2470_v16, %v2470_v16  ;;  %v2473_v51 = vsub.f32 %v4034_v15, %v4169_v10 }
 0x302   : > { %v2503_v54 = vmul.f32 %v2471_v60, %v2471_v60  ;;  %v2474_v52 = vsub.f32 %v4036_v9, %v4169_v10  ;;  %v2475_v24 = vsub.f32 %v4046_v50, %v4169_v10  ;;  %v2476_v42 = vsub.f32 %v4048_v56, %v4169_v10 }
 0x303   : > { %v2528_v1 = vadd.f32 %v2527_v17, %v2497_v53  ;;  %v2504_v49 = vmul.f32 %v2472_v12, %v2472_v12  ;;  %v2505_v33 = vmul.f32 %v2473_v51, %v2473_v51  ;;  %v2477_v15 = vsub.f32 %v4055_v41, %v4169_v10 }
 0x304   : > { %v2506_v7 = vmul.f32 %v2474_v52, %v2474_v52  ;;  %v2507_v44 = vmul.f32 %v2475_v24, %v2475_v24  ;;  %v2478_v9 = vsub.f32 %v4057_v38, %v4169_v10  ;;  %v2508_v40 = vmul.f32 %v2476_v42, %v2476_v42 }
 0x305   : > { %v2529_v23 = vadd.f32 %v2528_v1, %v2498_v13  ;;  %v2479_v50 = vsub.f32 %v4064_v6, %v4169_v10  ;;  %v2509_v0 = vmul.f32 %v2477_v15, %v2477_v15  ;;  %v2480_v56 = vsub.f32 %v4066_v29, %v4169_v10 }
 0x306   : > { %v2510_v8 = vmul.f32 %v2478_v9, %v2478_v9  ;;  %v2481_v41 = vsub.f32 %v4073_v55, %v4169_v10  ;;  %v2482_v38 = vsub.f32 %v4075_v11, %v4169_v10  ;;  %v2483_v6 = vsub.f32 %v4085_v57, %v4169_v10 }
 0x307   : > { %v2530_v5 = vadd.f32 %v2529_v23, %v2499_v20  ;;  %v2511_v32 = vmul.f32 %v2479_v50, %v2479_v50  ;;  %v2512_v2 = vmul.f32 %v2480_v56, %v2480_v56  ;;  %v2484_v29 = vsub.f32 %v4087_v36, %v4169_v10 }
 0x308   : > { %v2513_v17 = vmul.f32 %v2481_v41, %v2481_v41  ;;  %v2514_v13 = vmul.f32 %v2482_v38, %v2482_v38  ;;  %v2485_v55 = vsub.f32 %v4102_v19, %v4169_v10  ;;  %v2515_v45 = vmul.f32 %v2483_v6, %v2483_v6 }
 0x309   : > { %v2531_v26 = vadd.f32 %v2530_v5, %v2500_v59  ;;  %v2486_v11 = vsub.f32 %v4104_v14, %v4169_v10  ;;  %v2516_v23 = vmul.f32 %v2484_v29, %v2484_v29  ;;  %v2487_v57 = vsub.f32 %v4119_v43, %v4169_v10 }
 0x30a   : > { %v2517_v59 = vmul.f32 %v2485_v55, %v2485_v55  ;;  %v2488_v36 = vsub.f32 %v4121_v46, %v4169_v10  ;;  %v2489_v19 = vsub.f32 %v4134_v21, %v4169_v10  ;;  %v2490_v14 = vsub.f32 %v4138_v31, %v4169_v10 }
 0x30b   : > { %v2532_v3 = vadd.f32 %v2531_v26, %v2501_v63  ;;  %v2518_v60 = vmul.f32 %v2486_v11, %v2486_v11  ;;  %v2519_v26 = vmul.f32 %v2487_v57, %v2487_v57  ;;  %v2491_v43 = vsub.f32 %v4145_v22, %v4169_v10 }
 0x30c   : > { %v2521_v51 = vmul.f32 %v2489_v19, %v2489_v19  ;;  %v2492_v46 = vsub.f32 %v4149_v28, %v4169_v10  ;;  %v2493_v21 = vsub.f32 %v4156_v27, %v4169_v10  ;;  %v2494_v31 = vsub.f32 %v4160_v35, %v4169_v10 }
 0x30d   : > { %v2533_v18 = vadd.f32 %v2532_v3, %v2502_v30  ;;  %v2520_v30 = vmul.f32 %v2488_v36, %v2488_v36  ;;  %v2564_v28 = vlaneseq }
 0x30e   : > { %v2524_v24 = vmul.f32 %v2492_v46, %v2492_v46  ;;  %v2526_v42 = vmul.f32 %v2494_v31, %v2494_v31 }
 0x30f   : > { %v2534_v39 = vadd.f32 %v2533_v18, %v2503_v54  ;;  %v2522_v18 = vmul.f32 %v2490_v14, %v2490_v14  ;;  %v2565_v9 = vshrl.u32 %v2564_v28, 7 }
 0x311   : > { %v2535_v47 = vadd.f32 %v2534_v39, %v2504_v49  ;;  %v2523_v49 = vmul.f32 %v2491_v43, %v2491_v43  ;;  %vm2567_vm0 = vcmp.eq.s32.totalorder %v2565_v9, 1  ;;  %vm2566_vm1 = vcmp.eq.s32.totalorder %v2565_v9, 0 }
 0x313   : > { %v2536_v61 = vadd.f32 %v2535_v47, %v2505_v33  ;;  %v2525_v47 = vmul.f32 %v2493_v21, %v2493_v21 }
 0x315   : > { %v2537_v62 = vadd.f32 %v2536_v61, %v2506_v7 }
 0x317   : > { %v2538_v25 = vadd.f32 %v2537_v62, %v2507_v44 }
 0x319   : > { %v2539_v4 = vadd.f32 %v2538_v25, %v2508_v40 }
 0x31b   : > { %v2540_v34 = vadd.f32 %v2539_v4, %v2509_v0 }
 0x31d   : > { %v2541_v37 = vadd.f32 %v2540_v34, %v2510_v8 }
 0x31f   : > { %v2542_v53 = vadd.f32 %v2541_v37, %v2511_v32 }
 0x321   : > { %v2543_v58 = vadd.f32 %v2542_v53, %v2512_v2 }
 0x323   : > { %v2544_v1 = vadd.f32 %v2543_v58, %v2513_v17 }
 0x325   : > { %v2545_v20 = vadd.f32 %v2544_v1, %v2514_v13 }
 0x327   : > { %v2546_v16 = vadd.f32 %v2545_v20, %v2515_v45 }
 0x329   : > { %v2547_v5 = vadd.f32 %v2546_v16, %v2516_v23 }
 0x32b   : > { %v2548_v63 = vadd.f32 %v2547_v5, %v2517_v59 }
 0x32d   : > { %v2549_v12 = vadd.f32 %v2548_v63, %v2518_v60 }
 0x32f   : > { %v2550_v3 = vadd.f32 %v2549_v12, %v2519_v26 }
 0x331   : > { %v2551_v54 = vadd.f32 %v2550_v3, %v2520_v30 }
 0x333   : > { %v2552_v52 = vadd.f32 %v2551_v54, %v2521_v51 }
 0x335   : > { %v2553_v39 = vadd.f32 %v2552_v52, %v2522_v18 }
 0x337   : > { %v2554_v33 = vadd.f32 %v2553_v39, %v2523_v49 }
 0x339   : > { %v2555_v22 = vadd.f32 %v2554_v33, %v2524_v24 }
 0x33b   : > { %v2556_v7 = vadd.f32 %v2555_v22, %v2525_v47 }
 0x33d   : > { %v2557_v61 = vadd.f32 %v2556_v7, %v2526_v42 }
 0x33f   : > { %v2558_v15 = vrot.slane %v2557_v61, 4 }
 0x341   : > { %v2559_v44 = vadd.f32 %v2558_v15, %v2557_v61 }
 0x343   : > { %v2560_v62 = vrot.slane %v2559_v44, 2 }
 0x345   : > { %v2561_v40 = vadd.f32 %v2560_v62, %v2559_v44 }
 0x347   : > { %v2562_v27 = vrot.slane %v2561_v40, 1 }
 0x349   : > { %v2563_v25 = vadd.f32 %v2562_v27, %v2561_v40 }
 0x34b   : > { %v2568_v35 = vsel %vm2567_vm0, %v2563_v25, 0.0 }
 0x34c   : > { %v2569_v10 = vsel %vm2566_vm1, %v4166_v48, %v2568_v35 }
 0x34d   : > { %2570 = vst [vmem:[%s181_s24] sm:$0xff] %v2569_v10 }
 0x34e PF: > { %s14_s12 = sadd.s32 1, %s3294_s12  }
 0x34f   : > { %p11_p4 = scmp.ge.s32.totalorder %s14_s12, 4  }
 0x351   :  { %13 = sbr.rel (!%p11_p4) target bundleno = 1 (0x1), region = 80 }

// kernel: resnet_basic_block.4
= control target key start
LH: loop header
LB: loop body
LE: loop exit
PB: predicated region body
PF: predicated region fallthrough
CT: control target
= control target key end

     0   :  { %s3601_s18 = smov 0   ;;  %s4622_s0 = inlined_call_operand.vmem [shape: bf16[2,16,16,128], index: 0, kind: input, shape index: {}]   ;;  %s4623_s1 = inlined_call_operand.vmem [shape: f32[1,128], index: 1, kind: input, shape index: {}]   ;;  %s4624_s2 = inlined_call_operand.vmem [shape: f32[1,128], index: 2, kind: input, shape index: {}]   ;;  %s4625_s3 = inlined_call_operand.vmem [shape: bf16[3,3,128,128], index: 3, kind: input, shape index: {}]   ;;  %s4626_s4 = inlined_call_operand.vmem [shape: bf16[2,16,16,128], index: 4, kind: output, shape index: {0}]   ;;  %s4627_s5 = inlined_call_operand.vmem [shape: f32[2,8,128], index: 5, kind: output, shape index: {1}]  }
   0x1 LB: > { %s2847_s19 = sadd.s32 4294967295, %s3567_s18   ;;  %p2851_p0 = scmp.ge.s32.totalorder %s3567_s18, 1  ;;  %s3567_s18 = sphi %s3601_s18, %s16_s18  }
   0x2   : > { %p190_p1 = scmp.lt.s32.totalorder %s3567_s18, 3 }
   0x4   : > { %p191_p2 = pnand %p2851_p0, %p190_p1 }
   0x6   : > { %194 = sbr.rel (%p191_p2) target bundleno = 846 (0x34e), region = 36 }
   0xb   : > { %v3292_v0 = vld [vmem:[%s4625_s3 + $0x78] sm:$0xff]  ;;  %p222_p3 = scmp.lt.s32.totalorder %s2847_s19, 1  ;;  %v3569_v1 = vmov 0.0   ;;  %v3291_v2 = vld [vmem:[%s4625_s3 + $0x70] sm:$0xff]  ;;  %v3631_v3 = vld [vmem:[%s4623_s1] ss:$0 sm:$0xff] }
   0xc   : > { %236 = vst [vmem:[#allocation2] sm:$0xff] %v3569_v1  ;;  %3523 = vmatpush.bf16.msra.mxu1 %v3292_v0  ;;  %3524 = vmatpush.bf16.msra.mxu2 %v3292_v0  ;;  %v3290_v4 = vld [vmem:[%s4625_s3 + $0x68] sm:$0xff]  ;;  %v3642_v8 = vld [vmem:[%s4624_s2] ss:$0 sm:$0xff]  ;;  %v3288_v19 = vld [vmem:[%s4625_s3 + $0x58] sm:$0xff] }
   0xd   : > { %s4664_s19 = smov (!%p222_p3, %s2847_s19), 1  ;;  %237 = vst [vmem:[#allocation2 + $0x8] sm:$0xff] %v3569_v1  ;;  %3525 = vmatpush.bf16.msra.mxu3 %v3292_v0  ;;  %686 = vmatpush.bf16.msra.mxu0 %v3292_v0  ;;  %v3289_v11 = vld [vmem:[%s4625_s3 + $0x60] sm:$0xff]  ;;  %v3287_v25 = vld [vmem:[%s4625_s3 + $0x50] sm:$0xff]  ;;  %v3286_v30 = vld [vmem:[%s4625_s3 + $0x48] sm:$0xff]  ;;  %v3570_v0 = vmov 0.0|0.0  }
   0xe   : > { %s3275_s24 = sshll.u32 %s4664_s19, 7  ;;  %238 = vst [vmem:[#allocation2 + $0x10] sm:$0xff] %v3569_v1  ;;  %v3285_v36 = vld [vmem:[%s4625_s3 + $0x40] sm:$0xff]  ;;  %v3300_v43 = vld [vmem:[%s4625_s3 + $0xb8] sm:$0xff]  ;;  %v3299_v57 = vld [vmem:[%s4625_s3 + $0xb0] sm:$0xff] }
   0xf   : > { %s3626_s27 = scalar_lea.vmem %s4622_s0, %s3275_s24  ;;  %239 = vst [vmem:[#allocation2 + $0x18] sm:$0x1] %v3569_v1  ;;  %v3308_v44 = vld [vmem:[%s4625_s3 + $0xf8] sm:$0xff]  ;;  %v3307_v58 = vld [vmem:[%s4625_s3 + $0xf0] sm:$0xff]  ;;  %s4357_s30 = scalar_lea.vmem %s4626_s4, %s3275_s24 }
  0x10   : > { %3526 = vmatpush.bf16.msra.mxu1 %v3291_v2  ;;  %3527 = vmatpush.bf16.msra.mxu2 %v3291_v2  ;;  %v3495_v5 = vld [vmem:[%s3626_s27 + $0x18] sm:$0xff]   ;;  %240 = vst [vmem:[#allocation2 + $0x20] sm:$0xff] %v3569_v1  ;;  %v3496_v35 = vld [vmem:[%s3626_s27 + $0x20] sm:$0xff]   ;;  %s2856_s24 = sshll.u32 %s4664_s19, 3 }
  0x11   : > { %3528 = vmatpush.bf16.msra.mxu3 %v3291_v2  ;;  %687 = vmatpush.bf16.msra.mxu0 %v3291_v2  ;;  %v3363_v6 = vunpack.c.l.bf16 %v3495_v5  ;;  %v3364_v7 = vunpack.c.h.bf16 %v3495_v5  ;;  %243 = vst [vmem:[#allocation2 + $0x38] sm:$0x1] %v3569_v1  ;;  %v3499_v12 = vld [vmem:[%s3626_s27 + $0x38] sm:$0xff]   ;;  %v3500_v39 = vld [vmem:[%s3626_s27 + $0x40] sm:$0xff]   ;;  %v3367_v45 = vunpack.c.l.bf16 %v3496_v35  ;;  %v3368_v46 = vunpack.c.h.bf16 %v3496_v35  ;;  %v3501_v35 = vld [vmem:[%s3626_s27 + $0x48] sm:$0xff]   ;;  %s235_s8 = scalar_lea.vmem %s4627_s5, %s2856_s24 }
  0x12   : > { %244 = vst [vmem:[#allocation2 + $0x40] sm:$0xff] %v3569_v1  ;;  %v3503_v15 = vld [vmem:[%s3626_s27 + $0x58] sm:$0xff]   ;;  %v3379_v17 = vunpack.c.l.bf16 %v3499_v12  ;;  %v3380_v18 = vunpack.c.h.bf16 %v3499_v12  ;;  %v3504_v40 = vld [vmem:[%s3626_s27 + $0x60] sm:$0xff]   ;;  %v3383_v48 = vunpack.c.l.bf16 %v3500_v39  ;;  %v3384_v49 = vunpack.c.h.bf16 %v3500_v39  ;;  %v3306_v12 = vld [vmem:[%s4625_s3 + $0xe8] sm:$0xff] }
  0x13   : > { %v383_v9 = vmul.f32 %v3631_v3, %v3363_v6  ;;  %v384_v10 = vmul.f32 %v3631_v3, %v3364_v7  ;;  %247 = vst [vmem:[#allocation2 + $0x58] sm:$0x1] %v3569_v1  ;;  %v3395_v21 = vunpack.c.l.bf16 %v3503_v15  ;;  %v3396_v22 = vunpack.c.h.bf16 %v3503_v15  ;;  %v3350_v41 = vld [vmem:[%s3626_s27] sm:$0xff]   ;;  %v3284_v55 = vld [vmem:[%s4625_s3 + $0x38] sm:$0xff]  ;;  %v3283_v6 = vld [vmem:[%s4625_s3 + $0x30] sm:$0xff] }
  0x14   : > { %3529 = vmatpush.bf16.msra.mxu1 %v3290_v4  ;;  %3530 = vmatpush.bf16.msra.mxu2 %v3290_v4  ;;  %248 = vst [vmem:[#allocation2 + $0x60] sm:$0xff] %v3569_v1  ;;  %v391_v23 = vmul.f32 %v3631_v3, %v3379_v17  ;;  %v392_v24 = vmul.f32 %v3631_v3, %v3380_v18  ;;  %v3399_v50 = vunpack.c.l.bf16 %v3504_v40  ;;  %v3400_v52 = vunpack.c.h.bf16 %v3504_v40  ;;  %v3316_v56 = vld [vmem:[%s4625_s3 + $0x138] sm:$0xff]  ;;  %v3315_v7 = vld [vmem:[%s4625_s3 + $0x130] sm:$0xff] }
  0x15   : > { %3531 = vmatpush.bf16.msra.mxu3 %v3290_v4  ;;  %688 = vmatpush.bf16.msra.mxu0 %v3290_v4  ;;  %v3655_v13 = vadd.f32 %v3642_v8, %v383_v9  ;;  %v419_v14 = vadd.f32 %v3642_v8, %v384_v10  ;;  %251 = vst [vmem:[#allocation2 + $0x78] sm:$0x1] %v3569_v1  ;;  %v3351_v53 = vunpack.c.l.bf16 %v3350_v41  ;;  %v3352_v54 = vunpack.c.h.bf16 %v3350_v41 }
  0x16   : > { %252 = vst [vmem:[#allocation2 + $0x80] sm:$0xff] %v3569_v1  ;;  %v399_v26 = vmul.f32 %v3631_v3, %v3395_v21  ;;  %v400_v27 = vmul.f32 %v3631_v3, %v3396_v22  ;;  %v3680_v28 = vadd.f32 %v3642_v8, %v391_v23  ;;  %v3683_v29 = vadd.f32 %v3642_v8, %v392_v24  ;;  %v3314_v21 = vld [vmem:[%s4625_s3 + $0x128] sm:$0xff]  ;;  %v3297_v24 = vld [vmem:[%s4625_s3 + $0xa0] sm:$0xff] }
  0x17   : > { %v450_v16 = vmax.f32 %v3655_v13, 0.0  ;;  %255 = vst [vmem:[#allocation2 + $0x98] sm:$0x1] %v3569_v1  ;;  %v451_v20 = vmax.f32 %v419_v14, 0.0  ;;  %v385_v59 = vmul.f32 %v3631_v3, %v3367_v45  ;;  %v386_v60 = vmul.f32 %v3631_v3, %v3368_v46  ;;  %v3493_v46 = vld [vmem:[%s3626_s27 + $0x8] sm:$0xff]  }
  0x18   : > { %3532 = vmatpush.bf16.msra.mxu1 %v3289_v11  ;;  %3533 = vmatpush.bf16.msra.mxu2 %v3289_v11  ;;  %256 = vst [vmem:[#allocation2 + $0xa0] sm:$0xff] %v3569_v1  ;;  %v3690_v31 = vadd.f32 %v3642_v8, %v399_v26  ;;  %v3693_v32 = vadd.f32 %v3642_v8, %v400_v27  ;;  %v458_v33 = vmax.f32 %v3680_v28, 0.0  ;;  %v459_v34 = vmax.f32 %v3683_v29, 0.0 }
  0x19   : > { %3534 = vmatpush.bf16.msra.mxu3 %v3289_v11  ;;  %689 = vmatpush.bf16.msra.mxu0 %v3289_v11  ;;  %483 = vst [vmem:[#allocation2 + $0x88] sm:$0xff] %v450_v16  ;;  %v3711_v42 = vpack.c.bf16 %v451_v20, %v450_v16  ;;  %v393_v61 = vmul.f32 %v3631_v3, %v3383_v48  ;;  %v3298_v11 = vld [vmem:[%s4625_s3 + $0xa8] sm:$0xff] }
  0x1a   : > { %484 = vst [vmem:[#allocation2 + $0x90] sm:$0xff] %v451_v20  ;;  %v466_v37 = vmax.f32 %v3690_v31, 0.0  ;;  %v467_v38 = vmax.f32 %v3693_v32, 0.0  ;;  %v613_v47 = vpack.c.bf16 %v459_v34, %v458_v33  ;;  %v394_v62 = vmul.f32 %v3631_v3, %v3384_v49  ;;  %v3282_v20 = vld [vmem:[%s4625_s3 + $0x28] sm:$0xff] }
  0x1b   : > { %259 = vst [vmem:[#allocation2 + $0xb8] sm:$0x1] %v3569_v1  ;;  %v401_v63 = vmul.f32 %v3631_v3, %v3399_v50  ;;  %v402_v2 = vmul.f32 %v3631_v3, %v3400_v52  ;;  %v377_v4 = vmul.f32 %v3631_v3, %v3351_v53  ;;  %v378_v5 = vmul.f32 %v3631_v3, %v3352_v54  ;;  %v3296_v50 = vld [vmem:[%s4625_s3 + $0x98] sm:$0xff] }
  0x1c   : > { %3535 = vmatpush.bf16.msra.mxu1 %v3288_v19  ;;  %3536 = vmatpush.bf16.msra.mxu2 %v3288_v19  ;;  %260 = vst [vmem:[#allocation2 + $0xc0] sm:$0xff] %v3569_v1  ;;  %v617_v51 = vpack.c.bf16 %v467_v38, %v466_v37  ;;  %v3764_v9 = vadd.f32 %v3642_v8, %v385_v59  ;;  %v3388_v49 = vunpack.c.h.bf16 %v3501_v35  ;;  %v3303_v59 = vld [vmem:[%s4625_s3 + $0xd0] sm:$0xff] }
  0x1d   : > { %3537 = vmatpush.bf16.msra.mxu3 %v3288_v19  ;;  %690 = vmatpush.bf16.msra.mxu0 %v3288_v19  ;;  %263 = vst [vmem:[#allocation2 + $0xd8] sm:$0x1] %v3569_v1  ;;  %v3767_v10 = vadd.f32 %v3642_v8, %v386_v60  ;;  %v3777_v13 = vadd.f32 %v3642_v8, %v393_v61  ;;  %v3497_v19 = vld [vmem:[%s3626_s27 + $0x28] sm:$0xff]  }
  0x1e   : > { %264 = vst [vmem:[#allocation2 + $0xe0] sm:$0xff] %v3569_v1  ;;  %v3780_v14 = vadd.f32 %v3642_v8, %v394_v62  ;;  %v3784_v15 = vadd.f32 %v3642_v8, %v401_v63  ;;  %v3787_v16 = vadd.f32 %v3642_v8, %v402_v2  ;;  %v3790_v17 = vadd.f32 %v3642_v8, %v377_v4  ;;  %v3502_v63 = vld [vmem:[%s3626_s27 + $0x50] sm:$0xff]  }
  0x1f   : > { %267 = vst [vmem:[#allocation2 + $0xf8] sm:$0x1] %v3569_v1  ;;  %v3793_v18 = vadd.f32 %v3642_v8, %v378_v5  ;;  %v452_v22 = vmax.f32 %v3764_v9, 0.0  ;;  %v453_v23 = vmax.f32 %v3767_v10, 0.0  ;;  %v460_v26 = vmax.f32 %v3777_v13, 0.0  ;;  %v3506_v9 = vld [vmem:[%s3626_s27 + $0x70] sm:$0xff]  }
  0x20   : > { %3538 = vmatpush.bf16.msra.mxu1 %v3287_v25  ;;  %3539 = vmatpush.bf16.msra.mxu2 %v3287_v25  ;;  %268 = vst [vmem:[#allocation2 + $0x100] sm:$0xff] %v3569_v1  ;;  %v461_v27 = vmax.f32 %v3780_v14, 0.0  ;;  %v469_v39 = vmax.f32 %v3787_v16, 0.0  ;;  %v444_v40 = vmax.f32 %v3790_v17, 0.0  ;;  %v3372_v45 = vunpack.c.h.bf16 %v3497_v19  ;;  %v3311_v10 = vld [vmem:[%s4625_s3 + $0x110] sm:$0xff]  ;;  %v3294_v14 = vld [vmem:[%s4625_s3 + $0x88] sm:$0xff] }
  0x21   : > { %3540 = vmatpush.bf16.msra.mxu3 %v3287_v25  ;;  %691 = vmatpush.bf16.msra.mxu0 %v3287_v25  ;;  %271 = vst [vmem:[#allocation2 + $0x118] sm:$0x1] %v3569_v1  ;;  %v3305_v25 = vld [vmem:[%s4625_s3 + $0xe0] sm:$0xff]  ;;  %v445_v41 = vmax.f32 %v3793_v18, 0.0  ;;  %v3832_v48 = vpack.c.bf16 %v453_v23, %v452_v22  ;;  %v396_v32 = vmul.f32 %v3631_v3, %v3388_v49  ;;  %v3391_v13 = vunpack.c.l.bf16 %v3502_v63  ;;  %v3278_v17 = vld [vmem:[%s4625_s3 + $0x8] sm:$0xff] }
  0x22   : > { %272 = vst [vmem:[#allocation2 + $0x120] sm:$0xff] %v3569_v1  ;;  %v3842_v28 = vpack.c.bf16 %v461_v27, %v460_v26  ;;  %v388_v31 = vmul.f32 %v3631_v3, %v3372_v45 }
  0x23   : > { %275 = vst [vmem:[#allocation2 + $0x138] sm:$0x1] %v3569_v1  ;;  %v3855_v29 = vpack.c.bf16 %v445_v41, %v444_v40  ;;  %v397_v18 = vmul.f32 %v3631_v3, %v3391_v13 }
  0x24   : > { %3541 = vmatpush.bf16.msra.mxu1 %v3286_v30  ;;  %3542 = vmatpush.bf16.msra.mxu2 %v3286_v30  ;;  %276 = vst [vmem:[#allocation2 + $0x140] sm:$0xff] %v3569_v1  ;;  %v3887_v5 = vadd.f32 %v3642_v8, %v388_v31 }
  0x25   : > { %3543 = vmatpush.bf16.msra.mxu3 %v3286_v30  ;;  %692 = vmatpush.bf16.msra.mxu0 %v3286_v30  ;;  %279 = vst [vmem:[#allocation2 + $0x158] sm:$0x1] %v3569_v1  ;;  %v3371_v30 = vunpack.c.l.bf16 %v3497_v19  ;;  %v3302_v19 = vld [vmem:[%s4625_s3 + $0xc8] sm:$0xff] }
  0x26   : > { %280 = vst [vmem:[#allocation2 + $0x160] sm:$0xff] %v3569_v1  ;;  %v455_v16 = vmax.f32 %v3887_v5, 0.0  ;;  %v3332_v5 = vld [vmem:[%s4625_s3 + $0x1b8] sm:$0xff] }
  0x27   : > { %283 = vst [vmem:[#allocation2 + $0x178] sm:$0x1] %v3569_v1 }
  0x28   : > { %3544 = vmatpush.bf16.msra.mxu1 %v3285_v36  ;;  %3545 = vmatpush.bf16.msra.mxu2 %v3285_v36  ;;  %284 = vst [vmem:[#allocation2 + $0x180] sm:$0xff] %v3569_v1 }
  0x29   : > { %3546 = vmatpush.bf16.msra.mxu3 %v3285_v36  ;;  %693 = vmatpush.bf16.msra.mxu0 %v3285_v36  ;;  %287 = vst [vmem:[#allocation2 + $0x198] sm:$0x1] %v3569_v1  ;;  %v468_v36 = vmax.f32 %v3784_v15, 0.0 }
  0x2a   : > { %288 = vst [vmem:[#allocation2 + $0x1a0] sm:$0xff] %v3569_v1 }
  0x2b   : > { %714 = vmatmul.bf16.vlgmr.msra.gmra.mxu1 %v3711_v42  ;;  %291 = vst [vmem:[#allocation2 + $0x1b8] sm:$0x1] %v3569_v1  ;;  %734 = vmatmul.bf16.vlgmr.msra.gmra.mxu2 %v613_v47  ;;  %v3313_v47 = vld [vmem:[%s4625_s3 + $0x120] sm:$0xff]  ;;  %v618_v54 = vpack.c.bf16 %v469_v39, %v468_v36 }
  0x2c   : > { %1025 = vmatpush.bf16.msrb.mxu2 %v3300_v43  ;;  %292 = vst [vmem:[#allocation2 + $0x1c0] sm:$0xff] %v3569_v1  ;;  %754 = vmatmul.bf16.vlgmr.msra.gmra.mxu3 %v617_v51  ;;  %v3505_v43 = vld [vmem:[%s3626_s27 + $0x68] sm:$0xff]   ;;  %v3304_v51 = vld [vmem:[%s4625_s3 + $0xd8] sm:$0xff] }
  0x2d   : > { %1259 = vmatpush.bf16.msrb.mxu3 %v3308_v44  ;;  %694 = vmatmul.bf16.vlgmr.msra.gmra.mxu0 %v3570_v0  ;;  %295 = vst [vmem:[#allocation2 + $0x1d8] sm:$0x1] %v3569_v1  ;;  %v3281_v44 = vld [vmem:[%s4625_s3 + $0x20] sm:$0xff]  ;;  %v3403_v52 = vunpack.c.l.bf16 %v3505_v43  ;;  %v3404_v53 = vunpack.c.h.bf16 %v3505_v43 }
  0x2e   : > { %823 = vmatpush.bf16.msrb.mxu1 %v3284_v55  ;;  %1493 = vmatpush.bf16.msrb.mxu0 %v3316_v56  ;;  %296 = vst [vmem:[#allocation2 + $0x1e0] sm:$0xff] %v3569_v1  ;;  %v3356_v55 = vunpack.c.h.bf16 %v3493_v46  ;;  %v3312_v56 = vld [vmem:[%s4625_s3 + $0x118] sm:$0xff]  ;;  %v3293_v43 = vld [vmem:[%s4625_s3 + $0x80] sm:$0xff] }
  0x2f   : > { %299 = vst [vmem:[#allocation2 + $0x1f8] sm:$0x1] %v3569_v1  ;;  %v403_v61 = vmul.f32 %v3631_v3, %v3403_v52  ;;  %v404_v62 = vmul.f32 %v3631_v3, %v3404_v53 }
  0x30   : > { %1026 = vmatpush.bf16.msrb.mxu2 %v3299_v57  ;;  %300 = vst [vmem:[#allocation2 + $0x200] sm:$0xff] %v3569_v1  ;;  %v3498_v57 = vld [vmem:[%s3626_s27 + $0x30] sm:$0xff]   ;;  %v380_v2 = vmul.f32 %v3631_v3, %v3356_v55  ;;  %v432_v55 = vadd.f32 %v3642_v8, %v397_v18 }
  0x31   : > { %1260 = vmatpush.bf16.msrb.mxu3 %v3307_v58  ;;  %303 = vst [vmem:[#allocation2 + $0x218] sm:$0x1] %v3569_v1  ;;  %v3375_v4 = vunpack.c.l.bf16 %v3498_v57 }
  0x32   : > { %824 = vmatpush.bf16.msrb.mxu1 %v3283_v6  ;;  %1494 = vmatpush.bf16.msrb.mxu0 %v3315_v7  ;;  %304 = vst [vmem:[#allocation2 + $0x220] sm:$0xff] %v3569_v1  ;;  %v3279_v6 = vld [vmem:[%s4625_s3 + $0x10] sm:$0xff]  ;;  %v3376_v7 = vunpack.c.h.bf16 %v3498_v57 }
  0x33   : > { %305 = vst [vmem:[#allocation2 + $0x228] sm:$0xff] %v3569_v1 }
  0x34   : > { %1027 = vmatpush.bf16.msrb.mxu2 %v3298_v11  ;;  %306 = vst [vmem:[#allocation2 + $0x230] sm:$0xff] %v3569_v1 }
  0x35   : > { %1261 = vmatpush.bf16.msrb.mxu3 %v3306_v12  ;;  %307 = vst [vmem:[#allocation2 + $0x238] sm:$0x1] %v3569_v1  ;;  %v3387_v1 = vunpack.c.l.bf16 %v3501_v35  ;;  %v431_v12 = vadd.f32 %v3642_v8, %v396_v32  ;;  %v3408_v35 = vunpack.c.h.bf16 %v3506_v9 }
  0x36   : > { %825 = vmatpush.bf16.msrb.mxu1 %v3282_v20  ;;  %1495 = vmatpush.bf16.msrb.mxu0 %v3314_v21  ;;  %491 = vst [vmem:[#allocation2 + $0x108] sm:$0xff] %v458_v33  ;;  %v387_v33 = vmul.f32 %v3631_v3, %v3371_v30  ;;  %v438_v20 = vadd.f32 %v3642_v8, %v403_v61 }
  0x37   : > { %492 = vst [vmem:[#allocation2 + $0x110] sm:$0xff] %v459_v34  ;;  %v3355_v34 = vunpack.c.l.bf16 %v3493_v46  ;;  %v395_v58 = vmul.f32 %v3631_v3, %v3387_v1  ;;  %v439_v21 = vadd.f32 %v3642_v8, %v404_v62  ;;  %v390_v30 = vmul.f32 %v3631_v3, %v3376_v7  ;;  %v3324_v7 = vld [vmem:[%s4625_s3 + $0x178] sm:$0xff] }
  0x38   : > { %1028 = vmatpush.bf16.msrb.mxu2 %v3297_v24  ;;  %499 = vst [vmem:[#allocation2 + $0x188] sm:$0xff] %v466_v37  ;;  %v3280_v37 = vld [vmem:[%s4625_s3 + $0x18] sm:$0xff]  ;;  %v3878_v60 = vadd.f32 %v3642_v8, %v387_v33  ;;  %v470_v45 = vmax.f32 %v438_v20, 0.0  ;;  %v406_v53 = vmul.f32 %v3631_v3, %v3408_v35  ;;  %v510_v20 = vld [vmem:[#allocation2 + $0xf] sm:$0xff] }
  0x39   : > { %1262 = vmatpush.bf16.msrb.mxu3 %v3305_v25  ;;  %500 = vst [vmem:[#allocation2 + $0x190] sm:$0xff] %v467_v38  ;;  %v3295_v38 = vld [vmem:[%s4625_s3 + $0x90] sm:$0xff]  ;;  %v379_v0 = vmul.f32 %v3631_v3, %v3355_v34  ;;  %v430_v11 = vadd.f32 %v3642_v8, %v395_v58  ;;  %v415_v25 = vadd.f32 %v3642_v8, %v380_v2  ;;  %v471_v46 = vmax.f32 %v439_v21, 0.0  ;;  %v3309_v34 = vld [vmem:[%s4625_s3 + $0x100] sm:$0xff] }
  0x3a   : > { %826 = vmatpush.bf16.msrb.mxu1 %v3281_v44  ;;  %1496 = vmatpush.bf16.msrb.mxu0 %v3313_v47  ;;  %485 = vst [vmem:[#allocation2 + $0xa8] sm:$0xff] %v452_v22  ;;  %v454_v15 = vmax.f32 %v3878_v60, 0.0  ;;  %v3392_v22 = vunpack.c.h.bf16 %v3502_v63  ;;  %v3301_v44 = vld [vmem:[%s4625_s3 + $0xc0] sm:$0xff]  ;;  %v425_v52 = vadd.f32 %v3642_v8, %v390_v30  ;;  %v441_v62 = vadd.f32 %v3642_v8, %v406_v53  ;;  %v912_v21 = vld [vmem:[#allocation2 + $0x9] sm:$0xff] }
  0x3b   : > { %486 = vst [vmem:[#allocation2 + $0xb0] sm:$0xff] %v453_v23  ;;  %719 = vmatmul.bf16.gmra.mxu1 %v3832_v48  ;;  %739 = vmatmul.bf16.gmra.mxu2 %v3842_v28  ;;  %v3494_v23 = vld [vmem:[%s3626_s27 + $0x10] sm:$0xff]   ;;  %v414_v24 = vadd.f32 %v3642_v8, %v379_v0  ;;  %v619_v32 = vpack.c.bf16 %v471_v46, %v470_v45  ;;  %v464_v63 = vmax.f32 %v432_v55, 0.0 }
  0x3c   : > { %1029 = vmatpush.bf16.msrb.mxu2 %v3296_v50  ;;  %493 = vst [vmem:[#allocation2 + $0x128] sm:$0xff] %v460_v26  ;;  %759 = vmatmul.bf16.gmra.mxu3 %v618_v54  ;;  %v389_v26 = vmul.f32 %v3631_v3, %v3375_v4  ;;  %v398_v47 = vmul.f32 %v3631_v3, %v3392_v22  ;;  %v3360_v1 = vunpack.c.h.bf16 %v3494_v23  ;;  %v447_v50 = vmax.f32 %v415_v25, 0.0  ;;  %v3277_v54 = vld [vmem:[%s4625_s3] sm:$0xff]  ;;  %v913_v22 = vld [vmem:[#allocation2 + $0x11] sm:$0xff] }
  0x3d   : > { %1263 = vmatpush.bf16.msrb.mxu3 %v3304_v51  ;;  %699 = vmatmul.bf16.gmra.mxu0 %v3855_v29  ;;  %494 = vst [vmem:[#allocation2 + $0x130] sm:$0xff] %v461_v27  ;;  %v3407_v27 = vunpack.c.l.bf16 %v3506_v9  ;;  %v446_v49 = vmax.f32 %v414_v24, 0.0  ;;  %v457_v61 = vmax.f32 %v425_v52, 0.0  ;;  %v473_v9 = vmax.f32 %v441_v62, 0.0  ;;  %v3339_v30 = vld [vmem:[%s4625_s3 + $0x1f0] sm:$0xff] }
  0x3e   : > { %827 = vmatpush.bf16.msrb.mxu1 %v3280_v37  ;;  %1497 = vmatpush.bf16.msrb.mxu0 %v3312_v56  ;;  %501 = vst [vmem:[#allocation2 + $0x1a8] sm:$0xff] %v468_v36  ;;  %v3310_v36 = vld [vmem:[%s4625_s3 + $0x108] sm:$0xff]  ;;  %v424_v51 = vadd.f32 %v3642_v8, %v389_v26  ;;  %v3947_v37 = vpack.c.bf16 %v455_v16, %v454_v15  ;;  %v3323_v35 = vld [vmem:[%s4625_s3 + $0x170] sm:$0xff] }
  0x3f   : > { %502 = vst [vmem:[#allocation2 + $0x1b0] sm:$0xff] %v469_v39  ;;  %v462_v39 = vmax.f32 %v430_v11, 0.0  ;;  %v405_v33 = vmul.f32 %v3631_v3, %v3407_v27  ;;  %v433_v57 = vadd.f32 %v3642_v8, %v398_v47  ;;  %v382_v58 = vmul.f32 %v3631_v3, %v3360_v1 }
  0x40   : > { %1030 = vmatpush.bf16.msrb.mxu2 %v3295_v38  ;;  %477 = vst [vmem:[#allocation2 + $0x28] sm:$0xff] %v444_v40  ;;  %v463_v40 = vmax.f32 %v431_v12, 0.0  ;;  %v3953_v38 = vpack.c.bf16 %v447_v50, %v446_v49  ;;  %v944_v26 = vpack.c.bf16 %v913_v22, %v912_v21 }
  0x41   : > { %1264 = vmatpush.bf16.msrb.mxu3 %v3303_v59  ;;  %478 = vst [vmem:[#allocation2 + $0x30] sm:$0xff] %v445_v41  ;;  %v3359_v41 = vunpack.c.l.bf16 %v3494_v23  ;;  %v456_v59 = vmax.f32 %v424_v51, 0.0  ;;  %v440_v60 = vadd.f32 %v3642_v8, %v405_v33  ;;  %v417_v2 = vadd.f32 %v3642_v8, %v382_v58  ;;  %v3322_v51 = vld [vmem:[%s4625_s3 + $0x168] sm:$0xff]  ;;  %v921_v58 = vld [vmem:[#allocation2 + $0x91] sm:$0xff] }
  0x42   : > { %828 = vmatpush.bf16.msrb.mxu1 %v3279_v6  ;;  %1498 = vmatpush.bf16.msrb.mxu0 %v3311_v10  ;;  %487 = vst [vmem:[#allocation2 + $0xc8] sm:$0xff] %v454_v15  ;;  %v3949_v56 = vpack.c.bf16 %v463_v40, %v462_v39  ;;  %v3340_v6 = vld [vmem:[%s4625_s3 + $0x1f8] sm:$0xff]  ;;  %v509_v15 = vld [vmem:[#allocation2 + $0x7] sm:$0xff] }
  0x43   : > { %488 = vst [vmem:[#allocation2 + $0xd0] sm:$0xff] %v455_v16  ;;  %v381_v31 = vmul.f32 %v3631_v3, %v3359_v41  ;;  %v465_v3 = vmax.f32 %v433_v57, 0.0  ;;  %v472_v4 = vmax.f32 %v440_v60, 0.0  ;;  %v449_v11 = vmax.f32 %v417_v2, 0.0  ;;  %v3331_v16 = vld [vmem:[%s4625_s3 + $0x1b0] sm:$0xff]  ;;  %v3346_v33 = vld [vmem:[%s4625_s3 + $0x228] sm:$0xff] }
  0x44   : > { %1031 = vmatpush.bf16.msrb.mxu2 %v3294_v14  ;;  %495 = vst [vmem:[#allocation2 + $0x148] sm:$0xff] %v462_v39  ;;  %v3974_v12 = vpack.c.bf16 %v457_v61, %v456_v59  ;;  %v541_v25 = vpack.c.bf16 %v510_v20, %v509_v15  ;;  %v920_v57 = vld [vmem:[#allocation2 + $0x89] sm:$0xff]  ;;  %v3321_v2 = vld [vmem:[%s4625_s3 + $0x160] sm:$0xff] }
  0x45   : > { %1265 = vmatpush.bf16.msrb.mxu3 %v3302_v19  ;;  %496 = vst [vmem:[#allocation2 + $0x150] sm:$0xff] %v463_v40  ;;  %v416_v0 = vadd.f32 %v3642_v8, %v381_v31  ;;  %v3348_v8 = vld [vmem:[%s4625_s3 + $0x238] sm:$0xff]  ;;  %v3976_v13 = vpack.c.bf16 %v465_v3, %v464_v63  ;;  %v620_v14 = vpack.c.bf16 %v473_v9, %v472_v4 }
  0x46   : > { %829 = vmatpush.bf16.msrb.mxu1 %v3278_v17  ;;  %1499 = vmatpush.bf16.msrb.mxu0 %v3310_v36  ;;  %503 = vst [vmem:[#allocation2 + $0x1c8] sm:$0xff] %v470_v45  ;;  %v3347_v17 = vld [vmem:[%s4625_s3 + $0x230] sm:$0xff] }
  0x47   : > { %504 = vst [vmem:[#allocation2 + $0x1d0] sm:$0xff] %v471_v46  ;;  %v448_v10 = vmax.f32 %v416_v0, 0.0  ;;  %v1146_v23 = vld [vmem:[#allocation2 + $0x27] sm:$0xff] }
  0x48   : > { %1032 = vmatpush.bf16.msrb.mxu2 %v3293_v43  ;;  %479 = vst [vmem:[#allocation2 + $0x48] sm:$0xff] %v446_v49  ;;  %v1147_v24 = vld [vmem:[#allocation2 + $0x2f] sm:$0xff] }
  0x49   : > { %1266 = vmatpush.bf16.msrb.mxu3 %v3301_v44  ;;  %480 = vst [vmem:[#allocation2 + $0x50] sm:$0xff] %v447_v50  ;;  %v608_v19 = vpack.c.bf16 %v449_v11, %v448_v10  ;;  %v1178_v27 = vpack.c.bf16 %v1147_v24, %v1146_v23  ;;  %v915_v36 = vld [vmem:[#allocation2 + $0x31] sm:$0xff]  ;;  %v3330_v49 = vld [vmem:[%s4625_s3 + $0x1a8] sm:$0xff] }
  0x4a   : > { %830 = vmatpush.bf16.msrb.mxu1 %v3277_v54  ;;  %1500 = vmatpush.bf16.msrb.mxu0 %v3309_v34  ;;  %489 = vst [vmem:[#allocation2 + $0xe8] sm:$0xff] %v456_v59  ;;  %v3338_v50 = vld [vmem:[%s4625_s3 + $0x1e8] sm:$0xff]  ;;  %v4020_v59 = vpack.c.bf16 %v921_v58, %v920_v57 }
  0x4b   : > { %724 = vmatmul.bf16.gmra.mxu1 %v3947_v37  ;;  %744 = vmatmul.bf16.gmra.mxu2 %v3949_v56  ;;  %490 = vst [vmem:[#allocation2 + $0xf0] sm:$0xff] %v457_v61  ;;  %v1152_v54 = vld [vmem:[#allocation2 + $0x87] sm:$0xff]  ;;  %v1153_v34 = vld [vmem:[#allocation2 + $0x8f] sm:$0xff] }
  0x4c   : > { %764 = vmatmul.bf16.gmra.mxu3 %v619_v32  ;;  %497 = vst [vmem:[#allocation2 + $0x168] sm:$0xff] %v464_v63  ;;  %1962 = vmatpush.bf16.msra.mxu2 %v3332_v5  ;;  %v1181_v31 = vpack.c.bf16 %v1153_v34, %v1152_v54  ;;  %v1154_v32 = vld [vmem:[#allocation2 + $0xa7] sm:$0xff] }
  0x4d   : > { %704 = vmatmul.bf16.gmra.mxu0 %v3953_v38  ;;  %498 = vst [vmem:[#allocation2 + $0x170] sm:$0xff] %v465_v3  ;;  %2196 = vmatpush.bf16.msra.mxu3 %v3340_v6  ;;  %v3337_v63 = vld [vmem:[%s4625_s3 + $0x1e0] sm:$0xff]  ;;  %v922_v6 = vld [vmem:[#allocation2 + $0xa9] sm:$0xff] }
  0x4e   : > { %505 = vst [vmem:[#allocation2 + $0x1e8] sm:$0xff] %v472_v4  ;;  %1727 = vmatpush.bf16.msra.mxu1 %v3324_v7  ;;  %2430 = vmatpush.bf16.msra.mxu0 %v3348_v8  ;;  %v3345_v5 = vld [vmem:[%s4625_s3 + $0x220] sm:$0xff]  ;;  %v923_v7 = vld [vmem:[#allocation2 + $0xb1] sm:$0xff] }
  0x4f   : > { %506 = vst [vmem:[#allocation2 + $0x1f0] sm:$0xff] %v473_v9  ;;  %v1148_v39 = vld [vmem:[#allocation2 + $0x47] sm:$0xff]  ;;  %v1157_v8 = vld [vmem:[#allocation2 + $0xcf] sm:$0xff] }
  0x50   : > { %481 = vst [vmem:[#allocation2 + $0x68] sm:$0xff] %v448_v10  ;;  %1963 = vmatpush.bf16.msra.mxu2 %v3331_v16  ;;  %v1149_v40 = vld [vmem:[#allocation2 + $0x4f] sm:$0xff]  ;;  %v1156_v9 = vld [vmem:[#allocation2 + $0xc7] sm:$0xff] }
  0x51   : > { %482 = vst [vmem:[#allocation2 + $0x70] sm:$0xff] %v449_v11  ;;  %2197 = vmatpush.bf16.msra.mxu3 %v3339_v30  ;;  %v3995_v41 = vpack.c.bf16 %v1149_v40, %v1148_v39  ;;  %v916_v43 = vld [vmem:[#allocation2 + $0x49] sm:$0xff]  ;;  %v917_v44 = vld [vmem:[#allocation2 + $0x51] sm:$0xff]  ;;  %v1183_v15 = vpack.c.bf16 %v1157_v8, %v1156_v9 }
  0x52   : > { %1728 = vmatpush.bf16.msra.mxu1 %v3323_v35  ;;  %2431 = vmatpush.bf16.msra.mxu0 %v3347_v17  ;;  %v4000_v47 = vpack.c.bf16 %v917_v44, %v916_v43  ;;  %v1159_v16 = vld [vmem:[#allocation2 + $0xef] sm:$0xff]  ;;  %v3328_v39 = vld [vmem:[%s4625_s3 + $0x198] sm:$0xff] }
  0x53   : > { %v3336_v40 = vld [vmem:[%s4625_s3 + $0x1d8] sm:$0xff]  ;;  %v1163_v9 = vld [vmem:[#allocation2 + $0x12f] sm:$0xff] }
  0x54   : > { %1964 = vmatpush.bf16.msra.mxu2 %v3330_v49  ;;  %v926_v49 = vld [vmem:[#allocation2 + $0xe9] sm:$0xff] }
  0x55   : > { %2198 = vmatpush.bf16.msra.mxu3 %v3338_v50  ;;  %v927_v50 = vld [vmem:[#allocation2 + $0xf1] sm:$0xff] }
  0x56   : > { %1729 = vmatpush.bf16.msra.mxu1 %v3322_v51  ;;  %2432 = vmatpush.bf16.msra.mxu0 %v3346_v33  ;;  %v1160_v51 = vld [vmem:[#allocation2 + $0x107] sm:$0xff]  ;;  %v1161_v33 = vld [vmem:[#allocation2 + $0x10f] sm:$0xff] }
  0x57   : > { %v1150_v45 = vld [vmem:[#allocation2 + $0x67] sm:$0xff]  ;;  %v1185_v58 = vpack.c.bf16 %v1161_v33, %v1160_v51 }
  0x58   : > { %v1151_v46 = vld [vmem:[#allocation2 + $0x6f] sm:$0xff] }
  0x59   : > { %v1180_v1 = vpack.c.bf16 %v1151_v46, %v1150_v45  ;;  %v918_v52 = vld [vmem:[#allocation2 + $0x69] sm:$0xff]  ;;  %v919_v53 = vld [vmem:[#allocation2 + $0x71] sm:$0xff]  ;;  %2199 = vmatpush.bf16.msra.mxu3 %v3337_v63 }
  0x5a   : > { %v4016_v55 = vpack.c.bf16 %v919_v53, %v918_v52  ;;  %1730 = vmatpush.bf16.msra.mxu1 %v3321_v2  ;;  %2433 = vmatpush.bf16.msra.mxu0 %v3345_v5  ;;  %v1394_v52 = vld [vmem:[#allocation2 + $0x108] sm:$0xff]  ;;  %v1395_v53 = vld [vmem:[#allocation2 + $0x110] sm:$0xff] }
  0x5b   : > { %729 = vmatmul.bf16.gmra.mxu1 %v3974_v12  ;;  %749 = vmatmul.bf16.gmra.mxu2 %v3976_v13  ;;  %v928_v5 = vld [vmem:[#allocation2 + $0x109] sm:$0xff] }
  0x5c   : > { %769 = vmatmul.bf16.gmra.mxu3 %v620_v14  ;;  %v4052_v14 = vpack.c.bf16 %v923_v7, %v922_v6  ;;  %v929_v6 = vld [vmem:[#allocation2 + $0x111] sm:$0xff]  ;;  %v1162_v7 = vld [vmem:[#allocation2 + $0x127] sm:$0xff] }
  0x5d   : > { %709 = vmatmul.bf16.gmra.mxu0 %v608_v19  ;;  %2200 = vmatpush.bf16.msra.mxu3 %v3336_v40  ;;  %v3335_v40 = vld [vmem:[%s4625_s3 + $0x1d0] sm:$0xff] }
  0x61   : > { %2201 = vmatpush.bf16.msra.mxu3 %v3335_v40 }
  0x6b   : > { %831 = vmatmul.bf16.vlgmr.msrb.gmra.mxu1 %v541_v25  ;;  %1033 = vmatmul.bf16.vlgmr.msrb.gmra.mxu2 %v944_v26  ;;  %v924_v25 = vld [vmem:[#allocation2 + $0xc9] sm:$0xff]  ;;  %v925_v26 = vld [vmem:[#allocation2 + $0xd1] sm:$0xff] }
  0x6c   : > { %1267 = vmatmul.bf16.vlgmr.msrb.gmra.mxu3 %v1178_v27  ;;  %v4072_v17 = vpack.c.bf16 %v925_v26, %v924_v25  ;;  %v4123_v25 = vpack.c.bf16 %v929_v6, %v928_v5  ;;  %v1164_v5 = vld [vmem:[#allocation2 + $0x147] sm:$0xff]  ;;  %v1165_v6 = vld [vmem:[#allocation2 + $0x14f] sm:$0xff] }
  0x6d   : > { %1501 = vmatmul.bf16.vlgmr.msrb.gmra.mxu0 %v3855_v29  ;;  %v914_v29 = vld [vmem:[#allocation2 + $0x29] sm:$0xff] }
  0x6e   : > { %v3993_v18 = vpack.c.bf16 %v915_v36, %v914_v29 }
  0x7b   : > { %836 = vmatmul.bf16.gmra.mxu1 %v1178_v27  ;;  %1038 = vmatmul.bf16.gmra.mxu2 %v3993_v18  ;;  %v1158_v27 = vld [vmem:[#allocation2 + $0xe7] sm:$0xff] }
  0x7c   : > { %1272 = vmatmul.bf16.gmra.mxu3 %v3995_v41 }
  0x7d   : > { %1506 = vmatmul.bf16.gmra.mxu0 %v3953_v38  ;;  %v1155_v38 = vld [vmem:[#allocation2 + $0xaf] sm:$0xff] }
  0x7e   : > { %v1182_v61 = vpack.c.bf16 %v1155_v38, %v1154_v32  ;;  %v1419_v32 = vpack.c.bf16 %v1395_v53, %v1394_v52  ;;  %v3343_v52 = vld [vmem:[%s4625_s3 + $0x210] sm:$0xff] }
  0x8b   : > { %841 = vmatmul.bf16.gmra.mxu1 %v3995_v41  ;;  %1043 = vmatmul.bf16.gmra.mxu2 %v4000_v47 }
  0x8c   : > { %1277 = vmatmul.bf16.gmra.mxu3 %v1180_v1 }
  0x8d   : > { %1511 = vmatmul.bf16.gmra.mxu0 %v608_v19 }
  0x9b   : > { %846 = vmatmul.bf16.gmra.mxu1 %v1180_v1  ;;  %1048 = vmatmul.bf16.gmra.mxu2 %v4016_v55  ;;  %v3344_v1 = vld [vmem:[%s4625_s3 + $0x218] sm:$0xff] }
  0x9c   : > { %1282 = vmatmul.bf16.gmra.mxu3 %v1181_v31  ;;  %2434 = vmatpush.bf16.msra.mxu0 %v3344_v1 }
  0x9d   : > { %1516 = vmatmul.bf16.gmra.mxu0 %v3711_v42  ;;  %v3329_v42 = vld [vmem:[%s4625_s3 + $0x1a0] sm:$0xff] }
  0x9e   : > { %1965 = vmatpush.bf16.msra.mxu2 %v3329_v42 }
  0xa0   : > { %2435 = vmatpush.bf16.msra.mxu0 %v3343_v52 }
  0xa2   : > { %1966 = vmatpush.bf16.msra.mxu2 %v3328_v39  ;;  %v3327_v39 = vld [vmem:[%s4625_s3 + $0x190] sm:$0xff] }
  0xa6   : > { %1967 = vmatpush.bf16.msra.mxu2 %v3327_v39  ;;  %v4145_v39 = vpack.c.bf16 %v1165_v6, %v1164_v5  ;;  %v1166_v5 = vld [vmem:[#allocation2 + $0x167] sm:$0xff]  ;;  %v1167_v6 = vld [vmem:[#allocation2 + $0x16f] sm:$0xff] }
  0xa8   : > { %v4022_v60 = vpop.f32.mrf.mxu1 }
  0xaa   : > { %v4024_v62 = vpop.f32.mrf.mxu0 }
  0xab   : > { %851 = vmatmul.bf16.gmra.mxu1 %v1181_v31  ;;  %1053 = vmatmul.bf16.gmra.mxu2 %v4020_v59  ;;  %v4104_v31 = vpack.c.bf16 %v927_v50, %v926_v49 }
  0xac   : > { %1287 = vmatmul.bf16.gmra.mxu3 %v1182_v61 }
  0xad   : > { %1521 = vmatmul.bf16.gmra.mxu0 %v3832_v48 }
  0xae   : > { %v4034_v0 = vpop.f32.mrf.mxu2 }
  0xaf   : > { %v4036_v3 = vpop.f32.mrf.mxu3 }
  0xb0   : > { %v4041_v4 = vpop.f32.mrf.mxu1 }
  0xb2   : > { %v4043_v48 = vpop.f32.mrf.mxu0 }
  0xb6   : > { %v4048_v10 = vpop.f32.mrf.mxu2 }
  0xb7   : > { %v4050_v11 = vpop.f32.mrf.mxu3 }
  0xb8   : > { %v4054_v19 = vpop.f32.mrf.mxu1 }
  0xba   : > { %v4056_v20 = vpop.f32.mrf.mxu0 }
  0xbb   : > { %856 = vmatmul.bf16.gmra.mxu1 %v1182_v61  ;;  %1058 = vmatmul.bf16.gmra.mxu2 %v4052_v14 }
  0xbc   : > { %1292 = vmatmul.bf16.gmra.mxu3 %v1183_v15 }
  0xbd   : > { %1526 = vmatmul.bf16.gmra.mxu0 %v3947_v37  ;;  %v1184_v37 = vpack.c.bf16 %v1159_v16, %v1158_v27  ;;  %v1186_v27 = vpack.c.bf16 %v1163_v9, %v1162_v7 }
  0xbe   : > { %v4060_v21 = vpop.f32.mrf.mxu2 }
  0xbf   : > { %v4062_v22 = vpop.f32.mrf.mxu3 }
  0xc0   : > { %v4064_v23 = vpop.f32.mrf.mxu1 }
  0xc2   : > { %v4066_v24 = vpop.f32.mrf.mxu0 }
  0xc6   : > { %v4068_v30 = vpop.f32.mrf.mxu2 }
  0xc7   : > { %v4070_v35 = vpop.f32.mrf.mxu3 }
  0xc8   : > { %v4074_v29 = vpop.f32.mrf.mxu1 }
  0xca   : > { %v4076_v36 = vpop.f32.mrf.mxu0 }
  0xcb   : > { %861 = vmatmul.bf16.gmra.mxu1 %v1183_v15  ;;  %1063 = vmatmul.bf16.gmra.mxu2 %v4072_v17 }
  0xcc   : > { %1297 = vmatmul.bf16.gmra.mxu3 %v1184_v37 }
  0xcd   : > { %1531 = vmatmul.bf16.gmra.mxu0 %v3974_v12  ;;  %v3320_v12 = vld [vmem:[%s4625_s3 + $0x158] sm:$0xff] }
  0xce   : > { %v4086_v43 = vpop.f32.mrf.mxu2  ;;  %1731 = vmatpush.bf16.msra.mxu1 %v3320_v12 }
  0xcf   : > { %v4088_v44 = vpop.f32.mrf.mxu3 }
  0xd0   : > { %v4090_v45 = vpop.f32.mrf.mxu1 }
  0xd2   : > { %v4092_v46 = vpop.f32.mrf.mxu0 }
  0xd6   : > { %v4100_v54 = vpop.f32.mrf.mxu2 }
  0xd7   : > { %v4102_v34 = vpop.f32.mrf.mxu3 }
  0xd8   : > { %v4106_v57 = vpop.f32.mrf.mxu1 }
  0xda   : > { %v4108_v38 = vpop.f32.mrf.mxu0 }
  0xdb   : > { %866 = vmatmul.bf16.gmra.mxu1 %v1184_v37  ;;  %1068 = vmatmul.bf16.gmra.mxu2 %v4104_v31 }
  0xdc   : > { %1302 = vmatmul.bf16.gmra.mxu3 %v1185_v58 }
  0xdd   : > { %1536 = vmatmul.bf16.gmra.mxu0 %v1419_v32  ;;  %v931_v32 = vld [vmem:[#allocation2 + $0x131] sm:$0xff] }
  0xde   : > { %v4111_v61 = vpop.f32.mrf.mxu2 }
  0xdf   : > { %v4113_v42 = vpop.f32.mrf.mxu3 }
  0xe0   : > { %v4115_v63 = vpop.f32.mrf.mxu1 }
  0xe2   : > { %v4117_v2 = vpop.f32.mrf.mxu0 }
  0xe6   : > { %v4119_v8 = vpop.f32.mrf.mxu2 }
  0xe7   : > { %v4121_v15 = vpop.f32.mrf.mxu3 }
  0xe8   : > { %v832_v26 = vpop.f32.mrf.mxu1 }
  0xe9   : > { %v833_v16 = vadd.f32 %v832_v26, %v4024_v62 }
  0xea   : > { %v1502_v37 = vpop.f32.mrf.mxu0 }
  0xeb   : > { %871 = vmatmul.bf16.gmra.mxu1 %v1185_v58  ;;  %1073 = vmatmul.bf16.gmra.mxu2 %v4123_v25  ;;  %v930_v58 = vld [vmem:[#allocation2 + $0x129] sm:$0xff] }
  0xec   : > { %1307 = vmatmul.bf16.gmra.mxu3 %v1186_v27  ;;  %v4143_v26 = vpack.c.bf16 %v931_v32, %v930_v58 }
  0xed   : > { %1541 = vmatmul.bf16.gmra.mxu0 %v3842_v28  ;;  %v3319_v28 = vld [vmem:[%s4625_s3 + $0x150] sm:$0xff] }
  0xee   : > { %v1034_v12 = vpop.f32.mrf.mxu2  ;;  %1732 = vmatpush.bf16.msra.mxu1 %v3319_v28 }
  0xef   : > { %v1114_v1 = vadd.f32 %v1034_v12, %v833_v16  ;;  %v1268_v62 = vpop.f32.mrf.mxu3 }
  0xf0   : > { %v834_v49 = vpop.f32.mrf.mxu1 }
  0xf1   : > { %v1348_v50 = vadd.f32 %v1268_v62, %v1114_v1  ;;  %v835_v51 = vadd.f32 %v834_v49, %v4043_v48 }
  0xf2   : > { %v1504_v33 = vpop.f32.mrf.mxu0 }
  0xf3   : > { %v4141_v53 = vadd.f32 %v1502_v37, %v1348_v50 }
  0xf6   : > { %v1036_v7 = vpop.f32.mrf.mxu2 }
  0xf7   : > { %v1115_v9 = vadd.f32 %v1036_v7, %v835_v51  ;;  %v1270_v48 = vpop.f32.mrf.mxu3 }
  0xf8   : > { %v837_v16 = vpop.f32.mrf.mxu1 }
  0xf9   : > { %v1349_v40 = vadd.f32 %v1270_v48, %v1115_v9  ;;  %v838_v12 = vadd.f32 %v837_v16, %v4056_v20  ;;  %v932_v20 = vld [vmem:[#allocation2 + $0x149] sm:$0xff]  ;;  %v1188_v16 = vpack.c.bf16 %v1167_v6, %v1166_v5 }
  0xfa   : > { %v1507_v1 = vpop.f32.mrf.mxu0  ;;  %v934_v6 = vld [vmem:[#allocation2 + $0x169] sm:$0xff] }
  0xfb   : > { %876 = vmatmul.bf16.gmra.mxu1 %v1186_v27  ;;  %1078 = vmatmul.bf16.gmra.mxu2 %v4143_v26  ;;  %v4149_v37 = vadd.f32 %v1504_v33, %v1349_v40  ;;  %v933_v27 = vld [vmem:[#allocation2 + $0x151] sm:$0xff] }
  0xfc   : > { %1312 = vmatmul.bf16.gmra.mxu3 %v4145_v39  ;;  %v4156_v48 = vpack.c.bf16 %v933_v27, %v932_v20  ;;  %v3342_v27 = vld [vmem:[%s4625_s3 + $0x208] sm:$0xff] }
  0xfd   : > { %1546 = vmatmul.bf16.gmra.mxu0 %v3949_v56 }
  0xfe   : > { %v1039_v62 = vpop.f32.mrf.mxu2  ;;  %2436 = vmatpush.bf16.msra.mxu0 %v3342_v27 }
  0xff   : > { %v1116_v49 = vadd.f32 %v1039_v62, %v838_v12  ;;  %v1273_v50 = vpop.f32.mrf.mxu3 }
 0x100   : > { %v839_v51 = vpop.f32.mrf.mxu1 }
 0x101   : > { %v1350_v28 = vadd.f32 %v1273_v50, %v1116_v49  ;;  %v840_v52 = vadd.f32 %v839_v51, %v4066_v24  ;;  %v3334_v49 = vld [vmem:[%s4625_s3 + $0x1c8] sm:$0xff] }
 0x102   : > { %v1509_v58 = vpop.f32.mrf.mxu0  ;;  %2202 = vmatpush.bf16.msra.mxu3 %v3334_v49 }
 0x103   : > { %v4154_v32 = vadd.f32 %v1507_v1, %v1350_v28  ;;  %v3326_v1 = vld [vmem:[%s4625_s3 + $0x188] sm:$0xff] }
 0x104   : > { %1968 = vmatpush.bf16.msra.mxu2 %v3326_v1 }
 0x106   : > { %v1041_v33 = vpop.f32.mrf.mxu2 }
 0x107   : > { %v1117_v7 = vadd.f32 %v1041_v33, %v840_v52  ;;  %v1275_v9 = vpop.f32.mrf.mxu3  ;;  %v935_v33 = vld [vmem:[#allocation2 + $0x171] sm:$0xff] }
 0x108   : > { %v842_v56 = vpop.f32.mrf.mxu1  ;;  %v4179_v49 = vpack.c.bf16 %v935_v33, %v934_v6 }
 0x109   : > { %v1351_v40 = vadd.f32 %v1275_v9, %v1117_v7  ;;  %v843_v12 = vadd.f32 %v842_v56, %v4076_v36  ;;  %v1168_v7 = vld [vmem:[#allocation2 + $0x187] sm:$0xff]  ;;  %v1169_v9 = vld [vmem:[#allocation2 + $0x18f] sm:$0xff] }
 0x10a   : > { %v1512_v62 = vpop.f32.mrf.mxu0  ;;  %v1402_v56 = vld [vmem:[#allocation2 + $0x188] sm:$0xff] }
 0x10b   : > { %881 = vmatmul.bf16.gmra.mxu1 %v4145_v39  ;;  %1083 = vmatmul.bf16.gmra.mxu2 %v4156_v48  ;;  %v4161_v24 = vadd.f32 %v1509_v58, %v1351_v40  ;;  %v1403_v40 = vld [vmem:[#allocation2 + $0x190] sm:$0xff] }
 0x10c   : > { %1317 = vmatmul.bf16.gmra.mxu3 %v1188_v16 }
 0x10d   : > { %1551 = vmatmul.bf16.gmra.mxu0 %v3976_v13  ;;  %v3318_v13 = vld [vmem:[%s4625_s3 + $0x148] sm:$0xff] }
 0x10e   : > { %v1044_v50 = vpop.f32.mrf.mxu2  ;;  %1733 = vmatpush.bf16.msra.mxu1 %v3318_v13 }
 0x10f   : > { %v1118_v36 = vadd.f32 %v1044_v50, %v843_v12  ;;  %v1278_v51 = vpop.f32.mrf.mxu3 }
 0x110   : > { %v844_v28 = vpop.f32.mrf.mxu1 }
 0x111   : > { %v1352_v52 = vadd.f32 %v1278_v51, %v1118_v36  ;;  %v845_v58 = vadd.f32 %v844_v28, %v4092_v46  ;;  %v4181_v36 = vpack.c.bf16 %v1169_v9, %v1168_v7  ;;  %v4183_v51 = vpack.c.bf16 %v1403_v40, %v1402_v56 }
 0x112   : > { %v1514_v20 = vpop.f32.mrf.mxu0 }
 0x113   : > { %v4177_v5 = vadd.f32 %v1512_v62, %v1352_v52 }
 0x115   : > { %4635 = vst [vmem:[#allocation3_spill] sm:$0xff] %v4177_v5 }
 0x116   : > { %v1046_v46 = vpop.f32.mrf.mxu2 }
 0x117   : > { %v1119_v12 = vadd.f32 %v1046_v46, %v845_v58  ;;  %v1280_v1 = vpop.f32.mrf.mxu3  ;;  %v1170_v46 = vld [vmem:[#allocation2 + $0x1a7] sm:$0xff] }
 0x118   : > { %v847_v50 = vpop.f32.mrf.mxu1 }
 0x119   : > { %v1353_v28 = vadd.f32 %v1280_v1, %v1119_v12  ;;  %v848_v62 = vadd.f32 %v847_v50, %v4108_v38  ;;  %v936_v38 = vld [vmem:[#allocation2 + $0x189] sm:$0xff] }
 0x11a   : > { %v1517_v52 = vpop.f32.mrf.mxu0  ;;  %v1404_v12 = vld [vmem:[#allocation2 + $0x1a8] sm:$0xff]  ;;  %v1405_v1 = vld [vmem:[#allocation2 + $0x1b0] sm:$0xff] }
 0x11b   : > { %886 = vmatmul.bf16.gmra.mxu1 %v1188_v16  ;;  %1088 = vmatmul.bf16.gmra.mxu2 %v4179_v49  ;;  %v4187_v13 = vadd.f32 %v1514_v20, %v1353_v28  ;;  %v937_v16 = vld [vmem:[#allocation2 + $0x191] sm:$0xff] }
 0x11c   : > { %1322 = vmatmul.bf16.gmra.mxu3 %v4181_v36  ;;  %v1171_v20 = vld [vmem:[#allocation2 + $0x1af] sm:$0xff]  ;;  %v4194_v5 = vpack.c.bf16 %v937_v16, %v936_v38  ;;  %v3558_v16 = vld [vmem:[%s4623_s1] ss:$0 sm:$0xff] }
 0x11d   : > { %4636 = vst [vmem:[#allocation4_spill] sm:$0xff] %v4187_v13  ;;  %1556 = vmatmul.bf16.gmra.mxu0 %v4183_v51 }
 0x11e   : > { %v1049_v58 = vpop.f32.mrf.mxu2  ;;  %4638 = vst [vmem:[#allocation6_spill] sm:$0xff] %v4194_v5 }
 0x11f   : > { %v1120_v27 = vadd.f32 %v1049_v58, %v848_v62  ;;  %v1283_v6 = vpop.f32.mrf.mxu3  ;;  %v1190_v58 = vpack.c.bf16 %v1171_v20, %v1170_v46 }
 0x120   : > { %v849_v33 = vpop.f32.mrf.mxu1 }
 0x121   : > { %v1354_v7 = vadd.f32 %v1283_v6, %v1120_v27  ;;  %v850_v9 = vadd.f32 %v849_v33, %v4117_v2  ;;  %v4196_v27 = vpack.c.bf16 %v1405_v1, %v1404_v12 }
 0x122   : > { %v1519_v56 = vpop.f32.mrf.mxu0 }
 0x123   : > { %v4192_v40 = vadd.f32 %v1517_v52, %v1354_v7  ;;  %4639 = vst [vmem:[#allocation7_spill] sm:$0xff] %v4196_v27  ;;  %v3507_v52 = vld [vmem:[%s3626_s27 + $0x78] sm:$0xff]  }
 0x124   : > { %v3411_v33 = vunpack.c.l.bf16 %v3507_v52  ;;  %v3412_v7 = vunpack.c.h.bf16 %v3507_v52 }
 0x125   : > { %4637 = vst [vmem:[#allocation5_spill] sm:$0xff] %v4192_v40 }
 0x126   : > { %v1051_v50 = vpop.f32.mrf.mxu2  ;;  %v407_v46 = vmul.f32 %v3558_v16, %v3411_v33  ;;  %v3317_v33 = vld [vmem:[%s4625_s3 + $0x140] sm:$0xff] }
 0x127   : > { %v1121_v28 = vadd.f32 %v1051_v50, %v850_v9  ;;  %v1285_v13 = vpop.f32.mrf.mxu3  ;;  %v3325_v9 = vld [vmem:[%s4625_s3 + $0x180] sm:$0xff]  ;;  %1734 = vmatpush.bf16.msra.mxu1 %v3317_v33 }
 0x128   : > { %v852_v62 = vpop.f32.mrf.mxu1  ;;  %1969 = vmatpush.bf16.msra.mxu2 %v3325_v9  ;;  %v3559_v50 = vld [vmem:[%s4624_s2] ss:$0 sm:$0xff] }
 0x129   : > { %v1355_v2 = vadd.f32 %v1285_v13, %v1121_v28  ;;  %v3333_v13 = vld [vmem:[%s4625_s3 + $0x1c0] sm:$0xff]  ;;  %v853_v38 = vadd.f32 %v852_v62, %v4022_v60  ;;  %v4217_v28 = vadd.f32 %v3559_v50, %v407_v46  ;;  %v939_v46 = vld [vmem:[#allocation2 + $0x1b1] sm:$0xff] }
 0x12a   : > { %v1522_v6 = vpop.f32.mrf.mxu0  ;;  %2203 = vmatpush.bf16.msra.mxu3 %v3333_v13 }
 0x12b   : > { %891 = vmatmul.bf16.gmra.mxu1 %v4181_v36  ;;  %1093 = vmatmul.bf16.gmra.mxu2 %v4194_v5  ;;  %v4201_v40 = vadd.f32 %v1519_v56, %v1355_v2  ;;  %v408_v56 = vmul.f32 %v3558_v16, %v3412_v7  ;;  %v3341_v7 = vld [vmem:[%s4625_s3 + $0x200] sm:$0xff]  ;;  %v4630_v9 = vmax.f32 %v4217_v28, 0.0  ;;  %v938_v16 = vld [vmem:[#allocation2 + $0x1a9] sm:$0xff] }
 0x12c   : > { %1327 = vmatmul.bf16.gmra.mxu3 %v1190_v58  ;;  %2437 = vmatpush.bf16.msra.mxu0 %v3341_v7  ;;  %v4236_v7 = vpack.c.bf16 %v939_v46, %v938_v16 }
 0x12d   : > { %4640 = vst [vmem:[#allocation8_spill] sm:$0xff] %v4201_v40  ;;  %1561 = vmatmul.bf16.gmra.mxu0 %v4196_v27  ;;  %v4219_v2 = vadd.f32 %v3559_v50, %v408_v56  ;;  %v1172_v56 = vld [vmem:[#allocation2 + $0x1c7] sm:$0xff]  ;;  %v1407_v50 = vld [vmem:[#allocation2 + $0x1d0] sm:$0xff] }
 0x12e   : > { %v1054_v20 = vpop.f32.mrf.mxu2  ;;  %507 = vst [vmem:[#allocation2 + $0x208] sm:$0xff] %v4630_v9 }
 0x12f   : > { %v1122_v12 = vadd.f32 %v1054_v20, %v853_v38  ;;  %v1288_v1 = vpop.f32.mrf.mxu3  ;;  %v4631_v13 = vmax.f32 %v4219_v2, 0.0  ;;  %4642 = vst [vmem:[#allocation10_spill] sm:$0xff] %v4236_v7 }
 0x130   : > { %v854_v60 = vpop.f32.mrf.mxu1 }
 0x131   : > { %v1356_v62 = vadd.f32 %v1288_v1, %v1122_v12  ;;  %508 = vst [vmem:[#allocation2 + $0x210] sm:$0xff] %v4631_v13  ;;  %v855_v20 = vadd.f32 %v854_v60, %v4041_v4  ;;  %v1173_v12 = vld [vmem:[#allocation2 + $0x1cf] sm:$0xff] }
 0x132   : > { %v1524_v52 = vpop.f32.mrf.mxu0  ;;  %v1406_v1 = vld [vmem:[#allocation2 + $0x1c8] sm:$0xff]  ;;  %v4238_v9 = vpack.c.bf16 %v1173_v12, %v1172_v56 }
 0x133   : > { %v4231_v38 = vadd.f32 %v1522_v6, %v1356_v62  ;;  %v4240_v6 = vpack.c.bf16 %v1407_v50, %v1406_v1  ;;  %v1174_v1 = vld [vmem:[#allocation2 + $0x1e7] sm:$0xff]  ;;  %v1175_v50 = vld [vmem:[#allocation2 + $0x1ef] sm:$0xff] }
 0x135   : > { %4641 = vst [vmem:[#allocation9_spill] sm:$0xff] %v4231_v38 }
 0x136   : > { %v1056_v40 = vpop.f32.mrf.mxu2  ;;  %4643 = vst [vmem:[#allocation11_spill] sm:$0xff] %v4240_v6 }
 0x137   : > { %v1123_v27 = vadd.f32 %v1056_v40, %v855_v20  ;;  %v1290_v33 = vpop.f32.mrf.mxu3 }
 0x138   : > { %v857_v5 = vpop.f32.mrf.mxu1 }
 0x139   : > { %v1357_v62 = vadd.f32 %v1290_v33, %v1123_v27  ;;  %v858_v4 = vadd.f32 %v857_v5, %v4054_v19  ;;  %v940_v27 = vld [vmem:[#allocation2 + $0x1c9] sm:$0xff] }
 0x13a   : > { %v1527_v38 = vpop.f32.mrf.mxu0  ;;  %v1408_v33 = vld [vmem:[#allocation2 + $0x1e8] sm:$0xff] }
 0x13b   : > { %896 = vmatmul.bf16.gmra.mxu1 %v1190_v58  ;;  %1098 = vmatmul.bf16.gmra.mxu2 %v4236_v7  ;;  %v4243_v13 = vadd.f32 %v1524_v52, %v1357_v62  ;;  %v941_v58 = vld [vmem:[#allocation2 + $0x1d1] sm:$0xff] }
 0x13c   : > { %1332 = vmatmul.bf16.gmra.mxu3 %v4238_v9  ;;  %v1409_v62 = vld [vmem:[#allocation2 + $0x1f0] sm:$0xff]  ;;  %v4251_v19 = vpack.c.bf16 %v941_v58, %v940_v27 }
 0x13d   : > { %4644 = vst [vmem:[#allocation12_spill] sm:$0xff] %v4243_v13  ;;  %1566 = vmatmul.bf16.gmra.mxu0 %v4240_v6 }
 0x13e   : > { %v1059_v40 = vpop.f32.mrf.mxu2 }
 0x13f   : > { %v1124_v60 = vadd.f32 %v1059_v40, %v858_v4  ;;  %v1293_v16 = vpop.f32.mrf.mxu3  ;;  %v1192_v4 = vpack.c.bf16 %v1175_v50, %v1174_v1  ;;  %v4253_v40 = vpack.c.bf16 %v1409_v62, %v1408_v33  ;;  %v1176_v33 = vld [vmem:[#allocation2 + $0x207] sm:$0xff] }
 0x140   : > { %v859_v46 = vpop.f32.mrf.mxu1 }
 0x141   : > { %v1358_v56 = vadd.f32 %v1293_v16, %v1124_v60  ;;  %v860_v52 = vadd.f32 %v859_v46, %v4064_v23 }
 0x142   : > { %v1529_v20 = vpop.f32.mrf.mxu0 }
 0x143   : > { %v4248_v12 = vadd.f32 %v1527_v38, %v1358_v56 }
 0x145   : > { %4645 = vst [vmem:[#allocation13_spill] sm:$0xff] %v4248_v12 }
 0x146   : > { %v1061_v13 = vpop.f32.mrf.mxu2 }
 0x147   : > { %v1125_v6 = vadd.f32 %v1061_v13, %v860_v52  ;;  %v1295_v7 = vpop.f32.mrf.mxu3 }
 0x148   : > { %v862_v5 = vpop.f32.mrf.mxu1 }
 0x149   : > { %v1359_v60 = vadd.f32 %v1295_v7, %v1125_v6  ;;  %v863_v23 = vadd.f32 %v862_v5, %v4074_v29  ;;  %v942_v7 = vld [vmem:[#allocation2 + $0x1e9] sm:$0xff]  ;;  %v943_v6 = vld [vmem:[#allocation2 + $0x1f1] sm:$0xff] }
 0x14a   : > { %v1532_v38 = vpop.f32.mrf.mxu0  ;;  %v4264_v12 = vpack.c.bf16 %v943_v6, %v942_v7 }
 0x14b   : > { %901 = vmatmul.bf16.gmra.mxu1 %v4238_v9  ;;  %1103 = vmatmul.bf16.gmra.mxu2 %v4251_v19  ;;  %v4257_v16 = vadd.f32 %v1529_v20, %v1359_v60  ;;  %v1177_v20 = vld [vmem:[#allocation2 + $0x20f] sm:$0xff] }
 0x14c   : > { %1337 = vmatmul.bf16.gmra.mxu3 %v1192_v4  ;;  %v4266_v5 = vpack.c.bf16 %v1177_v20, %v1176_v33  ;;  %v2084_v20 = vld [vmem:[#allocation2 + $0x50] sm:$0xff] }
 0x14d   : > { %4646 = vst [vmem:[#allocation14_spill] sm:$0xff] %v4257_v16  ;;  %1571 = vmatmul.bf16.gmra.mxu0 %v4253_v40 }
 0x14e   : > { %v1064_v13 = vpop.f32.mrf.mxu2 }
 0x14f   : > { %v1126_v46 = vadd.f32 %v1064_v13, %v863_v23  ;;  %v1298_v56 = vpop.f32.mrf.mxu3  ;;  %v4647_v23 = vmax.f32 %v4217_v28, 0.0  ;;  %v4648_v13 = vmax.f32 %v4219_v2, 0.0 }
 0x150   : > { %v864_v27 = vpop.f32.mrf.mxu1 }
 0x151   : > { %v1360_v58 = vadd.f32 %v1298_v56, %v1126_v46  ;;  %v865_v50 = vadd.f32 %v864_v27, %v4090_v45 }
 0x152   : > { %v1534_v1 = vpop.f32.mrf.mxu0 }
 0x153   : > { %v4261_v52 = vadd.f32 %v1532_v38, %v1360_v58  ;;  %v4272_v38 = vpack.c.bf16 %v4648_v13, %v4647_v23 }
 0x156   : > { %v1066_v62 = vpop.f32.mrf.mxu2 }
 0x157   : > { %v1127_v60 = vadd.f32 %v1066_v62, %v865_v50  ;;  %v1300_v16 = vpop.f32.mrf.mxu3 }
 0x158   : > { %v867_v29 = vpop.f32.mrf.mxu1 }
 0x159   : > { %v1361_v46 = vadd.f32 %v1300_v16, %v1127_v60  ;;  %v868_v27 = vadd.f32 %v867_v29, %v4106_v57  ;;  %v2083_v16 = vld [vmem:[#allocation2 + $0x48] sm:$0xff] }
 0x15a   : > { %v1537_v56 = vpop.f32.mrf.mxu0  ;;  %v2115_v13 = vpack.c.bf16 %v2084_v20, %v2083_v16  ;;  %v1852_v16 = vld [vmem:[#allocation2 + $0x6f] sm:$0xff] }
 0x15b   : > { %906 = vmatmul.bf16.gmra.mxu1 %v1192_v4  ;;  %1108 = vmatmul.bf16.gmra.mxu2 %v4264_v12  ;;  %v4275_v45 = vadd.f32 %v1534_v1, %v1361_v46  ;;  %v2086_v20 = vld [vmem:[#allocation2 + $0x70] sm:$0xff] }
 0x15c   : > { %1342 = vmatmul.bf16.gmra.mxu3 %v4266_v5 }
 0x15d   : > { %4649 = vst [vmem:[#allocation15_spill] sm:$0xff] %v4275_v45  ;;  %1576 = vmatmul.bf16.gmra.mxu0 %v4272_v38 }
 0x15e   : > { %v1069_v58 = vpop.f32.mrf.mxu2 }
 0x15f   : > { %v1128_v7 = vadd.f32 %v1069_v58, %v868_v27  ;;  %v1303_v28 = vpop.f32.mrf.mxu3 }
 0x160   : > { %v869_v6 = vpop.f32.mrf.mxu1 }
 0x161   : > { %v1362_v2 = vadd.f32 %v1303_v28, %v1128_v7  ;;  %v870_v4 = vadd.f32 %v869_v6, %v4115_v63  ;;  %v1616_v6 = vld [vmem:[#allocation2 + $0x49] sm:$0xff] }
 0x162   : > { %v1539_v50 = vpop.f32.mrf.mxu0 }
 0x163   : > { %v4280_v33 = vadd.f32 %v1537_v56, %v1362_v2 }
 0x166   : > { %v1071_v1 = vpop.f32.mrf.mxu2 }
 0x167   : > { %v1129_v62 = vadd.f32 %v1071_v1, %v870_v4  ;;  %v1305_v60 = vpop.f32.mrf.mxu3  ;;  %v1617_v4 = vld [vmem:[#allocation2 + $0x51] sm:$0xff] }
 0x168   : > { %v872_v23 = vpop.f32.mrf.mxu1 }
 0x169   : > { %v1363_v46 = vadd.f32 %v1305_v60, %v1129_v62  ;;  %v873_v63 = vadd.f32 %v872_v23, %v4034_v0  ;;  %v1647_v0 = vpack.c.bf16 %v1617_v4, %v1616_v6  ;;  %v1618_v4 = vld [vmem:[#allocation2 + $0x69] sm:$0xff] }
 0x16a   : > { %v1542_v45 = vpop.f32.mrf.mxu0 }
 0x16b   : > { %1735 = vmatmul.bf16.vlgmr.msra.gmra.mxu1 %v3993_v18  ;;  %1970 = vmatmul.bf16.vlgmr.msra.gmra.mxu2 %v3995_v41  ;;  %v4285_v57 = vadd.f32 %v1539_v50, %v1363_v46  ;;  %v1851_v18 = vld [vmem:[#allocation2 + $0x67] sm:$0xff] }
 0x16c   : > { %2204 = vmatmul.bf16.vlgmr.msra.gmra.mxu3 %v2115_v13  ;;  %v2085_v50 = vld [vmem:[#allocation2 + $0x68] sm:$0xff]  ;;  %v1882_v60 = vpack.c.bf16 %v1852_v16, %v1851_v18  ;;  %v1619_v16 = vld [vmem:[#allocation2 + $0x71] sm:$0xff] }
 0x16d   : > { %2438 = vmatmul.bf16.vlgmr.msra.gmra.mxu0 %v4000_v47  ;;  %v2116_v13 = vpack.c.bf16 %v2086_v20, %v2085_v50  ;;  %v1854_v50 = vld [vmem:[#allocation2 + $0x8f] sm:$0xff] }
 0x16e   : > { %v1074_v29 = vpop.f32.mrf.mxu2  ;;  %v2087_v20 = vld [vmem:[#allocation2 + $0x88] sm:$0xff] }
 0x16f   : > { %v1130_v56 = vadd.f32 %v1074_v29, %v873_v63  ;;  %v1308_v27 = vpop.f32.mrf.mxu3 }
 0x170   : > { %v874_v58 = vpop.f32.mrf.mxu1 }
 0x171   : > { %v1364_v7 = vadd.f32 %v1308_v27, %v1130_v56  ;;  %v875_v41 = vadd.f32 %v874_v58, %v4048_v10 }
 0x172   : > { %v1544_v28 = vpop.f32.mrf.mxu0 }
 0x173   : > { %v4289_v2 = vadd.f32 %v1542_v45, %v1364_v7 }
 0x176   : > { %v1076_v1 = vpop.f32.mrf.mxu2 }
 0x177   : > { %v1131_v47 = vadd.f32 %v1076_v1, %v875_v41  ;;  %v1310_v62 = vpop.f32.mrf.mxu3  ;;  %v1853_v41 = vld [vmem:[#allocation2 + $0x87] sm:$0xff]  ;;  %v2088_v1 = vld [vmem:[#allocation2 + $0x90] sm:$0xff] }
 0x178   : > { %v877_v23 = vpop.f32.mrf.mxu1 }
 0x179   : > { %v1365_v46 = vadd.f32 %v1310_v62, %v1131_v47  ;;  %v878_v10 = vadd.f32 %v877_v23, %v4060_v21  ;;  %v1648_v21 = vpack.c.bf16 %v1619_v16, %v1618_v4  ;;  %v2117_v23 = vpack.c.bf16 %v2088_v1, %v2087_v20  ;;  %v1620_v4 = vld [vmem:[#allocation2 + $0x89] sm:$0xff] }
 0x17a   : > { %v1547_v63 = vpop.f32.mrf.mxu0  ;;  %v2089_v20 = vld [vmem:[#allocation2 + $0xa8] sm:$0xff]  ;;  %v2090_v1 = vld [vmem:[#allocation2 + $0xb0] sm:$0xff] }
 0x17b   : > { %1740 = vmatmul.bf16.gmra.mxu1 %v1647_v0  ;;  %1975 = vmatmul.bf16.gmra.mxu2 %v1882_v60  ;;  %v4292_v45 = vadd.f32 %v1544_v28, %v1365_v46  ;;  %v1883_v0 = vpack.c.bf16 %v1854_v50, %v1853_v41  ;;  %v1621_v41 = vld [vmem:[#allocation2 + $0x91] sm:$0xff]  ;;  %v1855_v50 = vld [vmem:[#allocation2 + $0xa7] sm:$0xff] }
 0x17c   : > { %2209 = vmatmul.bf16.gmra.mxu3 %v2116_v13 }
 0x17d   : > { %2443 = vmatmul.bf16.gmra.mxu0 %v4016_v55 }
 0x17e   : > { %v1079_v29 = vpop.f32.mrf.mxu2 }
 0x17f   : > { %v1132_v56 = vadd.f32 %v1079_v29, %v878_v10  ;;  %v1313_v27 = vpop.f32.mrf.mxu3 }
 0x180   : > { %v879_v58 = vpop.f32.mrf.mxu1 }
 0x181   : > { %v1366_v7 = vadd.f32 %v1313_v27, %v1132_v56  ;;  %v880_v28 = vadd.f32 %v879_v58, %v4068_v30 }
 0x182   : > { %v1549_v6 = vpop.f32.mrf.mxu0 }
 0x183   : > { %v4296_v18 = vadd.f32 %v1547_v63, %v1366_v7 }
 0x186   : > { %v1081_v47 = vpop.f32.mrf.mxu2 }
 0x187   : > { %v1133_v55 = vadd.f32 %v1081_v47, %v880_v28  ;;  %v1315_v62 = vpop.f32.mrf.mxu3  ;;  %v1856_v28 = vld [vmem:[#allocation2 + $0xaf] sm:$0xff] }
 0x188   : > { %v882_v60 = vpop.f32.mrf.mxu1 }
 0x189   : > { %v1367_v13 = vadd.f32 %v1315_v62, %v1133_v55  ;;  %v883_v30 = vadd.f32 %v882_v60, %v4086_v43  ;;  %v1649_v43 = vpack.c.bf16 %v1621_v41, %v1620_v4  ;;  %v1884_v62 = vpack.c.bf16 %v1856_v28, %v1855_v50  ;;  %v1623_v41 = vld [vmem:[#allocation2 + $0xb1] sm:$0xff]  ;;  %v1857_v50 = vld [vmem:[#allocation2 + $0xc7] sm:$0xff] }
 0x18a   : > { %v1552_v46 = vpop.f32.mrf.mxu0  ;;  %v1858_v28 = vld [vmem:[#allocation2 + $0xcf] sm:$0xff] }
 0x18b   : > { %1745 = vmatmul.bf16.gmra.mxu1 %v1648_v21  ;;  %1980 = vmatmul.bf16.gmra.mxu2 %v1883_v0  ;;  %v4299_v63 = vadd.f32 %v1549_v6, %v1367_v13  ;;  %v2118_v0 = vpack.c.bf16 %v2090_v1, %v2089_v20  ;;  %v2092_v20 = vld [vmem:[#allocation2 + $0xd0] sm:$0xff] }
 0x18c   : > { %2214 = vmatmul.bf16.gmra.mxu3 %v2117_v23 }
 0x18d   : > { %2448 = vmatmul.bf16.gmra.mxu0 %v4020_v59 }
 0x18e   : > { %v1084_v10 = vpop.f32.mrf.mxu2 }
 0x18f   : > { %v1134_v29 = vadd.f32 %v1084_v10, %v883_v30  ;;  %v1318_v56 = vpop.f32.mrf.mxu3 }
 0x190   : > { %v884_v27 = vpop.f32.mrf.mxu1 }
 0x191   : > { %v1368_v58 = vadd.f32 %v1318_v56, %v1134_v29  ;;  %v885_v6 = vadd.f32 %v884_v27, %v4100_v54 }
 0x192   : > { %v1554_v7 = vpop.f32.mrf.mxu0 }
 0x193   : > { %v4303_v16 = vadd.f32 %v1552_v46, %v1368_v58  ;;  %v1622_v58 = vld [vmem:[#allocation2 + $0xa9] sm:$0xff] }
 0x196   : > { %v1086_v47 = vpop.f32.mrf.mxu2 }
 0x197   : > { %v1135_v59 = vadd.f32 %v1086_v47, %v885_v6  ;;  %v1320_v55 = vpop.f32.mrf.mxu3  ;;  %v2091_v6 = vld [vmem:[#allocation2 + $0xc8] sm:$0xff] }
 0x198   : > { %v887_v21 = vpop.f32.mrf.mxu1 }
 0x199   : > { %v1369_v60 = vadd.f32 %v1320_v55, %v1135_v59  ;;  %v888_v54 = vadd.f32 %v887_v21, %v4111_v61  ;;  %v1650_v61 = vpack.c.bf16 %v1623_v41, %v1622_v58  ;;  %v1885_v59 = vpack.c.bf16 %v1858_v28, %v1857_v50  ;;  %v1625_v58 = vld [vmem:[#allocation2 + $0xd1] sm:$0xff]  ;;  %v1859_v41 = vld [vmem:[#allocation2 + $0xe7] sm:$0xff] }
 0x19a   : > { %v1557_v23 = vpop.f32.mrf.mxu0  ;;  %v1860_v50 = vld [vmem:[#allocation2 + $0xef] sm:$0xff] }
 0x19b   : > { %1750 = vmatmul.bf16.gmra.mxu1 %v1649_v43  ;;  %1985 = vmatmul.bf16.gmra.mxu2 %v1884_v62  ;;  %v4306_v13 = vadd.f32 %v1554_v7, %v1369_v60  ;;  %v2119_v43 = vpack.c.bf16 %v2092_v20, %v2091_v6  ;;  %v2093_v28 = vld [vmem:[#allocation2 + $0xe8] sm:$0xff] }
 0x19c   : > { %2219 = vmatmul.bf16.gmra.mxu3 %v2118_v0 }
 0x19d   : > { %2453 = vmatmul.bf16.gmra.mxu0 %v4052_v14 }
 0x19e   : > { %v1089_v46 = vpop.f32.mrf.mxu2 }
 0x19f   : > { %v1136_v30 = vadd.f32 %v1089_v46, %v888_v54  ;;  %v1323_v10 = vpop.f32.mrf.mxu3 }
 0x1a0   : > { %v889_v29 = vpop.f32.mrf.mxu1 }
 0x1a1   : > { %v1370_v56 = vadd.f32 %v1323_v10, %v1136_v30  ;;  %v890_v7 = vadd.f32 %v889_v29, %v4119_v8  ;;  %v1624_v29 = vld [vmem:[#allocation2 + $0xc9] sm:$0xff] }
 0x1a2   : > { %v1559_v27 = vpop.f32.mrf.mxu0 }
 0x1a3   : > { %v4310_v4 = vadd.f32 %v1557_v23, %v1370_v56 }
 0x1a6   : > { %v1091_v1 = vpop.f32.mrf.mxu2 }
 0x1a7   : > { %v1137_v14 = vadd.f32 %v1091_v1, %v890_v7  ;;  %v1325_v47 = vpop.f32.mrf.mxu3  ;;  %v2094_v7 = vld [vmem:[#allocation2 + $0xf0] sm:$0xff]  ;;  %v1886_v1 = vpack.c.bf16 %v1860_v50, %v1859_v41  ;;  %v2095_v41 = vld [vmem:[#allocation2 + $0x108] sm:$0xff] }
 0x1a8   : > { %v892_v55 = vpop.f32.mrf.mxu1  ;;  %v2096_v50 = vld [vmem:[#allocation2 + $0x110] sm:$0xff] }
 0x1a9   : > { %v1371_v62 = vadd.f32 %v1325_v47, %v1137_v14  ;;  %v893_v8 = vadd.f32 %v892_v55, %v4036_v3  ;;  %v1651_v3 = vpack.c.bf16 %v1625_v58, %v1624_v29  ;;  %v2120_v47 = vpack.c.bf16 %v2094_v7, %v2093_v28  ;;  %v1861_v29 = vld [vmem:[#allocation2 + $0x107] sm:$0xff]  ;;  %v1862_v58 = vld [vmem:[#allocation2 + $0x10f] sm:$0xff] }
 0x1aa   : > { %v1562_v21 = vpop.f32.mrf.mxu0  ;;  %v1887_v7 = vpack.c.bf16 %v1862_v58, %v1861_v29  ;;  %v2098_v29 = vld [vmem:[#allocation2 + $0x130] sm:$0xff] }
 0x1ab   : > { %1755 = vmatmul.bf16.gmra.mxu1 %v1650_v61  ;;  %1990 = vmatmul.bf16.gmra.mxu2 %v1885_v59  ;;  %v4313_v0 = vadd.f32 %v1559_v27, %v1371_v62 }
 0x1ac   : > { %2224 = vmatmul.bf16.gmra.mxu3 %v2119_v43 }
 0x1ad   : > { %2458 = vmatmul.bf16.gmra.mxu0 %v4072_v17 }
 0x1ae   : > { %v1094_v60 = vpop.f32.mrf.mxu2 }
 0x1af   : > { %v1138_v23 = vadd.f32 %v1094_v60, %v893_v8  ;;  %v1328_v54 = vpop.f32.mrf.mxu3 }
 0x1b0   : > { %v894_v46 = vpop.f32.mrf.mxu1 }
 0x1b1   : > { %v1372_v30 = vadd.f32 %v1328_v54, %v1138_v23  ;;  %v895_v27 = vadd.f32 %v894_v46, %v4050_v11  ;;  %v1626_v54 = vld [vmem:[#allocation2 + $0xe9] sm:$0xff] }
 0x1b2   : > { %v1564_v10 = vpop.f32.mrf.mxu0 }
 0x1b3   : > { %v4317_v56 = vadd.f32 %v1562_v21, %v1372_v30  ;;  %v1627_v30 = vld [vmem:[#allocation2 + $0xf1] sm:$0xff] }
 0x1b6   : > { %v1096_v6 = vpop.f32.mrf.mxu2 }
 0x1b7   : > { %v1139_v17 = vadd.f32 %v1096_v6, %v895_v27  ;;  %v1330_v20 = vpop.f32.mrf.mxu3 }
 0x1b8   : > { %v897_v14 = vpop.f32.mrf.mxu1 }
 0x1b9   : > { %v1373_v61 = vadd.f32 %v1330_v20, %v1139_v17  ;;  %v898_v11 = vadd.f32 %v897_v14, %v4062_v22  ;;  %v1652_v22 = vpack.c.bf16 %v1627_v30, %v1626_v54  ;;  %v2121_v17 = vpack.c.bf16 %v2096_v50, %v2095_v41  ;;  %v1864_v54 = vld [vmem:[#allocation2 + $0x12f] sm:$0xff] }
 0x1ba   : > { %v1567_v59 = vpop.f32.mrf.mxu0  ;;  %v2097_v30 = vld [vmem:[#allocation2 + $0x128] sm:$0xff] }
 0x1bb   : > { %1760 = vmatmul.bf16.gmra.mxu1 %v1651_v3  ;;  %1995 = vmatmul.bf16.gmra.mxu2 %v1886_v1  ;;  %v4320_v55 = vadd.f32 %v1564_v10, %v1373_v61 }
 0x1bc   : > { %2229 = vmatmul.bf16.gmra.mxu3 %v2120_v47 }
 0x1bd   : > { %2463 = vmatmul.bf16.gmra.mxu0 %v4104_v31 }
 0x1be   : > { %v1099_v43 = vpop.f32.mrf.mxu2 }
 0x1bf   : > { %v1140_v62 = vadd.f32 %v1099_v43, %v898_v11  ;;  %v1333_v21 = vpop.f32.mrf.mxu3 }
 0x1c0   : > { %v899_v8 = vpop.f32.mrf.mxu1 }
 0x1c1   : > { %v1374_v60 = vadd.f32 %v1333_v21, %v1140_v62  ;;  %v900_v10 = vadd.f32 %v899_v8, %v4070_v35  ;;  %v1628_v62 = vld [vmem:[#allocation2 + $0x109] sm:$0xff]  ;;  %v1629_v8 = vld [vmem:[#allocation2 + $0x111] sm:$0xff] }
 0x1c2   : > { %v1569_v23 = vpop.f32.mrf.mxu0 }
 0x1c3   : > { %v4324_v46 = vadd.f32 %v1567_v59, %v1374_v60  ;;  %v1863_v60 = vld [vmem:[#allocation2 + $0x127] sm:$0xff] }
 0x1c4   : > { %v1888_v41 = vpack.c.bf16 %v1864_v54, %v1863_v60 }
 0x1c6   : > { %v1101_v27 = vpop.f32.mrf.mxu2 }
 0x1c7   : > { %v1141_v31 = vadd.f32 %v1101_v27, %v900_v10  ;;  %v1335_v28 = vpop.f32.mrf.mxu3  ;;  %v2122_v27 = vpack.c.bf16 %v2098_v29, %v2097_v30 }
 0x1c8   : > { %v902_v6 = vpop.f32.mrf.mxu1 }
 0x1c9   : > { %v1375_v20 = vadd.f32 %v1335_v28, %v1141_v31  ;;  %v903_v35 = vadd.f32 %v902_v6, %v4088_v44  ;;  %v1653_v44 = vpack.c.bf16 %v1629_v8, %v1628_v62 }
 0x1ca   : > { %v1572_v3 = vpop.f32.mrf.mxu0 }
 0x1cb   : > { %1765 = vmatmul.bf16.gmra.mxu1 %v1652_v22  ;;  %2000 = vmatmul.bf16.gmra.mxu2 %v1887_v7  ;;  %v4327_v1 = vadd.f32 %v1569_v23, %v1375_v20 }
 0x1cc   : > { %2234 = vmatmul.bf16.gmra.mxu3 %v2121_v17 }
 0x1cd   : > { %2468 = vmatmul.bf16.gmra.mxu0 %v4123_v25 }
 0x1ce   : > { %v1104_v14 = vpop.f32.mrf.mxu2 }
 0x1cf   : > { %v1142_v47 = vadd.f32 %v1104_v14, %v903_v35  ;;  %v1338_v61 = vpop.f32.mrf.mxu3 }
 0x1d0   : > { %v904_v59 = vpop.f32.mrf.mxu1 }
 0x1d1   : > { %v1376_v11 = vadd.f32 %v1338_v61, %v1142_v47  ;;  %v905_v23 = vadd.f32 %v904_v59, %v4102_v34  ;;  %v2099_v61 = vld [vmem:[#allocation2 + $0x148] sm:$0xff]  ;;  %v2100_v59 = vld [vmem:[#allocation2 + $0x150] sm:$0xff] }
 0x1d2   : > { %v1574_v43 = vpop.f32.mrf.mxu0  ;;  %v2123_v60 = vpack.c.bf16 %v2100_v59, %v2099_v61 }
 0x1d3   : > { %v4331_v21 = vadd.f32 %v1572_v3, %v1376_v11 }
 0x1d6   : > { %v1106_v58 = vpop.f32.mrf.mxu2 }
 0x1d7   : > { %v1143_v25 = vadd.f32 %v1106_v58, %v905_v23  ;;  %v1340_v10 = vpop.f32.mrf.mxu3 }
 0x1d8   : > { %v907_v50 = vpop.f32.mrf.mxu1 }
 0x1d9   : > { %v1377_v31 = vadd.f32 %v1340_v10, %v1143_v25  ;;  %v908_v34 = vadd.f32 %v907_v50, %v4113_v42  ;;  %v1867_v50 = vld [vmem:[#allocation2 + $0x167] sm:$0xff] }
 0x1da   : > { %v1577_v28 = vpop.f32.mrf.mxu0 }
 0x1db   : > { %1770 = vmatmul.bf16.gmra.mxu1 %v1653_v44  ;;  %2005 = vmatmul.bf16.gmra.mxu2 %v1888_v41  ;;  %v4334_v22 = vadd.f32 %v1574_v43, %v1377_v31  ;;  %v1632_v44 = vld [vmem:[#allocation2 + $0x149] sm:$0xff]  ;;  %v1633_v41 = vld [vmem:[#allocation2 + $0x151] sm:$0xff] }
 0x1dc   : > { %2239 = vmatmul.bf16.gmra.mxu3 %v2122_v27  ;;  %v1868_v27 = vld [vmem:[#allocation2 + $0x16f] sm:$0xff] }
 0x1dd   : > { %2473 = vmatmul.bf16.gmra.mxu0 %v4143_v26  ;;  %v2101_v31 = vld [vmem:[#allocation2 + $0x168] sm:$0xff] }
 0x1de   : > { %v1109_v7 = vpop.f32.mrf.mxu2 }
 0x1df   : > { %v1144_v6 = vadd.f32 %v1109_v7, %v908_v34  ;;  %v1343_v17 = vpop.f32.mrf.mxu3 }
 0x1e0   : > { %v909_v20 = vpop.f32.mrf.mxu1 }
 0x1e1   : > { %v1378_v3 = vadd.f32 %v1343_v17, %v1144_v6  ;;  %v910_v47 = vadd.f32 %v909_v20, %v4121_v15  ;;  %v1655_v6 = vpack.c.bf16 %v1633_v41, %v1632_v44  ;;  %v1890_v17 = vpack.c.bf16 %v1868_v27, %v1867_v50 }
 0x1e2   : > { %v1579_v35 = vpop.f32.mrf.mxu0 }
 0x1e3   : > { %v4338_v14 = vadd.f32 %v1577_v28, %v1378_v3 }
 0x1e6   : > { %v1111_v11 = vpop.f32.mrf.mxu2 }
 0x1e7   : > { %v1145_v43 = vadd.f32 %v1111_v11, %v910_v47  ;;  %v1345_v62 = vpop.f32.mrf.mxu3 }
 0x1e8   : > { %v1736_v8 = vpop.f32.mrf.mxu1 }
 0x1e9   : > { %v1379_v54 = vadd.f32 %v1345_v62, %v1145_v43  ;;  %v1816_v58 = vadd.f32 %v1736_v8, %v4141_v53 }
 0x1ea   : > { %v2439_v23 = vpop.f32.mrf.mxu0 }
 0x1eb   : > { %1775 = vmatmul.bf16.gmra.mxu1 %v4143_v26  ;;  %2010 = vmatmul.bf16.gmra.mxu2 %v4145_v39  ;;  %v4343_v42 = vadd.f32 %v1579_v35, %v1379_v54  ;;  %v2102_v39 = vld [vmem:[#allocation2 + $0x170] sm:$0xff] }
 0x1ec   : > { %2244 = vmatmul.bf16.gmra.mxu3 %v2123_v60  ;;  %v2124_v3 = vpack.c.bf16 %v2102_v39, %v2101_v31  ;;  %v4651_v31 = vld [vmem:[#allocation3_spill] sm:$0xff] }
 0x1ed   : > { %2478 = vmatmul.bf16.gmra.mxu0 %v4156_v48 }
 0x1ee   : > { %v1971_v30 = vpop.f32.mrf.mxu2 }
 0x1ef   : > { %v2205_v15 = vpop.f32.mrf.mxu3  ;;  %v2051_v10 = vadd.f32 %v1971_v30, %v1816_v58 }
 0x1f0   : > { %v1738_v29 = vpop.f32.mrf.mxu1 }
 0x1f1   : > { %v1817_v26 = vadd.f32 %v1738_v29, %v4149_v37  ;;  %v2285_v34 = vadd.f32 %v2205_v15, %v2051_v10 }
 0x1f2   : > { %v2441_v25 = vpop.f32.mrf.mxu0 }
 0x1f3   : > { %v4348_v47 = vadd.f32 %v2439_v23, %v2285_v34 }
 0x1f6   : > { %v1973_v28 = vpop.f32.mrf.mxu2 }
 0x1f7   : > { %v2052_v7 = vadd.f32 %v1973_v28, %v1817_v26  ;;  %v2207_v48 = vpop.f32.mrf.mxu3 }
 0x1f8   : > { %v1741_v20 = vpop.f32.mrf.mxu1 }
 0x1f9   : > { %v2286_v53 = vadd.f32 %v2207_v48, %v2052_v7  ;;  %v1818_v62 = vadd.f32 %v1741_v20, %v4154_v32  ;;  %v4650_v32 = vld [vmem:[#allocation6_spill] sm:$0xff]  ;;  %v1636_v7 = vld [vmem:[#allocation2 + $0x189] sm:$0xff] }
 0x1fa   : > { %v2444_v35 = vpop.f32.mrf.mxu0  ;;  %v1637_v48 = vld [vmem:[#allocation2 + $0x191] sm:$0xff] }
 0x1fb   : > { %v4350_v61 = vadd.f32 %v2441_v25, %v2286_v53  ;;  %1780 = vmatmul.bf16.gmra.mxu1 %v1655_v6  ;;  %2015 = vmatmul.bf16.gmra.mxu2 %v1890_v17  ;;  %v1872_v6 = vld [vmem:[#allocation2 + $0x1af] sm:$0xff] }
 0x1fc   : > { %2249 = vmatmul.bf16.gmra.mxu3 %v2124_v3 }
 0x1fd   : > { %2483 = vmatmul.bf16.gmra.mxu0 %v4179_v49  ;;  %v3416_v37 = vpack.c.bf16 %v4350_v61, %v4348_v47 }
 0x1fe   : > { %v1976_v59 = vpop.f32.mrf.mxu2 }
 0x1ff   : > { %3417 = vst [vmem:[%s4357_s30] sm:$0xff] %v3416_v37   ;;  %v2210_v11 = vpop.f32.mrf.mxu3  ;;  %v2053_v60 = vadd.f32 %v1976_v59, %v1818_v62 }
 0x200   : > { %v1743_v43 = vpop.f32.mrf.mxu1 }
 0x201   : > { %v1819_v54 = vadd.f32 %v1743_v43, %v4161_v24  ;;  %v2287_v30 = vadd.f32 %v2210_v11, %v2053_v60  ;;  %v4653_v60 = vld [vmem:[#allocation7_spill] sm:$0xff] }
 0x202   : > { %v2446_v8 = vpop.f32.mrf.mxu0 }
 0x203   : > { %v4365_v44 = vadd.f32 %v2444_v35, %v2287_v30  ;;  %v1657_v35 = vpack.c.bf16 %v1637_v48, %v1636_v7 }
 0x206   : > { %v1978_v23 = vpop.f32.mrf.mxu2 }
 0x207   : > { %v2054_v15 = vadd.f32 %v1978_v23, %v1819_v54  ;;  %v2212_v29 = vpop.f32.mrf.mxu3  ;;  %v4654_v54 = vld [vmem:[#allocation10_spill] sm:$0xff] }
 0x208   : > { %v1746_v58 = vpop.f32.mrf.mxu1 }
 0x209   : > { %v2288_v25 = vadd.f32 %v2212_v29, %v2054_v15  ;;  %v1820_v39 = vadd.f32 %v1746_v58, %v4651_v31  ;;  %v4655_v58 = vld [vmem:[#allocation5_spill] sm:$0xff] }
 0x20a   : > { %v2449_v10 = vpop.f32.mrf.mxu0 }
 0x20b   : > { %v4367_v41 = vadd.f32 %v2446_v8, %v2288_v25  ;;  %1785 = vmatmul.bf16.gmra.mxu1 %v4179_v49  ;;  %2020 = vmatmul.bf16.gmra.mxu2 %v4181_v36  ;;  %v1871_v49 = vld [vmem:[#allocation2 + $0x1a7] sm:$0xff] }
 0x20c   : > { %2254 = vmatmul.bf16.gmra.mxu3 %v4183_v51  ;;  %v4652_v36 = vld [vmem:[#allocation4_spill] sm:$0xff]  ;;  %v1892_v37 = vpack.c.bf16 %v1872_v6, %v1871_v49  ;;  %v4657_v6 = vld [vmem:[#allocation11_spill] sm:$0xff] }
 0x20d   : > { %2488 = vmatmul.bf16.gmra.mxu0 %v4650_v32  ;;  %v3421_v24 = vpack.c.bf16 %v4367_v41, %v4365_v44 }
 0x20e   : > { %v1981_v50 = vpop.f32.mrf.mxu2 }
 0x20f   : > { %3508 = vst [vmem:[%s4357_s30 + $0x8] sm:$0xff] %v3421_v24   ;;  %v2215_v27 = vpop.f32.mrf.mxu3  ;;  %v2055_v34 = vadd.f32 %v1981_v50, %v1820_v39  ;;  %v4656_v24 = vld [vmem:[#allocation8_spill] sm:$0xff] }
 0x210   : > { %v1748_v26 = vpop.f32.mrf.mxu1 }
 0x211   : > { %v1821_v17 = vadd.f32 %v1748_v26, %v4652_v36  ;;  %v2289_v20 = vadd.f32 %v2215_v27, %v2055_v34 }
 0x212   : > { %v2451_v28 = vpop.f32.mrf.mxu0 }
 0x213   : > { %v4378_v62 = vadd.f32 %v2449_v10, %v2289_v20 }
 0x216   : > { %v1983_v51 = vpop.f32.mrf.mxu2 }
 0x217   : > { %v2056_v3 = vadd.f32 %v1983_v51, %v1821_v17  ;;  %v2217_v53 = vpop.f32.mrf.mxu3 }
 0x218   : > { %v1751_v59 = vpop.f32.mrf.mxu1 }
 0x219   : > { %v2290_v11 = vadd.f32 %v2217_v53, %v2056_v3  ;;  %v1822_v25 = vadd.f32 %v1751_v59, %v4655_v58  ;;  %v4658_v3 = vld [vmem:[#allocation9_spill] sm:$0xff] }
 0x21a   : > { %v2454_v43 = vpop.f32.mrf.mxu0  ;;  %v1640_v59 = vld [vmem:[#allocation2 + $0x1c9] sm:$0xff] }
 0x21b   : > { %v4380_v8 = vadd.f32 %v2451_v28, %v2290_v11  ;;  %1790 = vmatmul.bf16.gmra.mxu1 %v1657_v35  ;;  %2025 = vmatmul.bf16.gmra.mxu2 %v1892_v37  ;;  %v1641_v11 = vld [vmem:[#allocation2 + $0x1d1] sm:$0xff] }
 0x21c   : > { %2259 = vmatmul.bf16.gmra.mxu3 %v4653_v60  ;;  %v1876_v60 = vld [vmem:[#allocation2 + $0x1ef] sm:$0xff] }
 0x21d   : > { %2493 = vmatmul.bf16.gmra.mxu0 %v4654_v54  ;;  %v3426_v23 = vpack.c.bf16 %v4380_v8, %v4378_v62 }
 0x21e   : > { %v1986_v30 = vpop.f32.mrf.mxu2 }
 0x21f   : > { %3509 = vst [vmem:[%s4357_s30 + $0x10] sm:$0xff] %v3426_v23   ;;  %v2220_v15 = vpop.f32.mrf.mxu3  ;;  %v2057_v10 = vadd.f32 %v1986_v30, %v1822_v25 }
 0x220   : > { %v1753_v29 = vpop.f32.mrf.mxu1 }
 0x221   : > { %v1823_v50 = vadd.f32 %v1753_v29, %v4656_v24  ;;  %v2291_v26 = vadd.f32 %v2220_v15, %v2057_v10  ;;  %v1659_v29 = vpack.c.bf16 %v1641_v11, %v1640_v59 }
 0x222   : > { %v2456_v32 = vpop.f32.mrf.mxu0 }
 0x223   : > { %v4389_v48 = vadd.f32 %v2454_v43, %v2291_v26  ;;  %v1875_v43 = vld [vmem:[#allocation2 + $0x1e7] sm:$0xff] }
 0x224   : > { %v1894_v58 = vpack.c.bf16 %v1876_v60, %v1875_v43 }
 0x226   : > { %v1988_v27 = vpop.f32.mrf.mxu2 }
 0x227   : > { %v2058_v31 = vadd.f32 %v1988_v27, %v1823_v50  ;;  %v2222_v39 = vpop.f32.mrf.mxu3 }
 0x228   : > { %v1756_v28 = vpop.f32.mrf.mxu1 }
 0x229   : > { %v2292_v34 = vadd.f32 %v2222_v39, %v2058_v31  ;;  %v1824_v53 = vadd.f32 %v1756_v28, %v4658_v3  ;;  %v4660_v28 = vld [vmem:[#allocation13_spill] sm:$0xff] }
 0x22a   : > { %v2459_v7 = vpop.f32.mrf.mxu0 }
 0x22b   : > { %v4391_v49 = vadd.f32 %v2456_v32, %v2292_v34  ;;  %1795 = vmatmul.bf16.gmra.mxu1 %v4654_v54  ;;  %2030 = vmatmul.bf16.gmra.mxu2 %v4238_v9  ;;  %v4659_v9 = vld [vmem:[#allocation12_spill] sm:$0xff] }
 0x22c   : > { %2264 = vmatmul.bf16.gmra.mxu3 %v4657_v6 }
 0x22d   : > { %2498 = vmatmul.bf16.gmra.mxu0 %v4251_v19  ;;  %v3431_v36 = vpack.c.bf16 %v4391_v49, %v4389_v48 }
 0x22e   : > { %v1991_v17 = vpop.f32.mrf.mxu2 }
 0x22f   : > { %3510 = vst [vmem:[%s4357_s30 + $0x18] sm:$0xff] %v3431_v36   ;;  %v2225_v51 = vpop.f32.mrf.mxu3  ;;  %v2059_v37 = vadd.f32 %v1991_v17, %v1824_v53  ;;  %v4661_v36 = vld [vmem:[#allocation14_spill] sm:$0xff] }
 0x230   : > { %v1758_v20 = vpop.f32.mrf.mxu1 }
 0x231   : > { %v1825_v54 = vadd.f32 %v1758_v20, %v4659_v9  ;;  %v2293_v30 = vadd.f32 %v2225_v51, %v2059_v37  ;;  %v2345_v51 = vld [vmem:[#allocation2 + $0x209] sm:$0xff]  ;;  %v2346_v20 = vld [vmem:[#allocation2 + $0x211] sm:$0xff] }
 0x232   : > { %v2461_v35 = vpop.f32.mrf.mxu0  ;;  %v2363_v59 = vpack.c.bf16 %v2346_v20, %v2345_v51 }
 0x233   : > { %v4402_v24 = vadd.f32 %v2459_v7, %v2293_v30 }
 0x236   : > { %v1993_v23 = vpop.f32.mrf.mxu2 }
 0x237   : > { %v2060_v19 = vadd.f32 %v1993_v23, %v1825_v54  ;;  %v2227_v15 = vpop.f32.mrf.mxu3 }
 0x238   : > { %v1761_v25 = vpop.f32.mrf.mxu1 }
 0x239   : > { %v2294_v32 = vadd.f32 %v2227_v15, %v2060_v19  ;;  %v1826_v34 = vadd.f32 %v1761_v25, %v4660_v28  ;;  %v1879_v25 = vld [vmem:[#allocation2 + $0x227] sm:$0xff] }
 0x23a   : > { %v2464_v10 = vpop.f32.mrf.mxu0 }
 0x23b   : > { %v4404_v50 = vadd.f32 %v2461_v35, %v2294_v32  ;;  %1800 = vmatmul.bf16.gmra.mxu1 %v1659_v29  ;;  %2035 = vmatmul.bf16.gmra.mxu2 %v1894_v58  ;;  %v1880_v32 = vld [vmem:[#allocation2 + $0x22f] sm:$0xff] }
 0x23c   : > { %2269 = vmatmul.bf16.gmra.mxu3 %v4253_v40  ;;  %v1896_v28 = vpack.c.bf16 %v1880_v32, %v1879_v25 }
 0x23d   : > { %2503 = vmatmul.bf16.gmra.mxu0 %v4264_v12  ;;  %v3436_v27 = vpack.c.bf16 %v4404_v50, %v4402_v24 }
 0x23e   : > { %v1996_v26 = vpop.f32.mrf.mxu2 }
 0x23f   : > { %3511 = vst [vmem:[%s4357_s30 + $0x20] sm:$0xff] %v3436_v27   ;;  %v2230_v31 = vpop.f32.mrf.mxu3  ;;  %v2061_v7 = vadd.f32 %v1996_v26, %v1826_v34  ;;  %v2347_v27 = vld [vmem:[#allocation2 + $0x229] sm:$0xff] }
 0x240   : > { %v1763_v39 = vpop.f32.mrf.mxu1 }
 0x241   : > { %v1827_v17 = vadd.f32 %v1763_v39, %v4661_v36  ;;  %v2295_v40 = vadd.f32 %v2230_v31, %v2061_v7 }
 0x242   : > { %v2466_v6 = vpop.f32.mrf.mxu0 }
 0x243   : > { %v4413_v60 = vadd.f32 %v2464_v10, %v2295_v40  ;;  %v4662_v10 = vld [vmem:[#allocation15_spill] sm:$0xff] }
 0x246   : > { %v1998_v3 = vpop.f32.mrf.mxu2 }
 0x247   : > { %v2062_v53 = vadd.f32 %v1998_v3, %v1827_v17  ;;  %v2232_v35 = vpop.f32.mrf.mxu3 }
 0x248   : > { %v1766_v37 = vpop.f32.mrf.mxu1 }
 0x249   : > { %v2296_v11 = vadd.f32 %v2232_v35, %v2062_v53  ;;  %v1828_v15 = vadd.f32 %v1766_v37, %v4261_v52 }
 0x24a   : > { %v2469_v43 = vpop.f32.mrf.mxu0 }
 0x24b   : > { %v4415_v9 = vadd.f32 %v2466_v6, %v2296_v11  ;;  %1805 = vmatmul.bf16.gmra.mxu1 %v4264_v12  ;;  %2040 = vmatmul.bf16.gmra.mxu2 %v4266_v5  ;;  %v2348_v5 = vld [vmem:[#allocation2 + $0x231] sm:$0xff]  ;;  %v3560_v6 = vld [vmem:[#allocation2] sm:$0xff] }
 0x24c   : > { %2274 = vmatmul.bf16.gmra.mxu3 %v4272_v38  ;;  %v2130_v7 = vpack.c.bf16 %v3560_v6, %v3560_v6  ;;  %v2364_v36 = vpack.c.bf16 %v2348_v5, %v2347_v27 }
 0x24d   : > { %2508 = vmatmul.bf16.gmra.mxu0 %v2363_v59  ;;  %v3441_v54 = vpack.c.bf16 %v4415_v9, %v4413_v60 }
 0x24e   : > { %v2001_v23 = vpop.f32.mrf.mxu2 }
 0x24f   : > { %3512 = vst [vmem:[%s4357_s30 + $0x28] sm:$0xff] %v3441_v54   ;;  %v2235_v30 = vpop.f32.mrf.mxu3  ;;  %v2063_v58 = vadd.f32 %v2001_v23, %v1828_v15 }
 0x250   : > { %v1768_v19 = vpop.f32.mrf.mxu1 }
 0x251   : > { %v1829_v12 = vadd.f32 %v1768_v19, %v4662_v10  ;;  %v2297_v38 = vadd.f32 %v2235_v30, %v2063_v58 }
 0x252   : > { %v2471_v29 = vpop.f32.mrf.mxu0 }
 0x253   : > { %v4425_v51 = vadd.f32 %v2469_v43, %v2297_v38 }
 0x256   : > { %v2003_v26 = vpop.f32.mrf.mxu2 }
 0x257   : > { %v2064_v31 = vadd.f32 %v2003_v26, %v1829_v12  ;;  %v2237_v39 = vpop.f32.mrf.mxu3 }
 0x258   : > { %v1771_v34 = vpop.f32.mrf.mxu1 }
 0x259   : > { %v2298_v17 = vadd.f32 %v2237_v39, %v2064_v31  ;;  %v1830_v37 = vadd.f32 %v1771_v34, %v4280_v33 }
 0x25a   : > { %v2474_v52 = vpop.f32.mrf.mxu0 }
 0x25b   : > { %v4427_v20 = vadd.f32 %v2471_v29, %v2298_v17  ;;  %1810 = vmatmul.bf16.gmra.mxu1 %v2363_v59  ;;  %2045 = vmatmul.bf16.gmra.mxu2 %v1896_v28 }
 0x25c   : > { %2279 = vmatmul.bf16.gmra.mxu3 %v2130_v7 }
 0x25d   : > { %2513 = vmatmul.bf16.gmra.mxu0 %v2364_v36  ;;  %v3446_v3 = vpack.c.bf16 %v4427_v20, %v4425_v51 }
 0x25e   : > { %v2006_v40 = vpop.f32.mrf.mxu2 }
 0x25f   : > { %3513 = vst [vmem:[%s4357_s30 + $0x30] sm:$0xff] %v3446_v3   ;;  %v2240_v53 = vpop.f32.mrf.mxu3  ;;  %v2065_v54 = vadd.f32 %v2006_v40, %v1830_v37 }
 0x260   : > { %v1773_v35 = vpop.f32.mrf.mxu1 }
 0x261   : > { %v1831_v43 = vadd.f32 %v1773_v35, %v4285_v57  ;;  %v2299_v30 = vadd.f32 %v2240_v53, %v2065_v54 }
 0x262   : > { %v2476_v11 = vpop.f32.mrf.mxu0 }
 0x263   : > { %v4434_v25 = vadd.f32 %v2474_v52, %v2299_v30 }
 0x266   : > { %v2008_v23 = vpop.f32.mrf.mxu2 }
 0x267   : > { %v2066_v59 = vadd.f32 %v2008_v23, %v1831_v43  ;;  %v2242_v19 = vpop.f32.mrf.mxu3 }
 0x268   : > { %v1776_v15 = vpop.f32.mrf.mxu1 }
 0x269   : > { %v2300_v29 = vadd.f32 %v2242_v19, %v2066_v59  ;;  %v1832_v57 = vadd.f32 %v1776_v15, %v4289_v2 }
 0x26a   : > { %v2479_v58 = vpop.f32.mrf.mxu0 }
 0x26b   : > { %v4436_v32 = vadd.f32 %v2476_v11, %v2300_v29 }
 0x26d   : > { %v3451_v10 = vpack.c.bf16 %v4436_v32, %v4434_v25 }
 0x26e   : > { %v2011_v12 = vpop.f32.mrf.mxu2 }
 0x26f   : > { %3514 = vst [vmem:[%s4357_s30 + $0x38] sm:$0xff] %v3451_v10   ;;  %v2245_v33 = vpop.f32.mrf.mxu3  ;;  %v2067_v26 = vadd.f32 %v2011_v12, %v1832_v57 }
 0x270   : > { %v1778_v27 = vpop.f32.mrf.mxu1 }
 0x271   : > { %v1833_v38 = vadd.f32 %v1778_v27, %v4292_v45  ;;  %v2301_v39 = vadd.f32 %v2245_v33, %v2067_v26 }
 0x272   : > { %v2481_v5 = vpop.f32.mrf.mxu0 }
 0x273   : > { %v4443_v17 = vadd.f32 %v2479_v58, %v2301_v39 }
 0x276   : > { %v2013_v31 = vpop.f32.mrf.mxu2 }
 0x277   : > { %v2068_v28 = vadd.f32 %v2013_v31, %v1833_v38  ;;  %v2247_v34 = vpop.f32.mrf.mxu3 }
 0x278   : > { %v1781_v6 = vpop.f32.mrf.mxu1 }
 0x279   : > { %v2302_v7 = vadd.f32 %v2247_v34, %v2068_v28  ;;  %v1834_v45 = vadd.f32 %v1781_v6, %v4296_v18  ;;  %v2615_v34 = vadd.f32 %v4350_v61, %v4348_v47 }
 0x27a   : > { %v2484_v36 = vpop.f32.mrf.mxu0 }
 0x27b   : > { %v4445_v52 = vadd.f32 %v2481_v5, %v2302_v7 }
 0x27d   : > { %v3456_v3 = vpack.c.bf16 %v4445_v52, %v4443_v17 }
 0x27e   : > { %v2016_v40 = vpop.f32.mrf.mxu2 }
 0x27f   : > { %3515 = vst [vmem:[%s4357_s30 + $0x40] sm:$0xff] %v3456_v3   ;;  %v2250_v2 = vpop.f32.mrf.mxu3  ;;  %v2069_v37 = vadd.f32 %v2016_v40, %v1834_v45 }
 0x280   : > { %v1783_v53 = vpop.f32.mrf.mxu1 }
 0x281   : > { %v1835_v11 = vadd.f32 %v1783_v53, %v4299_v63  ;;  %v2303_v43 = vadd.f32 %v2250_v2, %v2069_v37 }
 0x282   : > { %v2486_v35 = vpop.f32.mrf.mxu0 }
 0x283   : > { %v4452_v29 = vadd.f32 %v2484_v36, %v2303_v43  ;;  %v2616_v36 = vadd.f32 %v2615_v34, %v4365_v44 }
 0x285   : > { %v2617_v40 = vadd.f32 %v2616_v36, %v4367_v41 }
 0x286   : > { %v2018_v54 = vpop.f32.mrf.mxu2 }
 0x287   : > { %v2070_v23 = vadd.f32 %v2018_v54, %v1835_v11  ;;  %v2252_v30 = vpop.f32.mrf.mxu3  ;;  %v2618_v53 = vadd.f32 %v2617_v40, %v4378_v62 }
 0x288   : > { %v1786_v59 = vpop.f32.mrf.mxu1 }
 0x289   : > { %v2304_v19 = vadd.f32 %v2252_v30, %v2070_v23  ;;  %v1836_v63 = vadd.f32 %v1786_v59, %v4303_v16  ;;  %v2619_v37 = vadd.f32 %v2618_v53, %v4380_v8 }
 0x28a   : > { %v2489_v15 = vpop.f32.mrf.mxu0 }
 0x28b   : > { %v4454_v58 = vadd.f32 %v2486_v35, %v2304_v19  ;;  %v2620_v43 = vadd.f32 %v2619_v37, %v4389_v48 }
 0x28d   : > { %v3461_v10 = vpack.c.bf16 %v4454_v58, %v4452_v29  ;;  %v2621_v30 = vadd.f32 %v2620_v43, %v4391_v49 }
 0x28e   : > { %v2021_v12 = vpop.f32.mrf.mxu2 }
 0x28f   : > { %3516 = vst [vmem:[%s4357_s30 + $0x48] sm:$0xff] %v3461_v10   ;;  %v2255_v18 = vpop.f32.mrf.mxu3  ;;  %v2071_v57 = vadd.f32 %v2021_v12, %v1836_v63 }
 0x290   : > { %v1788_v33 = vpop.f32.mrf.mxu1 }
 0x291   : > { %v1837_v5 = vadd.f32 %v1788_v33, %v4306_v13  ;;  %v2305_v38 = vadd.f32 %v2255_v18, %v2071_v57 }
 0x292   : > { %v2491_v27 = vpop.f32.mrf.mxu0 }
 0x293   : > { %v4464_v3 = vadd.f32 %v2489_v15, %v2305_v38  ;;  %v2622_v15 = vadd.f32 %v2621_v30, %v4402_v24 }
 0x295   : > { %v2623_v63 = vadd.f32 %v2622_v15, %v4404_v50 }
 0x296   : > { %v2023_v26 = vpop.f32.mrf.mxu2 }
 0x297   : > { %v2072_v31 = vadd.f32 %v2023_v26, %v1837_v5  ;;  %v2257_v39 = vpop.f32.mrf.mxu3  ;;  %v2624_v57 = vadd.f32 %v2623_v63, %v4413_v60 }
 0x298   : > { %v1791_v28 = vpop.f32.mrf.mxu1 }
 0x299   : > { %v2306_v6 = vadd.f32 %v2257_v39, %v2072_v31  ;;  %v1838_v11 = vadd.f32 %v1791_v28, %v4310_v4 }
 0x29a   : > { %v2494_v7 = vpop.f32.mrf.mxu0 }
 0x29b   : > { %v4466_v16 = vadd.f32 %v2491_v27, %v2306_v6 }
 0x29d   : > { %v3466_v13 = vpack.c.bf16 %v4466_v16, %v4464_v3 }
 0x29e   : > { %v2026_v2 = vpop.f32.mrf.mxu2 }
 0x29f   : > { %3517 = vst [vmem:[%s4357_s30 + $0x50] sm:$0xff] %v3466_v13   ;;  %v2260_v45 = vpop.f32.mrf.mxu3  ;;  %v2073_v23 = vadd.f32 %v2026_v2, %v1838_v11 }
 0x2a0   : > { %v1793_v35 = vpop.f32.mrf.mxu1 }
 0x2a1   : > { %v1839_v59 = vadd.f32 %v1793_v35, %v4313_v0  ;;  %v2307_v10 = vadd.f32 %v2260_v45, %v2073_v23  ;;  %v2625_v0 = vadd.f32 %v2624_v57, %v4415_v9 }
 0x2a2   : > { %v2496_v54 = vpop.f32.mrf.mxu0 }
 0x2a3   : > { %v4481_v5 = vadd.f32 %v2494_v7, %v2307_v10  ;;  %v2626_v39 = vadd.f32 %v2625_v0, %v4425_v51 }
 0x2a5   : > { %v2627_v6 = vadd.f32 %v2626_v39, %v4427_v20 }
 0x2a6   : > { %v2028_v19 = vpop.f32.mrf.mxu2 }
 0x2a7   : > { %v2074_v12 = vadd.f32 %v2028_v19, %v1839_v59  ;;  %v2262_v18 = vpop.f32.mrf.mxu3  ;;  %v2628_v7 = vadd.f32 %v2627_v6, %v4434_v25 }
 0x2a8   : > { %v1796_v33 = vpop.f32.mrf.mxu1 }
 0x2a9   : > { %v2308_v27 = vadd.f32 %v2262_v18, %v2074_v12  ;;  %v1840_v36 = vadd.f32 %v1796_v33, %v4317_v56  ;;  %v2629_v2 = vadd.f32 %v2628_v7, %v4436_v32 }
 0x2aa   : > { %v2499_v4 = vpop.f32.mrf.mxu0 }
 0x2ab   : > { %v4483_v26 = vadd.f32 %v2496_v54, %v2308_v27  ;;  %v2630_v35 = vadd.f32 %v2629_v2, %v4443_v17 }
 0x2ad   : > { %v3471_v38 = vpack.c.bf16 %v4483_v26, %v4481_v5  ;;  %v2631_v23 = vadd.f32 %v2630_v35, %v4445_v52 }
 0x2ae   : > { %v2031_v31 = vpop.f32.mrf.mxu2 }
 0x2af   : > { %3518 = vst [vmem:[%s4357_s30 + $0x58] sm:$0xff] %v3471_v38   ;;  %v2265_v28 = vpop.f32.mrf.mxu3  ;;  %v2075_v13 = vadd.f32 %v2031_v31, %v1840_v36  ;;  %v2632_v59 = vadd.f32 %v2631_v23, %v4452_v29 }
 0x2b0   : > { %v1798_v34 = vpop.f32.mrf.mxu1 }
 0x2b1   : > { %v1841_v53 = vadd.f32 %v1798_v34, %v4320_v55  ;;  %v2309_v37 = vadd.f32 %v2265_v28, %v2075_v13  ;;  %v2633_v55 = vadd.f32 %v2632_v59, %v4454_v58 }
 0x2b2   : > { %v2501_v40 = vpop.f32.mrf.mxu0 }
 0x2b3   : > { %v4498_v19 = vadd.f32 %v2499_v4, %v2309_v37  ;;  %v2634_v33 = vadd.f32 %v2633_v55, %v4464_v3 }
 0x2b5   : > { %v2635_v0 = vadd.f32 %v2634_v33, %v4466_v16 }
 0x2b6   : > { %v2033_v45 = vpop.f32.mrf.mxu2 }
 0x2b7   : > { %v2076_v11 = vadd.f32 %v2033_v45, %v1841_v53  ;;  %v2267_v54 = vpop.f32.mrf.mxu3  ;;  %v2636_v38 = vadd.f32 %v2635_v0, %v4481_v5 }
 0x2b8   : > { %v1801_v43 = vpop.f32.mrf.mxu1 }
 0x2b9   : > { %v2310_v30 = vadd.f32 %v2267_v54, %v2076_v11  ;;  %v1842_v12 = vadd.f32 %v1801_v43, %v4324_v46  ;;  %v2637_v39 = vadd.f32 %v2636_v38, %v4483_v26 }
 0x2ba   : > { %v2504_v56 = vpop.f32.mrf.mxu0 }
 0x2bb   : > { %v4500_v15 = vadd.f32 %v2501_v40, %v2310_v30  ;;  %v2638_v46 = vadd.f32 %v2637_v39, %v4498_v19 }
 0x2bd   : > { %v3476_v10 = vpack.c.bf16 %v4500_v15, %v4498_v19  ;;  %v2639_v13 = vadd.f32 %v2638_v46, %v4500_v15 }
 0x2be   : > { %v2036_v18 = vpop.f32.mrf.mxu2 }
 0x2bf   : > { %3519 = vst [vmem:[%s4357_s30 + $0x60] sm:$0xff] %v3476_v10   ;;  %v2077_v63 = vadd.f32 %v2036_v18, %v1842_v12  ;;  %v2270_v27 = vpop.f32.mrf.mxu3 }
 0x2c0   : > { %v1803_v57 = vpop.f32.mrf.mxu1 }
 0x2c1   : > { %v2311_v31 = vadd.f32 %v2270_v27, %v2077_v63  ;;  %v1843_v28 = vadd.f32 %v1803_v57, %v4327_v1 }
 0x2c2   : > { %v2506_v4 = vpop.f32.mrf.mxu0 }
 0x2c3   : > { %v4513_v6 = vadd.f32 %v2504_v56, %v2311_v31 }
 0x2c5   : > { %v2640_v53 = vadd.f32 %v2639_v13, %v4513_v6 }
 0x2c6   : > { %v2038_v34 = vpop.f32.mrf.mxu2 }
 0x2c7   : > { %v2078_v36 = vadd.f32 %v2038_v34, %v1843_v28  ;;  %v2272_v40 = vpop.f32.mrf.mxu3 }
 0x2c8   : > { %v1806_v7 = vpop.f32.mrf.mxu1 }
 0x2c9   : > { %v2312_v2 = vadd.f32 %v2272_v40, %v2078_v36  ;;  %v1844_v11 = vadd.f32 %v1806_v7, %v4331_v21 }
 0x2ca   : > { %v2509_v35 = vpop.f32.mrf.mxu0 }
 0x2cb   : > { %v4517_v45 = vadd.f32 %v2506_v4, %v2312_v2 }
 0x2cd   : > { %v3481_v1 = vpack.c.bf16 %v4517_v45, %v4513_v6  ;;  %v2641_v37 = vadd.f32 %v2640_v53, %v4517_v45 }
 0x2ce   : > { %v2041_v54 = vpop.f32.mrf.mxu2 }
 0x2cf   : > { %3520 = vst [vmem:[%s4357_s30 + $0x68] sm:$0xff] %v3481_v1   ;;  %v2079_v43 = vadd.f32 %v2041_v54, %v1844_v11  ;;  %v2275_v23 = vpop.f32.mrf.mxu3 }
 0x2d0   : > { %v1808_v30 = vpop.f32.mrf.mxu1 }
 0x2d1   : > { %v2313_v56 = vadd.f32 %v2275_v23, %v2079_v43  ;;  %v1845_v10 = vadd.f32 %v1808_v30, %v4334_v22 }
 0x2d2   : > { %v2511_v12 = vpop.f32.mrf.mxu0 }
 0x2d3   : > { %v4524_v59 = vadd.f32 %v2509_v35, %v2313_v56 }
 0x2d5   : > { %v2642_v55 = vadd.f32 %v2641_v37, %v4524_v59 }
 0x2d6   : > { %v2043_v18 = vpop.f32.mrf.mxu2 }
 0x2d7   : > { %v2080_v33 = vadd.f32 %v2043_v18, %v1845_v10  ;;  %v2277_v63 = vpop.f32.mrf.mxu3 }
 0x2d8   : > { %v1811_v27 = vpop.f32.mrf.mxu1 }
 0x2d9   : > { %v2314_v57 = vadd.f32 %v2277_v63, %v2080_v33  ;;  %v1846_v38 = vadd.f32 %v1811_v27, %v4338_v14 }
 0x2da   : > { %v2514_v28 = vpop.f32.mrf.mxu0 }
 0x2db   : > { %v4528_v21 = vadd.f32 %v2511_v12, %v2314_v57 }
 0x2dd   : > { %v3486_v0 = vpack.c.bf16 %v4528_v21, %v4524_v59  ;;  %v2643_v4 = vadd.f32 %v2642_v55, %v4528_v21 }
 0x2de   : > { %v2046_v31 = vpop.f32.mrf.mxu2 }
 0x2df   : > { %3521 = vst [vmem:[%s4357_s30 + $0x70] sm:$0xff] %v3486_v0   ;;  %v2081_v39 = vadd.f32 %v2046_v31, %v1846_v38  ;;  %v2280_v22 = vpop.f32.mrf.mxu3 }
 0x2e0   : > { %v1813_v46 = vpop.f32.mrf.mxu1 }
 0x2e1   : > { %v2315_v34 = vadd.f32 %v2280_v22, %v2081_v39  ;;  %v1847_v7 = vadd.f32 %v1813_v46, %v4343_v42 }
 0x2e2   : > { %v2516_v1 = vpop.f32.mrf.mxu0 }
 0x2e3   : > { %v4535_v36 = vadd.f32 %v2514_v28, %v2315_v34 }
 0x2e5   : > { %v2644_v40 = vadd.f32 %v2643_v4, %v4535_v36 }
 0x2e6   : > { %v2048_v13 = vpop.f32.mrf.mxu2 }
 0x2e7   : > { %v2082_v2 = vadd.f32 %v2048_v13, %v1847_v7  ;;  %v2282_v53 = vpop.f32.mrf.mxu3 }
 0x2e9   : > { %v2316_v35 = vadd.f32 %v2282_v53, %v2082_v2 }
 0x2eb   : > { %v4539_v14 = vadd.f32 %v2516_v1, %v2316_v35 }
 0x2ed   : > { %v3491_v37 = vpack.c.bf16 %v4539_v14, %v4535_v36  ;;  %v2645_v11 = vadd.f32 %v2644_v40, %v4539_v14 }
 0x2ef   : > { %3522 = vst [vmem:[%s4357_s30 + $0x78] sm:$0xff] %v3491_v37   ;;  %v2646_v54 = vrot.slane %v2645_v11, 4 }
 0x2f1   : > { %v2647_v43 = vadd.f32 %v2646_v54, %v2645_v11 }
 0x2f3   : > { %v2648_v23 = vrot.slane %v2647_v43, 2 }
 0x2f5   : > { %v2649_v30 = vadd.f32 %v2648_v23, %v2647_v43 }
 0x2f7   : > { %v2650_v56 = vrot.slane %v2649_v30, 1 }
 0x2f9   : > { %v4545_v55 = vadd.f32 %v2650_v56, %v2649_v30 }
 0x2fb   : > { %v4548_v42 = vmul.f32 0.00390625, %v4545_v55 }
 0x2fd   : > { %v2653_v10 = vsub.f32 %v4348_v47, %v4548_v42  ;;  %v2654_v12 = vsub.f32 %v4350_v61, %v4548_v42  ;;  %v2655_v18 = vsub.f32 %v4365_v44, %v4548_v42  ;;  %v2656_v27 = vsub.f32 %v4367_v41, %v4548_v42 }
 0x2fe   : > { %v2657_v57 = vsub.f32 %v4378_v62, %v4548_v42  ;;  %v2658_v38 = vsub.f32 %v4380_v8, %v4548_v42  ;;  %v2659_v61 = vsub.f32 %v4389_v48, %v4548_v42  ;;  %v2660_v22 = vsub.f32 %v4391_v49, %v4548_v42 }
 0x2ff   : > { %v2685_v33 = vmul.f32 %v2653_v10, %v2653_v10  ;;  %v2686_v63 = vmul.f32 %v2654_v12, %v2654_v12  ;;  %v2687_v0 = vmul.f32 %v2655_v18, %v2655_v18  ;;  %v2688_v47 = vmul.f32 %v2656_v27, %v2656_v27 }
 0x300   : > { %v2689_v39 = vmul.f32 %v2657_v57, %v2657_v57  ;;  %v2690_v28 = vmul.f32 %v2658_v38, %v2658_v38  ;;  %v2661_v62 = vsub.f32 %v4402_v24, %v4548_v42  ;;  %v2691_v34 = vmul.f32 %v2659_v61, %v2659_v61 }
 0x301   : > { %v2717_v4 = vadd.f32 %v2686_v63, %v2685_v33  ;;  %v2662_v8 = vsub.f32 %v4404_v50, %v4548_v42  ;;  %v2692_v40 = vmul.f32 %v2660_v22, %v2660_v22  ;;  %v2663_v48 = vsub.f32 %v4413_v60, %v4548_v42 }
 0x302   : > { %v2693_v13 = vmul.f32 %v2661_v62, %v2661_v62  ;;  %v2664_v49 = vsub.f32 %v4415_v9, %v4548_v42  ;;  %v2665_v24 = vsub.f32 %v4425_v51, %v4548_v42  ;;  %v2666_v50 = vsub.f32 %v4427_v20, %v4548_v42 }
 0x303   : > { %v2718_v31 = vadd.f32 %v2717_v4, %v2687_v0  ;;  %v2694_v53 = vmul.f32 %v2662_v8, %v2662_v8  ;;  %v2695_v1 = vmul.f32 %v2663_v48, %v2663_v48  ;;  %v2667_v60 = vsub.f32 %v4434_v25, %v4548_v42 }
 0x304   : > { %v2696_v11 = vmul.f32 %v2664_v49, %v2664_v49  ;;  %v2697_v43 = vmul.f32 %v2665_v24, %v2665_v24  ;;  %v2668_v9 = vsub.f32 %v4436_v32, %v4548_v42  ;;  %v2698_v30 = vmul.f32 %v2666_v50, %v2666_v50 }
 0x305   : > { %v2719_v44 = vadd.f32 %v2718_v31, %v2688_v47  ;;  %v2669_v51 = vsub.f32 %v4443_v17, %v4548_v42  ;;  %v2699_v10 = vmul.f32 %v2667_v60, %v2667_v60  ;;  %v2670_v20 = vsub.f32 %v4445_v52, %v4548_v42 }
 0x306   : > { %v2700_v18 = vmul.f32 %v2668_v9, %v2668_v9  ;;  %v2671_v25 = vsub.f32 %v4452_v29, %v4548_v42  ;;  %v2672_v32 = vsub.f32 %v4454_v58, %v4548_v42  ;;  %v2673_v17 = vsub.f32 %v4464_v3, %v4548_v42 }
 0x307   : > { %v2720_v41 = vadd.f32 %v2719_v44, %v2689_v39  ;;  %v2701_v63 = vmul.f32 %v2669_v51, %v2669_v51  ;;  %v2702_v57 = vmul.f32 %v2670_v20, %v2670_v20  ;;  %v2674_v52 = vsub.f32 %v4466_v16, %v4548_v42 }
 0x308   : > { %v2703_v4 = vmul.f32 %v2671_v25, %v2671_v25  ;;  %v2704_v47 = vmul.f32 %v2672_v32, %v2672_v32  ;;  %v2675_v29 = vsub.f32 %v4481_v5, %v4548_v42  ;;  %v2705_v61 = vmul.f32 %v2673_v17, %v2673_v17 }
 0x309   : > { %v2721_v46 = vadd.f32 %v2720_v41, %v2690_v28  ;;  %v2676_v58 = vsub.f32 %v4483_v26, %v4548_v42  ;;  %v2706_v44 = vmul.f32 %v2674_v52, %v2674_v52  ;;  %v2677_v3 = vsub.f32 %v4498_v19, %v4548_v42 }
 0x30a   : > { %v2707_v28 = vmul.f32 %v2675_v29, %v2675_v29  ;;  %v2678_v16 = vsub.f32 %v4500_v15, %v4548_v42  ;;  %v2679_v5 = vsub.f32 %v4513_v6, %v4548_v42  ;;  %v2680_v26 = vsub.f32 %v4517_v45, %v4548_v42 }
 0x30b   : > { %v2722_v7 = vadd.f32 %v2721_v46, %v2691_v34  ;;  %v2708_v62 = vmul.f32 %v2676_v58, %v2676_v58  ;;  %v2709_v46 = vmul.f32 %v2677_v3, %v2677_v3  ;;  %v2681_v19 = vsub.f32 %v4524_v59, %v4548_v42 }
 0x30c   : > { %v2711_v48 = vmul.f32 %v2679_v5, %v2679_v5  ;;  %v2682_v15 = vsub.f32 %v4528_v21, %v4548_v42  ;;  %v2683_v6 = vsub.f32 %v4535_v36, %v4548_v42  ;;  %v2684_v45 = vsub.f32 %v4539_v14, %v4548_v42 }
 0x30d   : > { %v2723_v2 = vadd.f32 %v2722_v7, %v2692_v40  ;;  %v2710_v40 = vmul.f32 %v2678_v16, %v2678_v16  ;;  %v2754_v21 = vlaneseq }
 0x30e   : > { %v2714_v24 = vmul.f32 %v2682_v15, %v2682_v15  ;;  %v2716_v50 = vmul.f32 %v2684_v45, %v2684_v45 }
 0x30f   : > { %v2724_v35 = vadd.f32 %v2723_v2, %v2693_v13  ;;  %v2712_v2 = vmul.f32 %v2680_v26, %v2680_v26  ;;  %v2755_v9 = vshrl.u32 %v2754_v21, 7 }
 0x311   : > { %v2725_v37 = vadd.f32 %v2724_v35, %v2694_v53  ;;  %v2713_v53 = vmul.f32 %v2681_v19, %v2681_v19  ;;  %vm2757_vm0 = vcmp.eq.s32.totalorder %v2755_v9, 1  ;;  %vm2756_vm1 = vcmp.eq.s32.totalorder %v2755_v9, 0 }
 0x313   : > { %v2726_v54 = vadd.f32 %v2725_v37, %v2695_v1  ;;  %v2715_v37 = vmul.f32 %v2683_v6, %v2683_v6 }
 0x315   : > { %v2727_v23 = vadd.f32 %v2726_v54, %v2696_v11 }
 0x317   : > { %v2728_v56 = vadd.f32 %v2727_v23, %v2697_v43 }
 0x319   : > { %v2729_v12 = vadd.f32 %v2728_v56, %v2698_v30 }
 0x31b   : > { %v2730_v33 = vadd.f32 %v2729_v12, %v2699_v10 }
 0x31d   : > { %v2731_v27 = vadd.f32 %v2730_v33, %v2700_v18 }
 0x31f   : > { %v2732_v0 = vadd.f32 %v2731_v27, %v2701_v63 }
 0x321   : > { %v2733_v38 = vadd.f32 %v2732_v0, %v2702_v57 }
 0x323   : > { %v2734_v31 = vadd.f32 %v2733_v38, %v2703_v4 }
 0x325   : > { %v2735_v39 = vadd.f32 %v2734_v31, %v2704_v47 }
 0x327   : > { %v2736_v22 = vadd.f32 %v2735_v39, %v2705_v61 }
 0x329   : > { %v2737_v41 = vadd.f32 %v2736_v22, %v2706_v44 }
 0x32b   : > { %v2738_v34 = vadd.f32 %v2737_v41, %v2707_v28 }
 0x32d   : > { %v2739_v8 = vadd.f32 %v2738_v34, %v2708_v62 }
 0x32f   : > { %v2740_v7 = vadd.f32 %v2739_v8, %v2709_v46 }
 0x331   : > { %v2741_v13 = vadd.f32 %v2740_v7, %v2710_v40 }
 0x333   : > { %v2742_v49 = vadd.f32 %v2741_v13, %v2711_v48 }
 0x335   : > { %v2743_v35 = vadd.f32 %v2742_v49, %v2712_v2 }
 0x337   : > { %v2744_v1 = vadd.f32 %v2743_v35, %v2713_v53 }
 0x339   : > { %v2745_v59 = vadd.f32 %v2744_v1, %v2714_v24 }
 0x33b   : > { %v2746_v11 = vadd.f32 %v2745_v59, %v2715_v37 }
 0x33d   : > { %v2747_v54 = vadd.f32 %v2746_v11, %v2716_v50 }
 0x33f   : > { %v2748_v60 = vrot.slane %v2747_v54, 4 }
 0x341   : > { %v2749_v43 = vadd.f32 %v2748_v60, %v2747_v54 }
 0x343   : > { %v2750_v23 = vrot.slane %v2749_v43, 2 }
 0x345   : > { %v2751_v30 = vadd.f32 %v2750_v23, %v2749_v43 }
 0x347   : > { %v2752_v36 = vrot.slane %v2751_v30, 1 }
 0x349   : > { %v2753_v56 = vadd.f32 %v2752_v36, %v2751_v30 }
 0x34b   : > { %v2758_v14 = vsel %vm2757_vm0, %v2753_v56, 0.0 }
 0x34c   : > { %v2759_v42 = vsel %vm2756_vm1, %v4545_v55, %v2758_v14 }
 0x34d   : > { %2760 = vst [vmem:[%s235_s8] sm:$0xff] %v2759_v42 }
 0x34e PF: > { %s16_s18 = sadd.s32 1, %s3567_s18  }
 0x34f   : > { %p13_p4 = scmp.ge.s32.totalorder %s16_s18, 4  }
 0x351   :  { %15 = sbr.rel (!%p13_p4) target bundleno = 1 (0x1), region = 88 }

</bundles_post_ra>
